<compile_context>
chip_gen: v5e
topology: v5e:2x2
jax: 0.10.0
libtpu: 0.0.40
codegen_flags: <defaults>
</compile_context>

<pallas_src>
import functools

import numpy as np
import jax
import jax.numpy as jnp
from jax import lax
from jax.experimental import pallas as pl
from jax.experimental.pallas import tpu as pltpu


# --------------------------------------------------------------------------
# Pass 1 kernels: dilated conv + per-tile (sum, sum^2) statistics
# --------------------------------------------------------------------------
def _conv_stats_im2col_kernel(x_ref, w_ref, y_ref, s_ref, patch_ref, *,
                              K, rate, W, Cin):
    # Small-Cin path: build (rows, K*K*Cin) im2col tile once, single fused dot.
    # x_ref:     (K, TH, W_pad, Cin)   row-shifted padded input slabs
    # w_ref:     (K*K*Cin, Cpad)       flattened conv weights (Cout zero-padded)
    # y_ref:     (rows, Cpad)          conv output tile (lane dense)
    # s_ref:     (2, Cpad)             per-tile (sum, sum of squares), f32
    # patch_ref: (rows, K*K*Cin)       im2col VMEM scratch
    x = x_ref[...]
    rows = patch_ref.shape[0]
    for kh in range(K):
        for kw in range(K):
            t = kh * K + kw
            ws = kw * rate
            patch_ref[:, t * Cin:(t + 1) * Cin] = (
                x[kh, :, ws:ws + W, :].reshape(rows, Cin))
    y = jnp.dot(patch_ref[...], w_ref[...], preferred_element_type=jnp.float32)
    y_ref[...] = y.astype(y_ref.dtype)
    s_ref[0:1, :] = jnp.sum(y, axis=0, keepdims=True)
    s_ref[1:2, :] = jnp.sum(y * y, axis=0, keepdims=True)


def _conv_stats_taps_kernel(x_ref, w_ref, y_ref, s_ref, *, K, rate, W, Cin):
    # Large-Cin path: K*K accumulated dots of depth Cin, no im2col scratch.
    rows, cpad = y_ref.shape
    acc = jnp.zeros((rows, cpad), jnp.float32)
    for kh in range(K):
        xk = x_ref[kh]                       # (TH, W_pad, Cin)
        for kw in range(K):
            t = kh * K + kw
            ws = kw * rate
            tap = xk[:, ws:ws + W, :].reshape(rows, Cin)
            acc = acc + jnp.dot(tap, w_ref[t * Cin:(t + 1) * Cin, :],
                                preferred_element_type=jnp.float32)
    y_ref[...] = acc.astype(y_ref.dtype)
    s_ref[0:1, :] = jnp.sum(acc, axis=0, keepdims=True)
    s_ref[1:2, :] = jnp.sum(acc * acc, axis=0, keepdims=True)


# --------------------------------------------------------------------------
# Pass 2 kernel: y * scale + shift, ReLU (scale/shift precomputed in wrapper)
# --------------------------------------------------------------------------
def _bn_relu_kernel(y_ref, ss_ref, o_ref):
    scale = ss_ref[0:1, :]
    shift = ss_ref[1:2, :]
    y = y_ref[...].astype(jnp.float32)
    o_ref[...] = jnp.maximum(y * scale + shift, 0.0)


# --------------------------------------------------------------------------
# VMEM budgeting / tile selection (generation aware)
# --------------------------------------------------------------------------
def _vmem_budget():
    cap = 64 * 1024 * 1024                      # conservative fallback (v7x)
    try:
        cap = int(pltpu.get_tpu_info().vmem_capacity_bytes)
    except Exception:
        pass
    budget = min(int(cap * 0.6), 96 * 1024 * 1024)   # headroom for compiler
    return budget, cap


def _pick_conv_tile(H, W, W_pad, Cin, K, cpad, in_isz, y_isz, use_im2col,
                    budget_bytes, target_rows=2048, row_align=8):
    """Largest divisor of H whose full (double-buffered) pass-1 block working
    set -- input, weights, conv output, stats, im2col scratch -- fits."""
    def block_bytes(th):
        rows = th * W
        inp = 2 * K * th * W_pad * Cin * in_isz      # double-buffered input
        wgt = 2 * K * K * Cin * cpad * in_isz        # weight slab (2 bufs)
        yout = 2 * rows * cpad * y_isz               # double-buffered conv out
        sts = 2 * 2 * cpad * 4
        patch = rows * K * K * Cin * in_isz if use_im2col else 0
        return inp + wgt + yout + sts + patch

    for th in range(H, 0, -1):
        if H % th:
            continue
        rows = th * W
        if rows % row_align and th != H:             # keep (8/16,128)-friendly
            continue
        if rows <= target_rows and block_bytes(th) <= budget_bytes:
            return th, block_bytes(th)
    return 1, block_bytes(1)


def _pick_bn_tile(H, W, cpad, y_isz, budget_bytes, target_rows=16384,
                  row_align=8):
    """Pass 2 is purely memory bound; pick the biggest tile that fits."""
    def block_bytes(th):
        rows = th * W
        return 2 * rows * cpad * y_isz + 2 * rows * cpad * 4 + 2 * cpad * 4

    for th in range(H, 0, -1):
        if H % th:
            continue
        rows = th * W
        if rows % row_align and th != H:
            continue
        if rows <= target_rows and block_bytes(th) <= budget_bytes:
            return th, block_bytes(th)
    return 1, block_bytes(1)


# --------------------------------------------------------------------------
# Wrapper: ASPP_module forward
# --------------------------------------------------------------------------
def aspp_module(x_nchw, w_oihw, gamma, beta, *, rate, eps=1e-5,
                matmul_dtype=None):
    """Forward pass of ASPP_module.  x_nchw: (N, Cin, H, W) like PyTorch."""
    N, Cin, H, W = x_nchw.shape
    Cout, _, K, _ = w_oihw.shape
    pad = 0 if K == 1 else rate
    W_pad = W + 2 * pad
    Cpad = max(128, ((Cout + 127) // 128) * 128)     # lane-dense out channels

    use_im2col = Cin < 128
    if matmul_dtype is None:
        # bf16 operands only in the compute-bound (large-Cin) regime; f32
        # otherwise so the small-Cin path stays numerically tight.
        matmul_dtype = jnp.float32 if use_im2col else jnp.bfloat16
    in_isz = np.dtype(matmul_dtype).itemsize
    y_dtype = matmul_dtype                           # inter-pass staging dtype
    y_isz = np.dtype(y_dtype).itemsize
    row_align = 16 if y_isz == 2 else 8

    budget, cap = _vmem_budget()

    # ---- layout glue: NCHW -> NHWC, zero pad, K row-shifted slabs ----------
    x = jnp.transpose(x_nchw, (0, 2, 3, 1)).astype(matmul_dtype)
    x = jnp.pad(x, ((0, 0), (pad, pad), (pad, pad), (0, 0)))
    # xs[kh] = padded input shifted down by kh*rate rows -> every H-tile's
    # input becomes a disjoint rectangular block (no halo overlap needed).
    # TODO(synk): for small-Cin / memory-bound shapes, replace this K-way
    # replication with a manual halo DMA (memory_space=pl.ANY + async copy).
    xs = jnp.stack([x[:, kh * rate: kh * rate + H, :, :] for kh in range(K)],
                   axis=0)                           # (K, N, H, W_pad, Cin)

    # weights (O,I,Kh,Kw) -> (Kh,Kw,I,O) -> (K*K*Cin, Cout) -> pad O to Cpad
    w2 = jnp.transpose(w_oihw, (2, 3, 1, 0)).astype(matmul_dtype)
    w2 = w2.reshape(K * K * Cin, Cout)
    w2 = jnp.pad(w2, ((0, 0), (0, Cpad - Cout)))

    # ---- pass 1: dilated conv + partial BN statistics ----------------------
    TH, blk1 = _pick_conv_tile(H, W, W_pad, Cin, K, Cpad, in_isz, y_isz,
                               use_im2col, budget, row_align=row_align)
    n_ht = H // TH
    rows = TH * W
    count = float(N * H * W)
    vmem1 = min(max(32 * 1024 * 1024, 2 * blk1), int(cap * 0.8))

    if use_im2col:
        conv_kernel = functools.partial(_conv_stats_im2col_kernel,
                                        K=K, rate=rate, W=W, Cin=Cin)
        scratch = [pltpu.VMEM((rows, K * K * Cin), matmul_dtype)]
    else:
        conv_kernel = functools.partial(_conv_stats_taps_kernel,
                                        K=K, rate=rate, W=W, Cin=Cin)
        scratch = []

    flops = 2 * N * H * W * K * K * Cin * Cpad
    bytes_acc = (xs.size * in_isz + w2.size * in_isz
                 + N * H * W * Cpad * y_isz + N * n_ht * 2 * Cpad * 4)

    y, part_stats = pl.pallas_call(
        conv_kernel,
        grid=(N, n_ht),
        in_specs=[
            pl.BlockSpec((K, None, TH, W_pad, Cin), lambda n, i: (0, n, i, 0, 0)),
            pl.BlockSpec((K * K * Cin, Cpad), lambda n, i: (0, 0)),
        ],
        out_specs=[
            pl.BlockSpec((None, rows, Cpad), lambda n, i: (n, i, 0)),
            pl.BlockSpec((None, None, 2, Cpad), lambda n, i: (n, i, 0, 0)),
        ],
        out_shape=[
            jax.ShapeDtypeStruct((N, H * W, Cpad), y_dtype),
            jax.ShapeDtypeStruct((N, n_ht, 2, Cpad), jnp.float32),
        ],
        scratch_shapes=scratch,
        compiler_params=pltpu.CompilerParams(
            dimension_semantics=("parallel", "parallel"),
            vmem_limit_bytes=vmem1),
        cost_estimate=pl.CostEstimate(
            flops=flops, transcendentals=0, bytes_accessed=bytes_acc),
    )(xs, w2)

    # ---- reduce partial stats; precompute per-channel scale/shift ----------
    stats = jnp.sum(part_stats, axis=(0, 1))         # (2, Cpad), f32
    mean = stats[0] / count
    var = jnp.maximum(stats[1] / count - mean * mean, 0.0)
    # NOTE: E[y^2]-E[y]^2 in f32; conv outputs are near zero-mean (kaiming, no
    # bias) so cancellation is benign here.
    # TODO(synk): switch to Welford-style tile-partial merging if configs with
    # |mean| >> std show up.
    g = jnp.pad(gamma.astype(jnp.float32), (0, Cpad - Cout), constant_values=1.0)
    b = jnp.pad(beta.astype(jnp.float32), (0, Cpad - Cout))
    scale = g * lax.rsqrt(var + eps)
    shift = b - mean * scale
    ss = jnp.stack([scale, shift], axis=0)            # (2, Cpad)

    # ---- pass 2: BatchNorm (as FMA) + ReLU, with its own larger tile -------
    TH2, blk2 = _pick_bn_tile(H, W, Cpad, y_isz, budget, row_align=row_align)
    n2 = H // TH2
    rows2 = TH2 * W
    vmem2 = min(max(32 * 1024 * 1024, 2 * blk2), int(cap * 0.8))

    out = pl.pallas_call(
        _bn_relu_kernel,
        grid=(N, n2),
        in_specs=[
            pl.BlockSpec((None, rows2, Cpad), lambda n, i: (n, i, 0)),
            pl.BlockSpec((2, Cpad), lambda n, i: (0, 0)),
        ],
        out_specs=pl.BlockSpec((None, rows2, Cpad), lambda n, i: (n, i, 0)),
        out_shape=jax.ShapeDtypeStruct((N, H * W, Cpad), jnp.float32),
        compiler_params=pltpu.CompilerParams(
            dimension_semantics=("parallel", "parallel"),
            vmem_limit_bytes=vmem2),
    )(y, ss)

    # TODO(synk): this slice + NHWC->NCHW transpose is a full extra XLA HBM
    # pass kept only to match PyTorch's layout; drop it if the consumer can
    # take NHWC / padded channels.
    out = out[:, :, :Cout].reshape(N, H, W, Cout)
    return jnp.transpose(out, (0, 3, 1, 2))           # back to NCHW


# --------------------------------------------------------------------------
# Pure-JAX reference (PyTorch semantics, training-mode BatchNorm)
# --------------------------------------------------------------------------
def _reference(x_nchw, w_oihw, gamma, beta, *, rate, eps=1e-5):
    K = w_oihw.shape[2]
    pad = 0 if K == 1 else rate
    y = lax.conv_general_dilated(
        x_nchw, w_oihw, window_strides=(1, 1),
        padding=[(pad, pad), (pad, pad)], rhs_dilation=(rate, rate),
        dimension_numbers=('NCHW', 'OIHW', 'NCHW'))
    mean = jnp.mean(y, axis=(0, 2, 3), keepdims=True)
    var = jnp.mean((y - mean) ** 2, axis=(0, 2, 3), keepdims=True)
    yn = (y - mean) / jnp.sqrt(var + eps)
    yn = yn * gamma.reshape(1, -1, 1, 1) + beta.reshape(1, -1, 1, 1)
    return jnp.maximum(yn, 0.0)


if __name__ == "__main__":
    # ASPP_module(inplanes=4, planes=8, rate=2) -> kernel_size=3, padding=2, dilation=2
    N, inplanes, planes, H, W, rate = 2, 4, 8, 16, 16, 2
    K = 1 if rate == 1 else 3

    key = jax.random.PRNGKey(0)
    kx, kw = jax.random.split(key)

    # Input (NCHW like PyTorch)
    x = jax.random.normal(kx, (N, inplanes, H, W), dtype=jnp.float32)

    # Conv weight: kaiming_normal_ (fan_in, gain sqrt(2)), no bias
    fan_in = inplanes * K * K
    std = (2.0 / fan_in) ** 0.5
    w = std * jax.random.normal(kw, (planes, inplanes, K, K), dtype=jnp.float32)

    # BatchNorm2d params per __init_weight: weight=1, bias=0
    gamma = jnp.ones((planes,), dtype=jnp.float32)
    beta = jnp.zeros((planes,), dtype=jnp.float32)

    out = aspp_module(x, w, gamma, beta, rate=rate)
    out = jax.block_until_ready(out)

    ref = _reference(x, w, gamma, beta, rate=rate)
    assert out.shape == (N, planes, H, W)
    err = float(jnp.max(jnp.abs(out - ref)))
    assert jnp.allclose(out, ref, rtol=1e-3, atol=1e-3), err

    print("KERNEL_OK")
</pallas_src>

<mosaic_0001>
module attributes {stable_mosaic.version = 11 : i64} {
  func.func @_conv_stats_im2col_kernel(%arg0: i32, %arg1: i32, %arg2: memref<3x1x16x20x4xf32, #tpu.memory_space<vmem>>, %arg3: memref<36x128xf32, #tpu.memory_space<vmem>>, %arg4: memref<1x256x128xf32, #tpu.memory_space<vmem>>, %arg5: memref<1x1x2x128xf32, #tpu.memory_space<vmem>>, %arg6: memref<256x36xf32, #tpu.memory_space<vmem>>) attributes {dimension_semantics = [#tpu.dimension_semantics<parallel>, #tpu.dimension_semantics<parallel>], iteration_bounds = array<i64: 2, 1>, scalar_prefetch = 0 : i64, scratch_operands = 1 : i64, tpu.core_type = #tpu.core_type<tc>, window_params = [{transform_indices = @transform_0, window_bounds = array<i64: 3, 1, 16, 20, 4>}, {pipeline_mode = #tpu.pipeline_mode<synchronous>, transform_indices = @transform_1, window_bounds = array<i64: 36, 128>}, {transform_indices = @transform_2, window_bounds = array<i64: 1, 256, 128>}, {transform_indices = @transform_3, window_bounds = array<i64: 1, 1, 2, 128>}]} {
    %c0 = arith.constant 0 : index
    %c0_0 = arith.constant 0 : index
    %c0_1 = arith.constant 0 : index
    %c0_2 = arith.constant 0 : index
    %c0_3 = arith.constant 0 : index
    %0 = vector.load %arg2[%c0, %c0_0, %c0_1, %c0_2, %c0_3] : memref<3x1x16x20x4xf32, #tpu.memory_space<vmem>>, vector<3x1x16x20x4xf32>
    %1 = vector.shape_cast %0 : vector<3x1x16x20x4xf32> to vector<3x16x20x4xf32>
    %2 = vector.extract_strided_slice %1 {offsets = [0, 0, 0, 0], sizes = [1, 16, 16, 4], strides = [1, 1, 1, 1]} : vector<3x16x20x4xf32> to vector<1x16x16x4xf32>
    %3 = vector.shape_cast %2 : vector<1x16x16x4xf32> to vector<16x16x4xf32>
    %4 = vector.shape_cast %3 : vector<16x16x4xf32> to vector<256x4xf32>
    %c0_4 = arith.constant 0 : index
    %c0_5 = arith.constant 0 : index
    %5 = vector.load %arg6[%c0_4, %c0_5] : memref<256x36xf32, #tpu.memory_space<vmem>>, vector<256x4xf32>
    tpu.vector_store %arg6[%c0_4, %c0_5], %4 {strides = array<i32>} : memref<256x36xf32, #tpu.memory_space<vmem>>, vector<256x4xf32>,
    %6 = vector.extract_strided_slice %1 {offsets = [0, 0, 2, 0], sizes = [1, 16, 16, 4], strides = [1, 1, 1, 1]} : vector<3x16x20x4xf32> to vector<1x16x16x4xf32>
    %7 = vector.shape_cast %6 : vector<1x16x16x4xf32> to vector<16x16x4xf32>
    %8 = vector.shape_cast %7 : vector<16x16x4xf32> to vector<256x4xf32>
    %c0_6 = arith.constant 0 : index
    %c4 = arith.constant 4 : index
    %9 = vector.load %arg6[%c0_6, %c4] : memref<256x36xf32, #tpu.memory_space<vmem>>, vector<256x4xf32>
    tpu.vector_store %arg6[%c0_6, %c4], %8 {strides = array<i32>} : memref<256x36xf32, #tpu.memory_space<vmem>>, vector<256x4xf32>,
    %10 = vector.extract_strided_slice %1 {offsets = [0, 0, 4, 0], sizes = [1, 16, 16, 4], strides = [1, 1, 1, 1]} : vector<3x16x20x4xf32> to vector<1x16x16x4xf32>
    %11 = vector.shape_cast %10 : vector<1x16x16x4xf32> to vector<16x16x4xf32>
    %12 = vector.shape_cast %11 : vector<16x16x4xf32> to vector<256x4xf32>
    %c0_7 = arith.constant 0 : index
    %c8 = arith.constant 8 : index
    %13 = vector.load %arg6[%c0_7, %c8] : memref<256x36xf32, #tpu.memory_space<vmem>>, vector<256x4xf32>
    tpu.vector_store %arg6[%c0_7, %c8], %12 {strides = array<i32>} : memref<256x36xf32, #tpu.memory_space<vmem>>, vector<256x4xf32>,
    %14 = vector.extract_strided_slice %1 {offsets = [1, 0, 0, 0], sizes = [1, 16, 16, 4], strides = [1, 1, 1, 1]} : vector<3x16x20x4xf32> to vector<1x16x16x4xf32>
    %15 = vector.shape_cast %14 : vector<1x16x16x4xf32> to vector<16x16x4xf32>
    %16 = vector.shape_cast %15 : vector<16x16x4xf32> to vector<256x4xf32>
    %c0_8 = arith.constant 0 : index
    %c12 = arith.constant 12 : index
    %17 = vector.load %arg6[%c0_8, %c12] : memref<256x36xf32, #tpu.memory_space<vmem>>, vector<256x4xf32>
    tpu.vector_store %arg6[%c0_8, %c12], %16 {strides = array<i32>} : memref<256x36xf32, #tpu.memory_space<vmem>>, vector<256x4xf32>,
    %18 = vector.extract_strided_slice %1 {offsets = [1, 0, 2, 0], sizes = [1, 16, 16, 4], strides = [1, 1, 1, 1]} : vector<3x16x20x4xf32> to vector<1x16x16x4xf32>
    %19 = vector.shape_cast %18 : vector<1x16x16x4xf32> to vector<16x16x4xf32>
    %20 = vector.shape_cast %19 : vector<16x16x4xf32> to vector<256x4xf32>
    %c0_9 = arith.constant 0 : index
    %c16 = arith.constant 16 : index
    %21 = vector.load %arg6[%c0_9, %c16] : memref<256x36xf32, #tpu.memory_space<vmem>>, vector<256x4xf32>
    tpu.vector_store %arg6[%c0_9, %c16], %20 {strides = array<i32>} : memref<256x36xf32, #tpu.memory_space<vmem>>, vector<256x4xf32>,
    %22 = vector.extract_strided_slice %1 {offsets = [1, 0, 4, 0], sizes = [1, 16, 16, 4], strides = [1, 1, 1, 1]} : vector<3x16x20x4xf32> to vector<1x16x16x4xf32>
    %23 = vector.shape_cast %22 : vector<1x16x16x4xf32> to vector<16x16x4xf32>
    %24 = vector.shape_cast %23 : vector<16x16x4xf32> to vector<256x4xf32>
    %c0_10 = arith.constant 0 : index
    %c20 = arith.constant 20 : index
    %25 = vector.load %arg6[%c0_10, %c20] : memref<256x36xf32, #tpu.memory_space<vmem>>, vector<256x4xf32>
    tpu.vector_store %arg6[%c0_10, %c20], %24 {strides = array<i32>} : memref<256x36xf32, #tpu.memory_space<vmem>>, vector<256x4xf32>,
    %26 = vector.extract_strided_slice %1 {offsets = [2, 0, 0, 0], sizes = [1, 16, 16, 4], strides = [1, 1, 1, 1]} : vector<3x16x20x4xf32> to vector<1x16x16x4xf32>
    %27 = vector.shape_cast %26 : vector<1x16x16x4xf32> to vector<16x16x4xf32>
    %28 = vector.shape_cast %27 : vector<16x16x4xf32> to vector<256x4xf32>
    %c0_11 = arith.constant 0 : index
    %c24 = arith.constant 24 : index
    %29 = vector.load %arg6[%c0_11, %c24] : memref<256x36xf32, #tpu.memory_space<vmem>>, vector<256x4xf32>
    tpu.vector_store %arg6[%c0_11, %c24], %28 {strides = array<i32>} : memref<256x36xf32, #tpu.memory_space<vmem>>, vector<256x4xf32>,
    %30 = vector.extract_strided_slice %1 {offsets = [2, 0, 2, 0], sizes = [1, 16, 16, 4], strides = [1, 1, 1, 1]} : vector<3x16x20x4xf32> to vector<1x16x16x4xf32>
    %31 = vector.shape_cast %30 : vector<1x16x16x4xf32> to vector<16x16x4xf32>
    %32 = vector.shape_cast %31 : vector<16x16x4xf32> to vector<256x4xf32>
    %c0_12 = arith.constant 0 : index
    %c28 = arith.constant 28 : index
    %33 = vector.load %arg6[%c0_12, %c28] : memref<256x36xf32, #tpu.memory_space<vmem>>, vector<256x4xf32>
    tpu.vector_store %arg6[%c0_12, %c28], %32 {strides = array<i32>} : memref<256x36xf32, #tpu.memory_space<vmem>>, vector<256x4xf32>,
    %34 = vector.extract_strided_slice %1 {offsets = [2, 0, 4, 0], sizes = [1, 16, 16, 4], strides = [1, 1, 1, 1]} : vector<3x16x20x4xf32> to vector<1x16x16x4xf32>
    %35 = vector.shape_cast %34 : vector<1x16x16x4xf32> to vector<16x16x4xf32>
    %36 = vector.shape_cast %35 : vector<16x16x4xf32> to vector<256x4xf32>
    %c0_13 = arith.constant 0 : index
    %c32 = arith.constant 32 : index
    %37 = vector.load %arg6[%c0_13, %c32] : memref<256x36xf32, #tpu.memory_space<vmem>>, vector<256x4xf32>
    tpu.vector_store %arg6[%c0_13, %c32], %36 {strides = array<i32>} : memref<256x36xf32, #tpu.memory_space<vmem>>, vector<256x4xf32>,
    %c0_14 = arith.constant 0 : index
    %c0_15 = arith.constant 0 : index
    %38 = vector.load %arg6[%c0_14, %c0_15] : memref<256x36xf32, #tpu.memory_space<vmem>>, vector<256x36xf32>
    %c0_16 = arith.constant 0 : index
    %c0_17 = arith.constant 0 : index
    %39 = vector.load %arg3[%c0_16, %c0_17] : memref<36x128xf32, #tpu.memory_space<vmem>>, vector<36x128xf32>
    %cst = arith.constant dense<0.000000e+00> : vector<256x128xf32>
    %40 = tpu.matmul %38, %39, %cst {dimension_numbers = #tpu.dot_dimension_numbers<[1], [0], [0], [1], [0, 0, 1, 1], [], []>} : vector<256x36xf32>, vector<36x128xf32>, vector<256x128xf32> -> vector<256x128xf32>
    %c0_18 = arith.constant 0 : index
    %c0_19 = arith.constant 0 : index
    %c0_20 = arith.constant 0 : index
    %41 = vector.load %arg4[%c0_18, %c0_19, %c0_20] : memref<1x256x128xf32, #tpu.memory_space<vmem>>, vector<1x256x128xf32>
    %42 = vector.shape_cast %41 : vector<1x256x128xf32> to vector<256x128xf32>
    %43 = vector.shape_cast %40 : vector<256x128xf32> to vector<1x256x128xf32>
    tpu.vector_store %arg4[%c0_18, %c0_19, %c0_20], %43 {strides = array<i32>} : memref<1x256x128xf32, #tpu.memory_space<vmem>>, vector<1x256x128xf32>,
    %cst_21 = arith.constant dense<0.000000e+00> : vector<128xf32>
    %44 = vector.multi_reduction <add>, %40, %cst_21 [0] : vector<256x128xf32> to vector<128xf32>
    %45 = vector.shape_cast %44 : vector<128xf32> to vector<1x128xf32>
    %c0_22 = arith.constant 0 : index
    %c0_23 = arith.constant 0 : index
    %c0_24 = arith.constant 0 : index
    %c0_25 = arith.constant 0 : index
    %46 = vector.load %arg5[%c0_22, %c0_23, %c0_24, %c0_25] : memref<1x1x2x128xf32, #tpu.memory_space<vmem>>, vector<1x1x1x128xf32>
    %47 = vector.shape_cast %46 : vector<1x1x1x128xf32> to vector<1x128xf32>
    %48 = vector.shape_cast %45 : vector<1x128xf32> to vector<1x1x1x128xf32>
    tpu.vector_store %arg5[%c0_22, %c0_23, %c0_24, %c0_25], %48 {strides = array<i32>} : memref<1x1x2x128xf32, #tpu.memory_space<vmem>>, vector<1x1x1x128xf32>,
    %49 = arith.mulf %40, %40 : vector<256x128xf32>
    %cst_26 = arith.constant dense<0.000000e+00> : vector<128xf32>
    %50 = vector.multi_reduction <add>, %49, %cst_26 [0] : vector<256x128xf32> to vector<128xf32>
    %51 = vector.shape_cast %50 : vector<128xf32> to vector<1x128xf32>
    %c0_27 = arith.constant 0 : index
    %c0_28 = arith.constant 0 : index
    %c1 = arith.constant 1 : index
    %c0_29 = arith.constant 0 : index
    %52 = vector.load %arg5[%c0_27, %c0_28, %c1, %c0_29] : memref<1x1x2x128xf32, #tpu.memory_space<vmem>>, vector<1x1x1x128xf32>
    %53 = vector.shape_cast %52 : vector<1x1x1x128xf32> to vector<1x128xf32>
    %54 = vector.shape_cast %51 : vector<1x128xf32> to vector<1x1x1x128xf32>
    tpu.vector_store %arg5[%c0_27, %c0_28, %c1, %c0_29], %54 {strides = array<i32>} : memref<1x1x2x128xf32, #tpu.memory_space<vmem>>, vector<1x1x1x128xf32>,
    return
  }
  func.func @transform_0(%arg0: i32, %arg1: i32) -> (i32, i32, i32, i32, i32) {
    %c0_i32 = arith.constant 0 : i32
    %c0_i32_0 = arith.constant 0 : i32
    %c0_i32_1 = arith.constant 0 : i32
    %c0_i32_2 = arith.constant 0 : i32
    return %c0_i32, %arg0, %arg1, %c0_i32_0, %c0_i32_1 : i32, i32, i32, i32, i32
  }
  func.func @transform_1(%arg0: i32, %arg1: i32) -> (i32, i32) {
    %c0_i32 = arith.constant 0 : i32
    %c0_i32_0 = arith.constant 0 : i32
    %c0_i32_1 = arith.constant 0 : i32
    return %c0_i32, %c0_i32_0 : i32, i32
  }
  func.func @transform_2(%arg0: i32, %arg1: i32) -> (i32, i32, i32) {
    %c0_i32 = arith.constant 0 : i32
    %c0_i32_0 = arith.constant 0 : i32
    return %arg0, %arg1, %c0_i32 : i32, i32, i32
  }
  func.func @transform_3(%arg0: i32, %arg1: i32) -> (i32, i32, i32, i32) {
    %c0_i32 = arith.constant 0 : i32
    %c0_i32_0 = arith.constant 0 : i32
    %c0_i32_1 = arith.constant 0 : i32
    return %arg0, %arg1, %c0_i32, %c0_i32_0 : i32, i32, i32, i32
  }
}

</mosaic_0001>

<bundles_post_ra>
// kernel: tpu_custom_call.1
= control target key start
LH: loop header
LB: loop body
LE: loop exit
PB: predicated region body
PF: predicated region fallthrough
CT: control target
= control target key end

     0   :  { %9 = vsyncpa [#allocation5], 0  ;;  %s5588_s0 = inlined_call_operand.vmem [shape: f32[3,2,16,20,4], index: 0, kind: input, shape index: {}]   ;;  %s5589_s1 = inlined_call_operand.vmem [shape: f32[36,128], index: 1, kind: input, shape index: {}]   ;;  %s5590_s2 = inlined_call_operand.hbm [shape: f32[2,256,128], index: 2, kind: output, shape index: {0}]   ;;  %s5591_s3 = inlined_call_operand.hbm [shape: f32[2,1,2,128], index: 3, kind: output, shape index: {1}]  }
   0x1   :  { %11 = vsyncpa [#allocation5 + $0x1], 0 }
   0x2   :  { %12 = vsyncpa [#allocation7], 0 }
   0x3   :  { %14 = vsyncpa [#allocation7 + $0x1], 0  ;;  %s3470_s12 = smov 0   ;;  %s3472_s13 = smov 0  }
   0x4   :  { %s3474_s14 = smov 0   ;;  %s3476_s15 = smov 0  }
   0x5   :  { %s3478_s16 = smov 0   ;;  %s3480_s17 = smov 0  }
   0x6 LB: > { %s3190_s18 = sadd.s32 4294967295, %s3439_s17   ;;  %s3191_s19 = sadd.s32 4294967294, %s3439_s17   ;;  %s3439_s17 = sphi %s3480_s17, %s20_s17   ;;  %s3435_s16 = sphi %s3478_s16, %s5598_s16   ;;  %s3431_s15 = sphi %s3476_s15, %s5597_s15   ;;  %s3427_s14 = sphi %s3474_s14, %s5596_s14   ;;  %s3423_s13 = sphi %s3472_s13, %s5595_s13   ;;  %s3419_s12 = sphi %s3470_s12, %s5594_s12  }
   0x7   : > { %s32_s20 = sadd.s32 1, %s3435_s16  ;;  %s41_s21 = sadd.s32 1, %s3427_s14 }
   0x8   : > { %p34_p0 = scmp.ge.s32.totalorder %s32_s20, 2  ;;  %p48_p1 = scmp.ne.s32.totalorder %s3427_s14, %s3423_s13 }
   0x9   : > { %p49_p2 = scmp.eq.s32.totalorder %s3439_s17, 0  ;;  %p101_p3 = scmp.eq.s32.totalorder %s3190_s18, 1 }
   0xa   : > { %s5600_s20 = smov (%p34_p0, %s32_s20), 0  ;;  %p106_p6 = scmp.ne.s32.totalorder %s3423_s13, %s3419_s12 }
   0xb   : > { %p50_p4 = por %p49_p2, %p48_p1  ;;  %p3509_p5 = por %p101_p3, %p48_p1 }
   0xc   : > { %s36_s23 = ssub.s32 %s3435_s16, %s5600_s20  ;;  %p107_p8 = scmp.eq.s32.totalorder %s3191_s19, 1 }
   0xd   : > { %p39_p7 = scmp.eq.s32.totalorder %s36_s23, 0  ;;  %p3193_p10 = scmp.ge.s32.totalorder %s3439_s17, 2 }
   0xe   : > { %p3520_p9 = por %p107_p8, %p106_p6 }
   0xf   : > { %s3518_s24 = scalar_select %p39_p7, %s3427_s14, %s41_s21  }
  0x10   : > { %154 = sbr.rel (%p3193_p10) target bundleno = 170 (0xaa), region = 20 }
  0x15   : > { %157 = sbr.rel (!%p50_p4) target bundleno = 170 (0xaa), region = 24  ;;  %s159_s26 = sand.u32 (%p50_p4), 1, %s3427_s14  }
  0x16   : > { %s3255_s27 = smul.u32 (%p50_p4), 384, %s3435_s16 }
  0x17   : > { %s3254_s28 = smul.u32 (%p50_p4), 1152, %s159_s26 }
  0x18   : > { %s3532_s4 = scalar_lea.vmem (%p50_p4), %s5588_s0, %s3255_s27 }
  0x19   : > { %v482_v0 = vld [vmem:[%s3532_s4] sm:$0xff] (%p50_p4)  ;;  %v484_v1 = vld [vmem:[%s3532_s4 + $0x8] sm:$0xff] (%p50_p4)  ;;  %v486_v2 = vld [vmem:[%s3532_s4 + $0x10] sm:$0xff] (%p50_p4)  ;;  %s3537_s5 = scalar_lea.vmem (%p50_p4), [#allocation3], %s3254_s28 }
  0x1a   : > { %483 = vst [vmem:[%s3537_s5] sm:$0xff] %v482_v0  ;;  %v488_v3 = vld [vmem:[%s3532_s4 + $0x18] sm:$0xff]  ;;  %v490_v4 = vld [vmem:[%s3532_s4 + $0x20] sm:$0xff]  ;;  %v492_v5 = vld [vmem:[%s3532_s4 + $0x28] sm:$0xff] }
  0x1b   : > { %485 = vst [vmem:[%s3537_s5 + $0x8] sm:$0xff] %v484_v1  ;;  %v494_v6 = vld [vmem:[%s3532_s4 + $0x30] sm:$0xff]  ;;  %v496_v7 = vld [vmem:[%s3532_s4 + $0x38] sm:$0xff]  ;;  %v498_v8 = vld [vmem:[%s3532_s4 + $0x40] sm:$0xff] }
  0x1c   : > { %487 = vst [vmem:[%s3537_s5 + $0x10] sm:$0xff] %v486_v2  ;;  %v500_v9 = vld [vmem:[%s3532_s4 + $0x48] sm:$0xff]  ;;  %v502_v10 = vld [vmem:[%s3532_s4 + $0x50] sm:$0xff]  ;;  %v504_v11 = vld [vmem:[%s3532_s4 + $0x58] sm:$0xff] }
  0x1d   : > { %489 = vst [vmem:[%s3537_s5 + $0x18] sm:$0xff] %v488_v3  ;;  %v506_v12 = vld [vmem:[%s3532_s4 + $0x60] sm:$0xff]  ;;  %v508_v13 = vld [vmem:[%s3532_s4 + $0x68] sm:$0xff]  ;;  %v510_v14 = vld [vmem:[%s3532_s4 + $0x70] sm:$0xff] }
  0x1e   : > { %491 = vst [vmem:[%s3537_s5 + $0x20] sm:$0xff] %v490_v4  ;;  %v512_v15 = vld [vmem:[%s3532_s4 + $0x78] sm:$0xff]  ;;  %v514_v16 = vld [vmem:[%s3532_s4 + $0x80] sm:$0xff]  ;;  %v516_v17 = vld [vmem:[%s3532_s4 + $0x88] sm:$0xff] }
  0x1f   : > { %493 = vst [vmem:[%s3537_s5 + $0x28] sm:$0xff] %v492_v5  ;;  %v518_v18 = vld [vmem:[%s3532_s4 + $0x90] sm:$0xff]  ;;  %v520_v19 = vld [vmem:[%s3532_s4 + $0x98] sm:$0xff]  ;;  %v522_v20 = vld [vmem:[%s3532_s4 + $0xa0] sm:$0xff] }
  0x20   : > { %495 = vst [vmem:[%s3537_s5 + $0x30] sm:$0xff] %v494_v6  ;;  %v524_v21 = vld [vmem:[%s3532_s4 + $0xa8] sm:$0xff]  ;;  %v526_v22 = vld [vmem:[%s3532_s4 + $0xb0] sm:$0xff]  ;;  %v528_v23 = vld [vmem:[%s3532_s4 + $0xb8] sm:$0xff] }
  0x21   : > { %497 = vst [vmem:[%s3537_s5 + $0x38] sm:$0xff] %v496_v7  ;;  %v530_v24 = vld [vmem:[%s3532_s4 + $0xc0] sm:$0xff]  ;;  %v532_v25 = vld [vmem:[%s3532_s4 + $0xc8] sm:$0xff]  ;;  %v534_v26 = vld [vmem:[%s3532_s4 + $0xd0] sm:$0xff] }
  0x22   : > { %499 = vst [vmem:[%s3537_s5 + $0x40] sm:$0xff] %v498_v8  ;;  %v536_v27 = vld [vmem:[%s3532_s4 + $0xd8] sm:$0xff]  ;;  %v538_v28 = vld [vmem:[%s3532_s4 + $0xe0] sm:$0xff]  ;;  %v540_v29 = vld [vmem:[%s3532_s4 + $0xe8] sm:$0xff] }
  0x23   : > { %501 = vst [vmem:[%s3537_s5 + $0x48] sm:$0xff] %v500_v9  ;;  %v542_v30 = vld [vmem:[%s3532_s4 + $0xf0] sm:$0xff]  ;;  %v544_v31 = vld [vmem:[%s3532_s4 + $0xf8] sm:$0xff]  ;;  %v546_v32 = vld [vmem:[%s3532_s4 + $0x100] sm:$0xff] }
  0x24   : > { %503 = vst [vmem:[%s3537_s5 + $0x50] sm:$0xff] %v502_v10  ;;  %v548_v33 = vld [vmem:[%s3532_s4 + $0x108] sm:$0xff]  ;;  %v550_v34 = vld [vmem:[%s3532_s4 + $0x110] sm:$0xff]  ;;  %v552_v35 = vld [vmem:[%s3532_s4 + $0x118] sm:$0xff] }
  0x25   : > { %505 = vst [vmem:[%s3537_s5 + $0x58] sm:$0xff] %v504_v11  ;;  %v554_v36 = vld [vmem:[%s3532_s4 + $0x120] sm:$0xff]  ;;  %v556_v37 = vld [vmem:[%s3532_s4 + $0x128] sm:$0xff]  ;;  %v558_v38 = vld [vmem:[%s3532_s4 + $0x130] sm:$0xff] }
  0x26   : > { %507 = vst [vmem:[%s3537_s5 + $0x60] sm:$0xff] %v506_v12  ;;  %v560_v39 = vld [vmem:[%s3532_s4 + $0x138] sm:$0xff]  ;;  %v562_v40 = vld [vmem:[%s3532_s4 + $0x140] sm:$0xff]  ;;  %v564_v41 = vld [vmem:[%s3532_s4 + $0x148] sm:$0xff] }
  0x27   : > { %509 = vst [vmem:[%s3537_s5 + $0x68] sm:$0xff] %v508_v13  ;;  %v566_v42 = vld [vmem:[%s3532_s4 + $0x150] sm:$0xff]  ;;  %v568_v43 = vld [vmem:[%s3532_s4 + $0x158] sm:$0xff]  ;;  %v570_v44 = vld [vmem:[%s3532_s4 + $0x160] sm:$0xff] }
  0x28   : > { %511 = vst [vmem:[%s3537_s5 + $0x70] sm:$0xff] %v510_v14  ;;  %v572_v45 = vld [vmem:[%s3532_s4 + $0x168] sm:$0xff]  ;;  %v574_v46 = vld [vmem:[%s3532_s4 + $0x170] sm:$0xff]  ;;  %v576_v47 = vld [vmem:[%s3532_s4 + $0x178] sm:$0xff] }
  0x29   : > { %513 = vst [vmem:[%s3537_s5 + $0x78] sm:$0xff] %v512_v15  ;;  %v578_v48 = vld [vmem:[%s3532_s4 + $0x300] sm:$0xff]  ;;  %v580_v49 = vld [vmem:[%s3532_s4 + $0x308] sm:$0xff]  ;;  %v582_v50 = vld [vmem:[%s3532_s4 + $0x310] sm:$0xff] }
  0x2a   : > { %515 = vst [vmem:[%s3537_s5 + $0x80] sm:$0xff] %v514_v16  ;;  %v584_v51 = vld [vmem:[%s3532_s4 + $0x318] sm:$0xff]  ;;  %v586_v52 = vld [vmem:[%s3532_s4 + $0x320] sm:$0xff]  ;;  %v588_v53 = vld [vmem:[%s3532_s4 + $0x328] sm:$0xff] }
  0x2b   : > { %517 = vst [vmem:[%s3537_s5 + $0x88] sm:$0xff] %v516_v17  ;;  %v590_v54 = vld [vmem:[%s3532_s4 + $0x330] sm:$0xff]  ;;  %v592_v55 = vld [vmem:[%s3532_s4 + $0x338] sm:$0xff]  ;;  %v594_v56 = vld [vmem:[%s3532_s4 + $0x340] sm:$0xff] }
  0x2c   : > { %519 = vst [vmem:[%s3537_s5 + $0x90] sm:$0xff] %v518_v18  ;;  %v596_v57 = vld [vmem:[%s3532_s4 + $0x348] sm:$0xff]  ;;  %v598_v58 = vld [vmem:[%s3532_s4 + $0x350] sm:$0xff]  ;;  %v600_v59 = vld [vmem:[%s3532_s4 + $0x358] sm:$0xff] }
  0x2d   : > { %521 = vst [vmem:[%s3537_s5 + $0x98] sm:$0xff] %v520_v19  ;;  %v602_v60 = vld [vmem:[%s3532_s4 + $0x360] sm:$0xff]  ;;  %v604_v61 = vld [vmem:[%s3532_s4 + $0x368] sm:$0xff]  ;;  %v606_v62 = vld [vmem:[%s3532_s4 + $0x370] sm:$0xff] }
  0x2e   : > { %523 = vst [vmem:[%s3537_s5 + $0xa0] sm:$0xff] %v522_v20  ;;  %v608_v63 = vld [vmem:[%s3532_s4 + $0x378] sm:$0xff]  ;;  %v610_v0 = vld [vmem:[%s3532_s4 + $0x380] sm:$0xff]  ;;  %v612_v1 = vld [vmem:[%s3532_s4 + $0x388] sm:$0xff] }
  0x2f   : > { %525 = vst [vmem:[%s3537_s5 + $0xa8] sm:$0xff] %v524_v21  ;;  %v614_v2 = vld [vmem:[%s3532_s4 + $0x390] sm:$0xff]  ;;  %v616_v3 = vld [vmem:[%s3532_s4 + $0x398] sm:$0xff]  ;;  %v618_v4 = vld [vmem:[%s3532_s4 + $0x3a0] sm:$0xff] }
  0x30   : > { %527 = vst [vmem:[%s3537_s5 + $0xb0] sm:$0xff] %v526_v22  ;;  %v620_v5 = vld [vmem:[%s3532_s4 + $0x3a8] sm:$0xff]  ;;  %v622_v6 = vld [vmem:[%s3532_s4 + $0x3b0] sm:$0xff]  ;;  %v624_v7 = vld [vmem:[%s3532_s4 + $0x3b8] sm:$0xff] }
  0x31   : > { %529 = vst [vmem:[%s3537_s5 + $0xb8] sm:$0xff] %v528_v23  ;;  %v626_v8 = vld [vmem:[%s3532_s4 + $0x3c0] sm:$0xff]  ;;  %v628_v9 = vld [vmem:[%s3532_s4 + $0x3c8] sm:$0xff]  ;;  %v630_v10 = vld [vmem:[%s3532_s4 + $0x3d0] sm:$0xff] }
  0x32   : > { %531 = vst [vmem:[%s3537_s5 + $0xc0] sm:$0xff] %v530_v24  ;;  %v632_v11 = vld [vmem:[%s3532_s4 + $0x3d8] sm:$0xff]  ;;  %v634_v12 = vld [vmem:[%s3532_s4 + $0x3e0] sm:$0xff]  ;;  %v636_v13 = vld [vmem:[%s3532_s4 + $0x3e8] sm:$0xff] }
  0x33   : > { %533 = vst [vmem:[%s3537_s5 + $0xc8] sm:$0xff] %v532_v25  ;;  %v638_v14 = vld [vmem:[%s3532_s4 + $0x3f0] sm:$0xff]  ;;  %v640_v15 = vld [vmem:[%s3532_s4 + $0x3f8] sm:$0xff]  ;;  %v642_v16 = vld [vmem:[%s3532_s4 + $0x400] sm:$0xff] }
  0x34   : > { %535 = vst [vmem:[%s3537_s5 + $0xd0] sm:$0xff] %v534_v26  ;;  %v644_v17 = vld [vmem:[%s3532_s4 + $0x408] sm:$0xff]  ;;  %v646_v18 = vld [vmem:[%s3532_s4 + $0x410] sm:$0xff]  ;;  %v648_v19 = vld [vmem:[%s3532_s4 + $0x418] sm:$0xff] }
  0x35   : > { %537 = vst [vmem:[%s3537_s5 + $0xd8] sm:$0xff] %v536_v27  ;;  %v650_v20 = vld [vmem:[%s3532_s4 + $0x420] sm:$0xff]  ;;  %v652_v21 = vld [vmem:[%s3532_s4 + $0x428] sm:$0xff]  ;;  %v654_v22 = vld [vmem:[%s3532_s4 + $0x430] sm:$0xff] }
  0x36   : > { %539 = vst [vmem:[%s3537_s5 + $0xe0] sm:$0xff] %v538_v28  ;;  %v656_v23 = vld [vmem:[%s3532_s4 + $0x438] sm:$0xff]  ;;  %v658_v24 = vld [vmem:[%s3532_s4 + $0x440] sm:$0xff]  ;;  %v660_v25 = vld [vmem:[%s3532_s4 + $0x448] sm:$0xff] }
  0x37   : > { %541 = vst [vmem:[%s3537_s5 + $0xe8] sm:$0xff] %v540_v29  ;;  %v662_v26 = vld [vmem:[%s3532_s4 + $0x450] sm:$0xff]  ;;  %v664_v27 = vld [vmem:[%s3532_s4 + $0x458] sm:$0xff]  ;;  %v666_v28 = vld [vmem:[%s3532_s4 + $0x460] sm:$0xff] }
  0x38   : > { %543 = vst [vmem:[%s3537_s5 + $0xf0] sm:$0xff] %v542_v30  ;;  %v668_v29 = vld [vmem:[%s3532_s4 + $0x468] sm:$0xff]  ;;  %v670_v30 = vld [vmem:[%s3532_s4 + $0x470] sm:$0xff] }
  0x39   : > { %545 = vst [vmem:[%s3537_s5 + $0xf8] sm:$0xff] %v544_v31  ;;  %v672_v31 = vld [vmem:[%s3532_s4 + $0x478] sm:$0xff] }
  0x3a   : > { %547 = vst [vmem:[%s3537_s5 + $0x100] sm:$0xff] %v546_v32  ;;  %v674_v32 = vld [vmem:[%s3532_s4 + $0x600] sm:$0xff] }
  0x3b   : > { %549 = vst [vmem:[%s3537_s5 + $0x108] sm:$0xff] %v548_v33  ;;  %v676_v33 = vld [vmem:[%s3532_s4 + $0x608] sm:$0xff] }
  0x3c   : > { %551 = vst [vmem:[%s3537_s5 + $0x110] sm:$0xff] %v550_v34  ;;  %v678_v34 = vld [vmem:[%s3532_s4 + $0x610] sm:$0xff] }
  0x3d   : > { %553 = vst [vmem:[%s3537_s5 + $0x118] sm:$0xff] %v552_v35  ;;  %v680_v35 = vld [vmem:[%s3532_s4 + $0x618] sm:$0xff] }
  0x3e   : > { %555 = vst [vmem:[%s3537_s5 + $0x120] sm:$0xff] %v554_v36  ;;  %v682_v36 = vld [vmem:[%s3532_s4 + $0x620] sm:$0xff] }
  0x3f   : > { %557 = vst [vmem:[%s3537_s5 + $0x128] sm:$0xff] %v556_v37  ;;  %v684_v37 = vld [vmem:[%s3532_s4 + $0x628] sm:$0xff] }
  0x40   : > { %559 = vst [vmem:[%s3537_s5 + $0x130] sm:$0xff] %v558_v38  ;;  %v686_v38 = vld [vmem:[%s3532_s4 + $0x630] sm:$0xff] }
  0x41   : > { %561 = vst [vmem:[%s3537_s5 + $0x138] sm:$0xff] %v560_v39  ;;  %v688_v39 = vld [vmem:[%s3532_s4 + $0x638] sm:$0xff] }
  0x42   : > { %563 = vst [vmem:[%s3537_s5 + $0x140] sm:$0xff] %v562_v40  ;;  %v690_v40 = vld [vmem:[%s3532_s4 + $0x640] sm:$0xff] }
  0x43   : > { %565 = vst [vmem:[%s3537_s5 + $0x148] sm:$0xff] %v564_v41  ;;  %v692_v41 = vld [vmem:[%s3532_s4 + $0x648] sm:$0xff] }
  0x44   : > { %567 = vst [vmem:[%s3537_s5 + $0x150] sm:$0xff] %v566_v42  ;;  %v694_v42 = vld [vmem:[%s3532_s4 + $0x650] sm:$0xff] }
  0x45   : > { %569 = vst [vmem:[%s3537_s5 + $0x158] sm:$0xff] %v568_v43  ;;  %v696_v43 = vld [vmem:[%s3532_s4 + $0x658] sm:$0xff] }
  0x46   : > { %571 = vst [vmem:[%s3537_s5 + $0x160] sm:$0xff] %v570_v44  ;;  %v698_v44 = vld [vmem:[%s3532_s4 + $0x660] sm:$0xff] }
  0x47   : > { %573 = vst [vmem:[%s3537_s5 + $0x168] sm:$0xff] %v572_v45  ;;  %v700_v45 = vld [vmem:[%s3532_s4 + $0x668] sm:$0xff] }
  0x48   : > { %575 = vst [vmem:[%s3537_s5 + $0x170] sm:$0xff] %v574_v46  ;;  %v702_v46 = vld [vmem:[%s3532_s4 + $0x670] sm:$0xff] }
  0x49   : > { %577 = vst [vmem:[%s3537_s5 + $0x178] sm:$0xff] %v576_v47  ;;  %v704_v47 = vld [vmem:[%s3532_s4 + $0x678] sm:$0xff] }
  0x4a   : > { %579 = vst [vmem:[%s3537_s5 + $0x180] sm:$0xff] %v578_v48  ;;  %v706_v48 = vld [vmem:[%s3532_s4 + $0x680] sm:$0xff] }
  0x4b   : > { %581 = vst [vmem:[%s3537_s5 + $0x188] sm:$0xff] %v580_v49  ;;  %v708_v49 = vld [vmem:[%s3532_s4 + $0x688] sm:$0xff] }
  0x4c   : > { %583 = vst [vmem:[%s3537_s5 + $0x190] sm:$0xff] %v582_v50  ;;  %v710_v50 = vld [vmem:[%s3532_s4 + $0x690] sm:$0xff] }
  0x4d   : > { %585 = vst [vmem:[%s3537_s5 + $0x198] sm:$0xff] %v584_v51  ;;  %v712_v51 = vld [vmem:[%s3532_s4 + $0x698] sm:$0xff] }
  0x4e   : > { %587 = vst [vmem:[%s3537_s5 + $0x1a0] sm:$0xff] %v586_v52  ;;  %v714_v52 = vld [vmem:[%s3532_s4 + $0x6a0] sm:$0xff] }
  0x4f   : > { %589 = vst [vmem:[%s3537_s5 + $0x1a8] sm:$0xff] %v588_v53  ;;  %v716_v53 = vld [vmem:[%s3532_s4 + $0x6a8] sm:$0xff] }
  0x50   : > { %591 = vst [vmem:[%s3537_s5 + $0x1b0] sm:$0xff] %v590_v54  ;;  %v718_v54 = vld [vmem:[%s3532_s4 + $0x6b0] sm:$0xff] }
  0x51   : > { %593 = vst [vmem:[%s3537_s5 + $0x1b8] sm:$0xff] %v592_v55  ;;  %v720_v55 = vld [vmem:[%s3532_s4 + $0x6b8] sm:$0xff] }
  0x52   : > { %595 = vst [vmem:[%s3537_s5 + $0x1c0] sm:$0xff] %v594_v56  ;;  %v722_v56 = vld [vmem:[%s3532_s4 + $0x6c0] sm:$0xff] }
  0x53   : > { %597 = vst [vmem:[%s3537_s5 + $0x1c8] sm:$0xff] %v596_v57  ;;  %v724_v57 = vld [vmem:[%s3532_s4 + $0x6c8] sm:$0xff] }
  0x54   : > { %599 = vst [vmem:[%s3537_s5 + $0x1d0] sm:$0xff] %v598_v58  ;;  %v726_v58 = vld [vmem:[%s3532_s4 + $0x6d0] sm:$0xff] }
  0x55   : > { %601 = vst [vmem:[%s3537_s5 + $0x1d8] sm:$0xff] %v600_v59  ;;  %v728_v59 = vld [vmem:[%s3532_s4 + $0x6d8] sm:$0xff] }
  0x56   : > { %603 = vst [vmem:[%s3537_s5 + $0x1e0] sm:$0xff] %v602_v60  ;;  %v730_v60 = vld [vmem:[%s3532_s4 + $0x6e0] sm:$0xff] }
  0x57   : > { %605 = vst [vmem:[%s3537_s5 + $0x1e8] sm:$0xff] %v604_v61  ;;  %v732_v61 = vld [vmem:[%s3532_s4 + $0x6e8] sm:$0xff] }
  0x58   : > { %607 = vst [vmem:[%s3537_s5 + $0x1f0] sm:$0xff] %v606_v62  ;;  %v734_v62 = vld [vmem:[%s3532_s4 + $0x6f0] sm:$0xff] }
  0x59   : > { %609 = vst [vmem:[%s3537_s5 + $0x1f8] sm:$0xff] %v608_v63  ;;  %v736_v63 = vld [vmem:[%s3532_s4 + $0x6f8] sm:$0xff] }
  0x5a   : > { %611 = vst [vmem:[%s3537_s5 + $0x200] sm:$0xff] %v610_v0  ;;  %v738_v0 = vld [vmem:[%s3532_s4 + $0x700] sm:$0xff] }
  0x5b   : > { %613 = vst [vmem:[%s3537_s5 + $0x208] sm:$0xff] %v612_v1  ;;  %v740_v1 = vld [vmem:[%s3532_s4 + $0x708] sm:$0xff] }
  0x5c   : > { %615 = vst [vmem:[%s3537_s5 + $0x210] sm:$0xff] %v614_v2  ;;  %v742_v2 = vld [vmem:[%s3532_s4 + $0x710] sm:$0xff] }
  0x5d   : > { %617 = vst [vmem:[%s3537_s5 + $0x218] sm:$0xff] %v616_v3  ;;  %v744_v3 = vld [vmem:[%s3532_s4 + $0x718] sm:$0xff] }
  0x5e   : > { %619 = vst [vmem:[%s3537_s5 + $0x220] sm:$0xff] %v618_v4  ;;  %v746_v4 = vld [vmem:[%s3532_s4 + $0x720] sm:$0xff] }
  0x5f   : > { %621 = vst [vmem:[%s3537_s5 + $0x228] sm:$0xff] %v620_v5  ;;  %v748_v5 = vld [vmem:[%s3532_s4 + $0x728] sm:$0xff] }
  0x60   : > { %623 = vst [vmem:[%s3537_s5 + $0x230] sm:$0xff] %v622_v6  ;;  %v750_v6 = vld [vmem:[%s3532_s4 + $0x730] sm:$0xff] }
  0x61   : > { %625 = vst [vmem:[%s3537_s5 + $0x238] sm:$0xff] %v624_v7  ;;  %v752_v7 = vld [vmem:[%s3532_s4 + $0x738] sm:$0xff] }
  0x62   : > { %627 = vst [vmem:[%s3537_s5 + $0x240] sm:$0xff] %v626_v8  ;;  %v754_v8 = vld [vmem:[%s3532_s4 + $0x740] sm:$0xff] }
  0x63   : > { %629 = vst [vmem:[%s3537_s5 + $0x248] sm:$0xff] %v628_v9  ;;  %v756_v9 = vld [vmem:[%s3532_s4 + $0x748] sm:$0xff] }
  0x64   : > { %631 = vst [vmem:[%s3537_s5 + $0x250] sm:$0xff] %v630_v10  ;;  %v758_v10 = vld [vmem:[%s3532_s4 + $0x750] sm:$0xff] }
  0x65   : > { %633 = vst [vmem:[%s3537_s5 + $0x258] sm:$0xff] %v632_v11  ;;  %v760_v11 = vld [vmem:[%s3532_s4 + $0x758] sm:$0xff] }
  0x66   : > { %635 = vst [vmem:[%s3537_s5 + $0x260] sm:$0xff] %v634_v12  ;;  %v762_v12 = vld [vmem:[%s3532_s4 + $0x760] sm:$0xff] }
  0x67   : > { %637 = vst [vmem:[%s3537_s5 + $0x268] sm:$0xff] %v636_v13  ;;  %v764_v13 = vld [vmem:[%s3532_s4 + $0x768] sm:$0xff] }
  0x68   : > { %639 = vst [vmem:[%s3537_s5 + $0x270] sm:$0xff] %v638_v14  ;;  %v766_v14 = vld [vmem:[%s3532_s4 + $0x770] sm:$0xff] }
  0x69   : > { %641 = vst [vmem:[%s3537_s5 + $0x278] sm:$0xff] %v640_v15  ;;  %v768_v15 = vld [vmem:[%s3532_s4 + $0x778] sm:$0xff] }
  0x6a   : > { %643 = vst [vmem:[%s3537_s5 + $0x280] sm:$0xff] %v642_v16 }
  0x6b   : > { %645 = vst [vmem:[%s3537_s5 + $0x288] sm:$0xff] %v644_v17 }
  0x6c   : > { %647 = vst [vmem:[%s3537_s5 + $0x290] sm:$0xff] %v646_v18 }
  0x6d   : > { %649 = vst [vmem:[%s3537_s5 + $0x298] sm:$0xff] %v648_v19 }
  0x6e   : > { %651 = vst [vmem:[%s3537_s5 + $0x2a0] sm:$0xff] %v650_v20 }
  0x6f   : > { %653 = vst [vmem:[%s3537_s5 + $0x2a8] sm:$0xff] %v652_v21 }
  0x70   : > { %655 = vst [vmem:[%s3537_s5 + $0x2b0] sm:$0xff] %v654_v22 }
  0x71   : > { %657 = vst [vmem:[%s3537_s5 + $0x2b8] sm:$0xff] %v656_v23 }
  0x72   : > { %659 = vst [vmem:[%s3537_s5 + $0x2c0] sm:$0xff] %v658_v24 }
  0x73   : > { %661 = vst [vmem:[%s3537_s5 + $0x2c8] sm:$0xff] %v660_v25 }
  0x74   : > { %663 = vst [vmem:[%s3537_s5 + $0x2d0] sm:$0xff] %v662_v26 }
  0x75   : > { %665 = vst [vmem:[%s3537_s5 + $0x2d8] sm:$0xff] %v664_v27 }
  0x76   : > { %667 = vst [vmem:[%s3537_s5 + $0x2e0] sm:$0xff] %v666_v28 }
  0x77   : > { %669 = vst [vmem:[%s3537_s5 + $0x2e8] sm:$0xff] %v668_v29 }
  0x78   : > { %671 = vst [vmem:[%s3537_s5 + $0x2f0] sm:$0xff] %v670_v30 }
  0x79   : > { %673 = vst [vmem:[%s3537_s5 + $0x2f8] sm:$0xff] %v672_v31 }
  0x7a   : > { %675 = vst [vmem:[%s3537_s5 + $0x300] sm:$0xff] %v674_v32 }
  0x7b   : > { %677 = vst [vmem:[%s3537_s5 + $0x308] sm:$0xff] %v676_v33 }
  0x7c   : > { %679 = vst [vmem:[%s3537_s5 + $0x310] sm:$0xff] %v678_v34 }
  0x7d   : > { %681 = vst [vmem:[%s3537_s5 + $0x318] sm:$0xff] %v680_v35 }
  0x7e   : > { %683 = vst [vmem:[%s3537_s5 + $0x320] sm:$0xff] %v682_v36 }
  0x7f   : > { %685 = vst [vmem:[%s3537_s5 + $0x328] sm:$0xff] %v684_v37 }
  0x80   : > { %687 = vst [vmem:[%s3537_s5 + $0x330] sm:$0xff] %v686_v38 }
  0x81   : > { %689 = vst [vmem:[%s3537_s5 + $0x338] sm:$0xff] %v688_v39 }
  0x82   : > { %691 = vst [vmem:[%s3537_s5 + $0x340] sm:$0xff] %v690_v40 }
  0x83   : > { %693 = vst [vmem:[%s3537_s5 + $0x348] sm:$0xff] %v692_v41 }
  0x84   : > { %695 = vst [vmem:[%s3537_s5 + $0x350] sm:$0xff] %v694_v42 }
  0x85   : > { %697 = vst [vmem:[%s3537_s5 + $0x358] sm:$0xff] %v696_v43 }
  0x86   : > { %699 = vst [vmem:[%s3537_s5 + $0x360] sm:$0xff] %v698_v44 }
  0x87   : > { %701 = vst [vmem:[%s3537_s5 + $0x368] sm:$0xff] %v700_v45 }
  0x88   : > { %703 = vst [vmem:[%s3537_s5 + $0x370] sm:$0xff] %v702_v46 }
  0x89   : > { %705 = vst [vmem:[%s3537_s5 + $0x378] sm:$0xff] %v704_v47 }
  0x8a   : > { %707 = vst [vmem:[%s3537_s5 + $0x380] sm:$0xff] %v706_v48 }
  0x8b   : > { %709 = vst [vmem:[%s3537_s5 + $0x388] sm:$0xff] %v708_v49 }
  0x8c   : > { %711 = vst [vmem:[%s3537_s5 + $0x390] sm:$0xff] %v710_v50 }
  0x8d   : > { %713 = vst [vmem:[%s3537_s5 + $0x398] sm:$0xff] %v712_v51 }
  0x8e   : > { %715 = vst [vmem:[%s3537_s5 + $0x3a0] sm:$0xff] %v714_v52 }
  0x8f   : > { %717 = vst [vmem:[%s3537_s5 + $0x3a8] sm:$0xff] %v716_v53 }
  0x90   : > { %719 = vst [vmem:[%s3537_s5 + $0x3b0] sm:$0xff] %v718_v54 }
  0x91   : > { %721 = vst [vmem:[%s3537_s5 + $0x3b8] sm:$0xff] %v720_v55 }
  0x92   : > { %723 = vst [vmem:[%s3537_s5 + $0x3c0] sm:$0xff] %v722_v56 }
  0x93   : > { %725 = vst [vmem:[%s3537_s5 + $0x3c8] sm:$0xff] %v724_v57 }
  0x94   : > { %727 = vst [vmem:[%s3537_s5 + $0x3d0] sm:$0xff] %v726_v58 }
  0x95   : > { %729 = vst [vmem:[%s3537_s5 + $0x3d8] sm:$0xff] %v728_v59 }
  0x96   : > { %731 = vst [vmem:[%s3537_s5 + $0x3e0] sm:$0xff] %v730_v60 }
  0x97   : > { %733 = vst [vmem:[%s3537_s5 + $0x3e8] sm:$0xff] %v732_v61 }
  0x98   : > { %735 = vst [vmem:[%s3537_s5 + $0x3f0] sm:$0xff] %v734_v62 }
  0x99   : > { %737 = vst [vmem:[%s3537_s5 + $0x3f8] sm:$0xff] %v736_v63 }
  0x9a   : > { %739 = vst [vmem:[%s3537_s5 + $0x400] sm:$0xff] %v738_v0 }
  0x9b   : > { %741 = vst [vmem:[%s3537_s5 + $0x408] sm:$0xff] %v740_v1 }
  0x9c   : > { %743 = vst [vmem:[%s3537_s5 + $0x410] sm:$0xff] %v742_v2 }
  0x9d   : > { %745 = vst [vmem:[%s3537_s5 + $0x418] sm:$0xff] %v744_v3 }
  0x9e   : > { %747 = vst [vmem:[%s3537_s5 + $0x420] sm:$0xff] %v746_v4 }
  0x9f   : > { %749 = vst [vmem:[%s3537_s5 + $0x428] sm:$0xff] %v748_v5 }
  0xa0   : > { %751 = vst [vmem:[%s3537_s5 + $0x430] sm:$0xff] %v750_v6 }
  0xa1   : > { %753 = vst [vmem:[%s3537_s5 + $0x438] sm:$0xff] %v752_v7 }
  0xa2   : > { %755 = vst [vmem:[%s3537_s5 + $0x440] sm:$0xff] %v754_v8 }
  0xa3   : > { %757 = vst [vmem:[%s3537_s5 + $0x448] sm:$0xff] %v756_v9 }
  0xa4   : > { %759 = vst [vmem:[%s3537_s5 + $0x450] sm:$0xff] %v758_v10 }
  0xa5   : > { %761 = vst [vmem:[%s3537_s5 + $0x458] sm:$0xff] %v760_v11 }
  0xa6   : > { %763 = vst [vmem:[%s3537_s5 + $0x460] sm:$0xff] %v762_v12 }
  0xa7   : > { %765 = vst [vmem:[%s3537_s5 + $0x468] sm:$0xff] %v764_v13 }
  0xa8   : > { %767 = vst [vmem:[%s3537_s5 + $0x470] sm:$0xff] %v766_v14 }
  0xa9   : > { %769 = vst [vmem:[%s3537_s5 + $0x478] sm:$0xff] %v768_v15 }
  0xaa PF: > { %p3195_p11 = scmp.ge.s32.totalorder %s3439_s17, 1  ;;  %p774_p12 = scmp.lt.s32.totalorder %s3439_s17, 3 }
  0xac   : > { %p775_p13 = pnand %p3195_p11, %p774_p12 }
  0xad   : > { %s3827_s6 = sand.u32 (!%p775_p13), 1, %s3423_s13   ;;  %s3441_s9 = smov (!%p775_p13), 4  }
  0xae   : > { %778 = sbr.rel (%p775_p13) target bundleno = 1138 (0x472), region = 62  ;;  %s3442_s10 = smov (!%p775_p13), 8  }
  0xaf   : > { %s3256_s7 = smul.u32 (!%p775_p13), 1152, %s3827_s6  ;;  %s3443_s11 = smov (!%p775_p13), 12  }
  0xb0   : > { %s3444_s18 = smov (!%p775_p13), 16   ;;  %s3445_s19 = smov (!%p775_p13), 20  }
  0xb1   : > { %s3830_s8 = scalar_lea.vmem (!%p775_p13), [#allocation3], %s3256_s7  ;;  %s3446_s21 = smov (!%p775_p13), 24  }
  0xb2   : > { %s3447_s23 = smov (!%p775_p13), 32   ;;  %s3448_s26 = smov (!%p775_p13), 28  }
  0xb3   : > { %v3833_v16 = vld [vmem:[%s3830_s8 + $0x18] sm:$0xff]  ;;  %v3836_v17 = vld [vmem:[%s3830_s8 + $0x20] sm:$0xff]  ;;  %vm1036_vm0 = vcmask 1045504   ;;  %v3844_v21 = vld [vmem:[%s3830_s8 + $0x8] sm:$0xff]  ;;  %vm955_vm1 = vcmask 31744   ;;  %vm1246_vm2 = vcmask 1043456  }
  0xb4   : > { %v3839_v18 = vld [vmem:[%s3830_s8] sm:$0xff]  ;;  %v1042_v19 = vrot.slane %v3833_v16, 2  ;;  %v1043_v20 = vrot.slane %v3836_v17, 2  ;;  %v1038_v23 = vrot.slane %v3844_v21, 2  ;;  %v3849_v24 = vld [vmem:[%s3830_s8 + $0x28] sm:$0xf] }
  0xb5   : > { %v1037_v22 = vrot.slane %v3839_v18, 2  ;;  %v3853_v26 = vld [vmem:[%s3830_s8 + $0x10] sm:$0xf]  ;;  %v3861_v29 = vld [vmem:[%s3830_s8 + $0x38] sm:$0xff]  ;;  %v1045_v31 = vrot.slane %v3849_v24, 2  ;;  %v3883_v41 = vld [vmem:[%s3830_s8 + $0x48] sm:$0xff] }
  0xb6   : > { %v1044_v25 = vsel %vm1036_vm0, %v1042_v19, %v1043_v20  ;;  %v3856_v27 = vld [vmem:[%s3830_s8 + $0x30] sm:$0xff]  ;;  %v1048_v32 = vrot.slane %v3861_v29, 2  ;;  %v1040_v33 = vrot.slane %v3853_v26, 2  ;;  %v3869_v34 = vld [vmem:[%s3830_s8 + $0x40] sm:$0xf]  ;;  %v1052_v45 = vrot.slane %v3883_v41, 2 }
  0xb7   : > { %1121 = vrot.lane.b32.xlu1 %v1044_v25, %s3441_s9  ;;  %v1039_v28 = vsel %vm1036_vm0, %v1037_v22, %v1038_v23  ;;  %v1047_v30 = vrot.slane %v3856_v27, 2  ;;  %v1046_v36 = vsel %vm1036_vm0, %v1043_v20, %v1045_v31  ;;  %v1050_v37 = vrot.slane %v3869_v34, 2  ;;  %v3877_v39 = vld [vmem:[%s3830_s8 + $0x50] sm:$0xff]  ;;  %v3880_v40 = vld [vmem:[%s3830_s8 + $0x58] sm:$0xf]  ;;  %v3892_v46 = vld [vmem:[%s3830_s8 + $0x60] sm:$0xff] }
  0xb8   : > { %1117 = vrot.lane.b32.xlu0 %v1039_v28, %s3441_s9  ;;  %v1041_v38 = vsel %vm1036_vm0, %v1038_v23, %v1040_v33  ;;  %v1053_v42 = vrot.slane %v3877_v39, 2  ;;  %v1055_v43 = vrot.slane %v3880_v40, 2  ;;  %v3895_v47 = vld [vmem:[%s3830_s8 + $0x68] sm:$0xff]  ;;  %v1057_v49 = vrot.slane %v3892_v46, 2  ;;  %v3902_v51 = vld [vmem:[%s3830_s8 + $0x78] sm:$0xff]  ;;  %v3905_v52 = vld [vmem:[%s3830_s8 + $0x80] sm:$0xff] }
  0xb9   : > { %v1049_v35 = vsel %vm1036_vm0, %v1047_v30, %v1048_v32  ;;  %v1051_v44 = vsel %vm1036_vm0, %v1048_v32, %v1050_v37  ;;  %v3908_v53 = vld [vmem:[%s3830_s8 + $0x70] sm:$0xf]  ;;  %v1058_v54 = vrot.slane %v3895_v47, 2  ;;  %v1062_v55 = vrot.slane %v3902_v51, 2  ;;  %v3918_v59 = vld [vmem:[%s3830_s8 + $0x88] sm:$0xf] }
  0xba   : > { %1125 = vrot.lane.b32.xlu2 %v1049_v35, %s3441_s9  ;;  %v1056_v48 = vsel %vm1036_vm0, %v1053_v42, %v1055_v43  ;;  %v1054_v50 = vsel %vm1036_vm0, %v1052_v45, %v1053_v42  ;;  %v1063_v56 = vrot.slane %v3905_v52, 2  ;;  %v1060_v58 = vrot.slane %v3908_v53, 2  ;;  %v3925_v63 = vld [vmem:[%s3830_s8 + $0x98] sm:$0xff]  ;;  %v3928_v0 = vld [vmem:[%s3830_s8 + $0xa0] sm:$0xf]  ;;  %v3931_v1 = vld [vmem:[%s3830_s8 + $0x90] sm:$0xff] }
  0xbb   : > { %v1059_v57 = vsel %vm1036_vm0, %v1057_v49, %v1058_v54  ;;  %v1065_v61 = vrot.slane %v3918_v59, 2  ;;  %v1068_v2 = vrot.slane %v3925_v63, 2  ;;  %v1070_v3 = vrot.slane %v3928_v0, 2  ;;  %v3940_v6 = vld [vmem:[%s3830_s8 + $0xa8] sm:$0xff]  ;;  %v3943_v7 = vld [vmem:[%s3830_s8 + $0xb0] sm:$0xff]  ;;  %v3950_v11 = vld [vmem:[%s3830_s8 + $0xc0] sm:$0xff] }
  0xbc   : > { %v1064_v60 = vsel %vm1036_vm0, %v1062_v55, %v1063_v56  ;;  %v1061_v62 = vsel %vm1036_vm0, %v1058_v54, %v1060_v58  ;;  %v1067_v5 = vrot.slane %v3931_v1, 2  ;;  %v1072_v9 = vrot.slane %v3940_v6, 2  ;;  %v3953_v12 = vld [vmem:[%s3830_s8 + $0xc8] sm:$0xff]  ;;  %v3956_v13 = vld [vmem:[%s3830_s8 + $0xb8] sm:$0xf]  ;;  %v3973_v31 = vld [vmem:[%s3830_s8 + $0xe0] sm:$0xff] }
  0xbd   : > { %v1066_v4 = vsel %vm1036_vm0, %v1063_v56, %v1065_v61  ;;  %v1071_v8 = vsel %vm1036_vm0, %v1068_v2, %v1070_v3  ;;  %v1073_v14 = vrot.slane %v3943_v7, 2  ;;  %v1077_v15 = vrot.slane %v3950_v11, 2  ;;  %v3966_v23 = vld [vmem:[%s3830_s8 + $0xd0] sm:$0xf]  ;;  %v3976_v32 = vld [vmem:[%s3830_s8 + $0xe8] sm:$0xf] }
  0xbe   : > { %v1069_v10 = vsel %vm1036_vm0, %v1067_v5, %v1068_v2  ;;  %v1078_v19 = vrot.slane %v3953_v12, 2  ;;  %v1075_v22 = vrot.slane %v3956_v13, 2  ;;  %v1080_v28 = vrot.slane %v3966_v23, 2  ;;  %v3979_v33 = vld [vmem:[%s3830_s8 + $0xd8] sm:$0xff]  ;;  %v3988_v42 = vld [vmem:[%s3830_s8 + $0xf0] sm:$0xff]  ;;  %v3998_v49 = vld [vmem:[%s3830_s8 + $0x108] sm:$0xff] }
  0xbf   : > { %1123 = vrot.lane.b32.xlu1 %v1046_v36, %s3441_s9  ;;  %v1074_v20 = vsel %vm1036_vm0, %v1072_v9, %v1073_v14  ;;  %v1083_v35 = vrot.slane %v3973_v31, 2  ;;  %v1085_v36 = vrot.slane %v3976_v32, 2  ;;  %v3991_v43 = vld [vmem:[%s3830_s8 + $0xf8] sm:$0xff]  ;;  %v1087_v45 = vrot.slane %v3988_v42, 2  ;;  %v4004_v54 = vld [vmem:[%s3830_s8 + $0x100] sm:$0xf] }
  0xc0   : > { %1119 = vrot.lane.b32.xlu0 %v1041_v38, %s3441_s9  ;;  %v1079_v25 = vsel %vm1036_vm0, %v1077_v15, %v1078_v19  ;;  %v1076_v30 = vsel %vm1036_vm0, %v1073_v14, %v1075_v22  ;;  %v1081_v37 = vsel %vm1036_vm0, %v1078_v19, %v1080_v28  ;;  %v1082_v38 = vrot.slane %v3979_v33, 2  ;;  %v4014_v61 = vld [vmem:[%s3830_s8 + $0x118] sm:$0xf]  ;;  %v4024_v5 = vld [vmem:[%s3830_s8 + $0x130] sm:$0xf]  ;;  %960 = vst.msk [vmem:[#allocation2 + $0x20] sm:$0xff] %vm955_vm1, %v3856_v27 }
  0xc1   : > { %v1088_v55 = vrot.slane %v3991_v43, 2  ;;  %v1092_v56 = vrot.slane %v3998_v49, 2  ;;  %v1095_v2 = vrot.slane %v4014_v61, 2  ;;  %v4036_v19 = vld [vmem:[%s3830_s8 + $0x138] sm:$0xff]  ;;  %956 = vst.msk [vmem:[#allocation2] sm:$0xff] %vm955_vm1, %v3839_v18  ;;  %vm1213_vm3 = vcmask 64544  }
  0xc2   : > { %1127 = vrot.lane.b32.xlu2 %v1051_v44, %s3441_s9  ;;  %v1086_v44 = vsel %vm1036_vm0, %v1083_v35, %v1085_v36  ;;  %v4052_v36 = vld [vmem:[%s3830_s8 + $0x148] sm:$0xf]  ;;  %957 = vst.msk [vmem:[#allocation2 + $0x8] sm:$0xff] %vm955_vm1, %v3844_v21  ;;  %vm1423_vm4 = vcmask 97344   ;;  %vm1584_vm5 = vcmask 130144   ;;  %vm1809_vm6 = vcmask 162944  }
  0xc3   : > { %v1089_v58 = vsel %vm1036_vm0, %v1087_v45, %v1088_v55  ;;  %958 = vst.msk [vmem:[#allocation2 + $0x10] sm:$0xff] %vm955_vm1, %v3833_v16  ;;  %vm2018_vm7 = vcmask 195744   ;;  %vm2179_vm8 = vcmask 228544   ;;  %vm2404_vm9 = vcmask 261344   ;;  %s3196_s27 = sshll.u32 %s3827_s6, 8  ;;  %s3037_s30 = scalar_lea.sflag [#allocation5], %s3827_s6 }
  0xc4   : > { %959 = vst.msk [vmem:[#allocation2 + $0x18] sm:$0xff] %vm955_vm1, %v3836_v17  ;;  %vm2613_vm10 = vcmask 294144   ;;  %vm2683_vm11 = vcmask 293888   ;;  %s5385_s28 = scalar_lea.vmem [#allocation4], %s3196_s27 }
  0xc5   : > { %961 = vst.msk [vmem:[#allocation2 + $0x28] sm:$0xff] %vm955_vm1, %v3861_v29 }
  0xc6   : > { %962 = vst.msk [vmem:[#allocation2 + $0x30] sm:$0xff] %vm955_vm1, %v3883_v41 }
  0xc7   : > { %1131 = vrot.lane.b32.xlu1 %v1056_v48, %s3441_s9  ;;  %v1084_v48 = vsel %vm1036_vm0, %v1082_v38, %v1083_v35  ;;  %v4049_v35 = vld [vmem:[%s3830_s8 + $0x158] sm:$0xff]  ;;  %963 = vst.msk [vmem:[#allocation2 + $0x38] sm:$0xff] %vm955_vm1, %v3877_v39 }
  0xc8   : > { %1129 = vrot.lane.b32.xlu0 %v1054_v50, %s3441_s9  ;;  %v4001_v50 = vld [vmem:[%s3830_s8 + $0x110] sm:$0xff]  ;;  %964 = vst.msk [vmem:[#allocation2 + $0x40] sm:$0xff] %vm955_vm1, %v3892_v46 }
  0xc9   : > { %965 = vst.msk [vmem:[#allocation2 + $0x48] sm:$0xff] %vm955_vm1, %v3895_v47 }
  0xca   : > { %1133 = vrot.lane.b32.xlu2 %v1059_v57, %s3441_s9  ;;  %v1093_v57 = vrot.slane %v4001_v50, 2  ;;  %966 = vst.msk [vmem:[#allocation2 + $0x50] sm:$0xff] %vm955_vm1, %v3902_v51 }
  0xcb   : > { %967 = vst.msk [vmem:[#allocation2 + $0x58] sm:$0xff] %vm955_vm1, %v3905_v52 }
  0xcc   : > { %v1096_v14 = vsel %vm1036_vm0, %v1093_v57, %v1095_v2  ;;  %v4075_v2 = vld [vmem:[%s3830_s8 + $0x168] sm:$0xff]  ;;  %968 = vst.msk [vmem:[#allocation2 + $0x60] sm:$0xff] %vm955_vm1, %v3931_v1 }
  0xcd   : > { %969 = vst.msk [vmem:[#allocation2 + $0x68] sm:$0xff] %vm955_vm1, %v3925_v63 }
  0xce   : > { %970 = vst.msk [vmem:[#allocation2 + $0x70] sm:$0xff] %vm955_vm1, %v3940_v6 }
  0xcf   : > { %1137 = vrot.lane.b32.xlu1 %v1064_v60, %s3441_s9  ;;  %v1090_v60 = vrot.slane %v4004_v54, 2  ;;  %971 = vst.msk [vmem:[#allocation2 + $0x78] sm:$0xff] %vm955_vm1, %v3943_v7 }
  0xd0   : > { %1135 = vrot.lane.b32.xlu0 %v1061_v62, %s3441_s9  ;;  %v1094_v62 = vsel %vm1036_vm0, %v1092_v56, %v1093_v57  ;;  %972 = vst.msk [vmem:[#allocation2 + $0x80] sm:$0xff] %vm955_vm1, %v3950_v11 }
  0xd1   : > { %v1091_v3 = vsel %vm1036_vm0, %v1088_v55, %v1090_v60  ;;  %v4062_v55 = vld [vmem:[%s3830_s8 + $0x160] sm:$0xf]  ;;  %v4069_v60 = vld [vmem:[%s3830_s8 + $0x170] sm:$0xff]  ;;  %973 = vst.msk [vmem:[#allocation2 + $0x88] sm:$0xff] %vm955_vm1, %v3953_v12 }
  0xd2   : > { %1139 = vrot.lane.b32.xlu2 %v1066_v4, %s3441_s9  ;;  %v4021_v4 = vld [vmem:[%s3830_s8 + $0x128] sm:$0xff]  ;;  %v1110_v57 = vrot.slane %v4062_v55, 2  ;;  %974 = vst.msk [vmem:[#allocation2 + $0x90] sm:$0xff] %vm955_vm1, %v3979_v33 }
  0xd3   : > { %v1098_v9 = vrot.slane %v4021_v4, 2  ;;  %975 = vst.msk [vmem:[#allocation2 + $0x98] sm:$0xff] %vm955_vm1, %v3973_v31 }
  0xd4   : > { %976 = vst.msk [vmem:[#allocation2 + $0xa0] sm:$0xff] %vm955_vm1, %v3988_v42 }
  0xd5   : > { %977 = vst.msk [vmem:[#allocation2 + $0xa8] sm:$0xff] %vm955_vm1, %v3991_v43 }
  0xd6   : > { %978 = vst.msk [vmem:[#allocation2 + $0xb0] sm:$0xff] %vm955_vm1, %v3998_v49 }
  0xd7   : > { %1143 = vrot.lane.b32.xlu1 %v1071_v8, %s3441_s9  ;;  %v4027_v8 = vld [vmem:[%s3830_s8 + $0x120] sm:$0xff]  ;;  %979 = vst.msk [vmem:[#allocation2 + $0xb8] sm:$0xff] %vm955_vm1, %v4001_v50 }
  0xd8   : > { %1141 = vrot.lane.b32.xlu0 %v1069_v10, %s3441_s9  ;;  %v1100_v10 = vrot.slane %v4024_v5, 2  ;;  %v1097_v15 = vrot.slane %v4027_v8, 2  ;;  %980 = vst.msk [vmem:[#allocation2 + $0xc0] sm:$0xff] %vm955_vm1, %v4027_v8 }
  0xd9   : > { %981 = vst.msk [vmem:[#allocation2 + $0xc8] sm:$0xff] %vm955_vm1, %v4021_v4 }
  0xda   : > { %1145 = vrot.lane.b32.xlu2 %v1074_v20, %s3441_s9  ;;  %v4039_v20 = vld [vmem:[%s3830_s8 + $0x140] sm:$0xff]  ;;  %v1101_v22 = vsel %vm1036_vm0, %v1098_v9, %v1100_v10  ;;  %v1099_v28 = vsel %vm1036_vm0, %v1097_v15, %v1098_v9  ;;  %982 = vst.msk [vmem:[#allocation2 + $0xd0] sm:$0xff] %vm955_vm1, %v4036_v19 }
  0xdb   : > { %983 = vst.msk [vmem:[#allocation2 + $0xd8] sm:$0xff] %vm955_vm1, %v4039_v20 }
  0xdc   : > { %985 = vst.msk [vmem:[#allocation2 + $0xe8] sm:$0xff] %vm955_vm1, %v4049_v35 }
  0xdd   : > { %986 = vst.msk [vmem:[#allocation2 + $0xf0] sm:$0xff] %vm955_vm1, %v4075_v2 }
  0xde   : > { %987 = vst.msk [vmem:[#allocation2 + $0xf8] sm:$0xff] %vm955_vm1, %v4069_v60 }
  0xdf   : > { %1149 = vrot.lane.b32.xlu1 %v1079_v25, %s3441_s9  ;;  %v1102_v25 = vrot.slane %v4036_v19, 2 }
  0xe0   : > { %1147 = vrot.lane.b32.xlu0 %v1076_v30, %s3441_s9  ;;  %v4046_v30 = vld [vmem:[%s3830_s8 + $0x150] sm:$0xff] }
  0xe1   : > { %v1107_v38 = vrot.slane %v4046_v30, 2  ;;  %984 = vst.msk [vmem:[#allocation2 + $0xe0] sm:$0xff] %vm955_vm1, %v4046_v30 }
  0xe2   : > { %1151 = vrot.lane.b32.xlu2 %v1081_v37, %s3441_s9  ;;  %v1103_v37 = vrot.slane %v4039_v20, 2 }
  0xe4   : > { %v1104_v45 = vsel %vm1036_vm0, %v1102_v25, %v1103_v37 }
  0xe7   : > { %1155 = vrot.lane.b32.xlu1 %v1086_v44, %s3441_s9  ;;  %v1108_v44 = vrot.slane %v4049_v35, 2 }
  0xe8   : > { %1153 = vrot.lane.b32.xlu0 %v1084_v48, %s3441_s9  ;;  %v1105_v48 = vrot.slane %v4052_v36, 2 }
  0xe9   : > { %v1109_v56 = vsel %vm1036_vm0, %v1107_v38, %v1108_v44  ;;  %v1111_v10 = vsel %vm1036_vm0, %v1108_v44, %v1110_v57  ;;  %v1260_v44 = vrot.slane %v3869_v34, 4  ;;  %v1262_v34 = vrot.slane %v3883_v41, 4 }
  0xea   : > { %1157 = vrot.lane.b32.xlu2 %v1089_v58, %s3441_s9  ;;  %v1106_v58 = vsel %vm1036_vm0, %v1103_v37, %v1105_v48  ;;  %v1253_v37 = vrot.slane %v3836_v17, 4  ;;  %v1255_v17 = vrot.slane %v3849_v24, 4  ;;  %v1258_v24 = vrot.slane %v3861_v29, 4 }
  0xeb   : > { %v1257_v48 = vrot.slane %v3856_v27, 4  ;;  %v1263_v57 = vrot.slane %v3877_v39, 4  ;;  %v1267_v41 = vrot.slane %v3892_v46, 4  ;;  %v1265_v39 = vrot.slane %v3880_v40, 4 }
  0xec   : > { %v1261_v29 = vsel %vm1246_vm2, %v1258_v24, %v1260_v44  ;;  %v1287_v44 = vrot.slane %v3950_v11, 4  ;;  %v1297_v11 = vrot.slane %v3988_v42, 4 }
  0xed   : > { %v1259_v27 = vsel %vm1246_vm2, %v1257_v48, %v1258_v24  ;;  %v1266_v40 = vsel %vm1246_vm2, %v1263_v57, %v1265_v39  ;;  %v1292_v48 = vrot.slane %v3979_v33, 4  ;;  %v1295_v33 = vrot.slane %v3976_v32, 4 }
  0xee   : > { %v1303_v32 = vrot.slane %v4001_v50, 4 }
  0xef   : > { %1161 = vrot.lane.b32.xlu1 %v1094_v62, %s3441_s9  ;;  %v4072_v62 = vld [vmem:[%s3830_s8 + $0x178] sm:$0xf] }
  0xf0   : > { %1159 = vrot.lane.b32.xlu0 %v1091_v3, %s3441_s9  ;;  %v1113_v3 = vrot.slane %v4069_v60, 2  ;;  %v1115_v9 = vrot.slane %v4072_v62, 2 }
  0xf2   : > { %1163 = vrot.lane.b32.xlu2 %v1096_v14, %s3441_s9  ;;  %v1112_v14 = vrot.slane %v4075_v2, 2  ;;  %v1116_v15 = vsel %vm1036_vm0, %v1113_v3, %v1115_v9 }
  0xf4   : > { %v1114_v25 = vsel %vm1036_vm0, %v1112_v14, %v1113_v3  ;;  %v1264_v3 = vsel %vm1246_vm2, %v1262_v34, %v1263_v57  ;;  %v1298_v34 = vrot.slane %v3991_v43, 4  ;;  %v1305_v43 = vrot.slane %v4014_v61, 4 }
  0xf5   : > { %v1308_v61 = vrot.slane %v4021_v4, 4 }
  0xf7   : > { %1167 = vrot.lane.b32.xlu1 %v1101_v22, %s3441_s9  ;;  %v1247_v22 = vrot.slane %v3839_v18, 4  ;;  %v1252_v18 = vrot.slane %v3833_v16, 4 }
  0xf8   : > { %1165 = vrot.lane.b32.xlu0 %v1099_v28, %s3441_s9  ;;  %v1248_v28 = vrot.slane %v3844_v21, 4  ;;  %v1250_v21 = vrot.slane %v3853_v26, 4 }
  0xf9   : > { %v1254_v16 = vsel %vm1246_vm2, %v1252_v18, %v1253_v37  ;;  %v1283_v18 = vrot.slane %v3943_v7, 4  ;;  %v1290_v7 = vrot.slane %v3966_v23, 4  ;;  %v1293_v23 = vrot.slane %v3973_v31, 4 }
  0xfa   : > { %1169 = vrot.lane.b32.xlu2 %v1104_v45, %s3441_s9  ;;  %v1249_v38 = vsel %vm1246_vm2, %v1247_v22, %v1248_v28  ;;  %v1251_v26 = vsel %vm1246_vm2, %v1248_v28, %v1250_v21  ;;  %v1256_v45 = vsel %vm1246_vm2, %v1253_v37, %v1255_v17  ;;  %v1299_v31 = vsel %vm1246_vm2, %v1297_v11, %v1298_v34  ;;  %v4337_v11 = vld [vmem:[%s3830_s8 + $0x1e8] sm:$0xff] }
  0xfb   : > { %v1296_v42 = vsel %vm1246_vm2, %v1293_v23, %v1295_v33 }
  0xff   : > { %1173 = vrot.lane.b32.xlu1 %v1109_v56, %s3441_s9 }
 0x100   : > { %1171 = vrot.lane.b32.xlu0 %v1106_v58, %s3441_s9  ;;  %v1268_v58 = vrot.slane %v3895_v47, 4  ;;  %v1270_v47 = vrot.slane %v3908_v53, 4  ;;  %v1273_v53 = vrot.slane %v3905_v52, 4 }
 0x102   : > { %1175 = vrot.lane.b32.xlu2 %v1111_v10, %s3441_s9  ;;  %v1269_v46 = vsel %vm1246_vm2, %v1267_v41, %v1268_v58  ;;  %v1275_v10 = vrot.slane %v3918_v59, 4  ;;  %v1271_v14 = vsel %vm1246_vm2, %v1268_v58, %v1270_v47  ;;  %v1278_v59 = vrot.slane %v3925_v63, 4 }
 0x103   : > { %v1300_v41 = vrot.slane %v4004_v54, 4  ;;  %v1306_v47 = vsel %vm1246_vm2, %v1303_v32, %v1305_v43 }
 0x104   : > { %v1276_v22 = vsel %vm1246_vm2, %v1273_v53, %v1275_v10 }
 0x107   : > { %1179 = vrot.lane.b32.xlu1 %v1116_v15, %s3441_s9  ;;  %v1272_v15 = vrot.slane %v3902_v51, 4  ;;  %v1282_v51 = vrot.slane %v3940_v6, 4 }
 0x108   : > { %1177 = vrot.lane.b32.xlu0 %v1114_v25, %s3441_s9  ;;  %v1277_v25 = vrot.slane %v3931_v1, 4  ;;  %v1280_v1 = vrot.slane %v3928_v0, 4  ;;  %v1288_v0 = vrot.slane %v3953_v12, 4 }
 0x109   : > { %v1274_v28 = vsel %vm1246_vm2, %v1272_v15, %v1273_v53  ;;  %v1284_v63 = vsel %vm1246_vm2, %v1282_v51, %v1283_v18  ;;  %v1313_v53 = vrot.slane %v4039_v20, 4  ;;  %v1320_v20 = vrot.slane %v4062_v55, 4 }
 0x10a   : > { %1327 = vrot.lane.b32.xlu2 %v1249_v38, %s3442_s10  ;;  %v1279_v37 = vsel %vm1246_vm2, %v1277_v25, %v1278_v59  ;;  %v1281_v6 = vsel %vm1246_vm2, %v1278_v59, %v1280_v1  ;;  %v1289_v12 = vsel %vm1246_vm2, %v1287_v44, %v1288_v0  ;;  %v1317_v59 = vrot.slane %v4046_v30, 4 }
 0x10b   : > { %v1325_v1 = vrot.slane %v4072_v62, 4  ;;  %v4294_v62 = vld [vmem:[%s3830_s8 + $0x188] sm:$0xff] }
 0x10f   : > { %1331 = vrot.lane.b32.xlu1 %v1254_v16, %s3442_s10  ;;  %v1285_v16 = vrot.slane %v3956_v13, 4 }
 0x110   : > { %1329 = vrot.lane.b32.xlu0 %v1251_v26, %s3442_s10 }
 0x111   : > { %v1286_v26 = vsel %vm1246_vm2, %v1283_v18, %v1285_v16  ;;  %v1322_v18 = vrot.slane %v4075_v2, 4 }
 0x112   : > { %1333 = vrot.lane.b32.xlu2 %v1256_v45, %s3442_s10  ;;  %v1291_v45 = vsel %vm1246_vm2, %v1288_v0, %v1290_v7  ;;  %v4304_v0 = vld [vmem:[%s3830_s8 + $0x198] sm:$0xff] }
 0x114   : > { %v1126_v56 = vpop.permute.xlu2 %1125 }
 0x115   : > { %1218 = vst.msk [vmem:[#allocation2 + $0x20] sm:$0xff] %vm1213_vm3, %v1126_v56 }
 0x117   : > { %1337 = vrot.lane.b32.xlu1 %v1261_v29, %s3442_s10 }
 0x118   : > { %1335 = vrot.lane.b32.xlu0 %v1259_v27, %s3442_s10  ;;  %v1294_v27 = vsel %vm1246_vm2, %v1292_v48, %v1293_v23 }
 0x11a   : > { %1339 = vrot.lane.b32.xlu2 %v1264_v3, %s3442_s10  ;;  %v1301_v3 = vsel %vm1246_vm2, %v1298_v34, %v1300_v41  ;;  %v4340_v34 = vld [vmem:[%s3830_s8 + $0x1e0] sm:$0xff] }
 0x11b   : > { %v4358_v41 = vld [vmem:[%s3830_s8 + $0x200] sm:$0xff] }
 0x11c   : > { %v1128_v9 = vpop.permute.xlu2 %1127 }
 0x11d   : > { %1219 = vst.msk [vmem:[#allocation2 + $0x28] sm:$0xff] %vm1213_vm3, %v1128_v9 }
 0x11f   : > { %1343 = vrot.lane.b32.xlu1 %v1269_v46, %s3442_s10  ;;  %v1302_v46 = vrot.slane %v3998_v49, 4  ;;  %v1312_v49 = vrot.slane %v4036_v19, 4 }
 0x120   : > { %1341 = vrot.lane.b32.xlu0 %v1266_v40, %s3442_s10  ;;  %v1307_v40 = vrot.slane %v4027_v8, 4  ;;  %v1310_v8 = vrot.slane %v4024_v5, 4  ;;  %v1318_v5 = vrot.slane %v4049_v35, 4 }
 0x121   : > { %v1304_v50 = vsel %vm1246_vm2, %v1302_v46, %v1303_v32  ;;  %v1314_v4 = vsel %vm1246_vm2, %v1312_v49, %v1313_v53  ;;  %v4402_v49 = vld [vmem:[%s3830_s8 + $0x260] sm:$0xff] }
 0x122   : > { %1345 = vrot.lane.b32.xlu2 %v1271_v14, %s3442_s10  ;;  %v1309_v10 = vsel %vm1246_vm2, %v1307_v40, %v1308_v61  ;;  %v1311_v19 = vsel %vm1246_vm2, %v1308_v61, %v1310_v8  ;;  %v1321_v51 = vsel %vm1246_vm2, %v1318_v5, %v1320_v20  ;;  %v1319_v35 = vsel %vm1246_vm2, %v1317_v59, %v1318_v5  ;;  %v4429_v20 = vld [vmem:[%s3830_s8 + $0x288] sm:$0xff] }
 0x123   : > { %v1634_v8 = vrot.slane %v4294_v62, 2 }
 0x124   : > { %v1134_v52 = vpop.permute.xlu2 %1133 }
 0x125   : > { %1222 = vst.msk [vmem:[#allocation2 + $0x40] sm:$0xff] %vm1213_vm3, %v1134_v52 }
 0x127   : > { %1349 = vrot.lane.b32.xlu1 %v1276_v22, %s3442_s10  ;;  %v1315_v22 = vrot.slane %v4052_v36, 4 }
 0x128   : > { %1347 = vrot.lane.b32.xlu0 %v1274_v28, %s3442_s10 }
 0x129   : > { %v1122_v38 = vpop.permute.xlu1 %1121  ;;  %v1316_v28 = vsel %vm1246_vm2, %v1313_v53, %v1315_v22 }
 0x12a   : > { %1216 = vst.msk [vmem:[#allocation2 + $0x10] sm:$0xff] %vm1213_vm3, %v1122_v38  ;;  %v1118_v21 = vpop.permute.xlu0 %1117  ;;  %1351 = vrot.lane.b32.xlu2 %v1279_v37, %s3442_s10  ;;  %v1323_v37 = vrot.slane %v4069_v60, 4  ;;  %v4286_v60 = vld [vmem:[%s3830_s8 + $0x180] sm:$0xff] }
 0x12b   : > { %1214 = vst.msk [vmem:[#allocation2] sm:$0xff] %vm1213_vm3, %v1118_v21 }
 0x12c   : > { %v1140_v17 = vpop.permute.xlu2 %1139  ;;  %v1324_v30 = vsel %vm1246_vm2, %v1322_v18, %v1323_v37  ;;  %v1326_v21 = vsel %vm1246_vm2, %v1323_v37, %v1325_v1  ;;  %v1638_v1 = vrot.slane %v4304_v0, 2 }
 0x12d   : > { %1225 = vst.msk [vmem:[#allocation2 + $0x58] sm:$0xff] %vm1213_vm3, %v1140_v17  ;;  %v4301_v17 = vld [vmem:[%s3830_s8 + $0x1a0] sm:$0xff] }
 0x12f   : > { %1355 = vrot.lane.b32.xlu1 %v1284_v63, %s3442_s10 }
 0x130   : > { %1353 = vrot.lane.b32.xlu0 %v1281_v6, %s3442_s10 }
 0x131   : > { %v1124_v24 = vpop.permute.xlu1 %1123 }
 0x132   : > { %1217 = vst.msk [vmem:[#allocation2 + $0x18] sm:$0xff] %vm1213_vm3, %v1124_v24  ;;  %v1120_v13 = vpop.permute.xlu0 %1119  ;;  %1357 = vrot.lane.b32.xlu2 %v1286_v26, %s3442_s10  ;;  %v4312_v26 = vld [vmem:[%s3830_s8 + $0x1b0] sm:$0xff] }
 0x133   : > { %1215 = vst.msk [vmem:[#allocation2 + $0x8] sm:$0xff] %vm1213_vm3, %v1120_v13  ;;  %v4319_v13 = vld [vmem:[%s3830_s8 + $0x1c8] sm:$0xff] }
 0x134   : > { %v1146_v29 = vpop.permute.xlu2 %1145 }
 0x135   : > { %1228 = vst.msk [vmem:[#allocation2 + $0x70] sm:$0xff] %vm1213_vm3, %v1146_v29 }
 0x137   : > { %1361 = vrot.lane.b32.xlu1 %v1291_v45, %s3442_s10  ;;  %v4322_v45 = vld [vmem:[%s3830_s8 + $0x1b8] sm:$0xff] }
 0x138   : > { %1359 = vrot.lane.b32.xlu0 %v1289_v12, %s3442_s10  ;;  %v4330_v12 = vld [vmem:[%s3830_s8 + $0x1d0] sm:$0xff] }
 0x139   : > { %v1132_v56 = vpop.permute.xlu1 %1131 }
 0x13a   : > { %1221 = vst.msk [vmem:[#allocation2 + $0x38] sm:$0xff] %vm1213_vm3, %v1132_v56  ;;  %v1130_v57 = vpop.permute.xlu0 %1129  ;;  %1363 = vrot.lane.b32.xlu2 %v1294_v27, %s3442_s10  ;;  %v4348_v56 = vld [vmem:[%s3830_s8 + $0x1f8] sm:$0xff] }
 0x13b   : > { %1220 = vst.msk [vmem:[#allocation2 + $0x30] sm:$0xff] %vm1213_vm3, %v1130_v57 }
 0x13c   : > { %v1152_v58 = vpop.permute.xlu2 %1151 }
 0x13d   : > { %1231 = vst.msk [vmem:[#allocation2 + $0x88] sm:$0xff] %vm1213_vm3, %v1152_v58  ;;  %v4366_v58 = vld [vmem:[%s3830_s8 + $0x218] sm:$0xff] }
 0x13f   : > { %1367 = vrot.lane.b32.xlu1 %v1299_v31, %s3442_s10  ;;  %v4355_v31 = vld [vmem:[%s3830_s8 + $0x210] sm:$0xff] }
 0x140   : > { %1365 = vrot.lane.b32.xlu0 %v1296_v42, %s3442_s10 }
 0x141   : > { %v1138_v39 = vpop.permute.xlu1 %1137 }
 0x142   : > { %1224 = vst.msk [vmem:[#allocation2 + $0x50] sm:$0xff] %vm1213_vm3, %v1138_v39  ;;  %v1136_v54 = vpop.permute.xlu0 %1135  ;;  %1369 = vrot.lane.b32.xlu2 %v1301_v3, %s3442_s10  ;;  %v4373_v3 = vld [vmem:[%s3830_s8 + $0x230] sm:$0xff]  ;;  %v4376_v39 = vld [vmem:[%s3830_s8 + $0x228] sm:$0xff] }
 0x143   : > { %1223 = vst.msk [vmem:[#allocation2 + $0x48] sm:$0xff] %vm1213_vm3, %v1136_v54  ;;  %v4384_v54 = vld [vmem:[%s3830_s8 + $0x240] sm:$0xff] }
 0x144   : > { %v1158_v9 = vpop.permute.xlu2 %1157 }
 0x145   : > { %1234 = vst.msk [vmem:[#allocation2 + $0xa0] sm:$0xff] %vm1213_vm3, %v1158_v9  ;;  %v4394_v9 = vld [vmem:[%s3830_s8 + $0x248] sm:$0xff] }
 0x147   : > { %1373 = vrot.lane.b32.xlu1 %v1306_v47, %s3442_s10 }
 0x148   : > { %1371 = vrot.lane.b32.xlu0 %v1304_v50, %s3442_s10  ;;  %v4391_v50 = vld [vmem:[%s3830_s8 + $0x258] sm:$0xff] }
 0x149   : > { %v1144_v14 = vpop.permute.xlu1 %1143 }
 0x14a   : > { %1227 = vst.msk [vmem:[#allocation2 + $0x68] sm:$0xff] %vm1213_vm3, %v1144_v14  ;;  %v1142_v15 = vpop.permute.xlu0 %1141  ;;  %1375 = vrot.lane.b32.xlu2 %v1309_v10, %s3442_s10  ;;  %v1633_v14 = vrot.slane %v4286_v60, 2 }
 0x14b   : > { %1226 = vst.msk [vmem:[#allocation2 + $0x60] sm:$0xff] %vm1213_vm3, %v1142_v15  ;;  %v4411_v15 = vld [vmem:[%s3830_s8 + $0x278] sm:$0xff] }
 0x14c   : > { %v1164_v25 = vpop.permute.xlu2 %1163  ;;  %v4424_v5 = vsel %vm1036_vm0, %v1633_v14, %v1634_v8 }
 0x14d   : > { %1237 = vst.msk [vmem:[#allocation2 + $0xb8] sm:$0xff] %vm1213_vm3, %v1164_v25  ;;  %v1643_v25 = vrot.slane %v4312_v26, 2 }
 0x14f   : > { %1379 = vrot.lane.b32.xlu1 %v1314_v4, %s3442_s10  ;;  %v4414_v4 = vld [vmem:[%s3830_s8 + $0x270] sm:$0xff] }
 0x150   : > { %1377 = vrot.lane.b32.xlu0 %v1311_v19, %s3442_s10  ;;  %v1644_v19 = vrot.slane %v4322_v45, 2 }
 0x151   : > { %v1150_v52 = vpop.permute.xlu1 %1149 }
 0x152   : > { %1230 = vst.msk [vmem:[#allocation2 + $0x80] sm:$0xff] %vm1213_vm3, %v1150_v52  ;;  %v1148_v36 = vpop.permute.xlu0 %1147  ;;  %1381 = vrot.lane.b32.xlu2 %v1316_v28, %s3442_s10  ;;  %v4438_v59 = vsel %vm1036_vm0, %v1643_v25, %v1644_v19  ;;  %v1654_v25 = vrot.slane %v4337_v11, 2 }
 0x153   : > { %1229 = vst.msk [vmem:[#allocation2 + $0x78] sm:$0xff] %vm1213_vm3, %v1148_v36  ;;  %v4441_v36 = vld [vmem:[%s3830_s8 + $0x2a0] sm:$0xff] }
 0x154   : > { %v1170_v55 = vpop.permute.xlu2 %1169 }
 0x155   : > { %1240 = vst.msk [vmem:[#allocation2 + $0xd0] sm:$0xff] %vm1213_vm3, %v1170_v55 }
 0x157   : > { %1385 = vrot.lane.b32.xlu1 %v1321_v51, %s3442_s10  ;;  %v4444_v51 = vld [vmem:[%s3830_s8 + $0x290] sm:$0xff] }
 0x158   : > { %1383 = vrot.lane.b32.xlu0 %v1319_v35, %s3442_s10  ;;  %v4452_v35 = vld [vmem:[%s3830_s8 + $0x2a8] sm:$0xff] }
 0x159   : > { %v1156_v38 = vpop.permute.xlu1 %1155 }
 0x15a   : > { %1233 = vst.msk [vmem:[#allocation2 + $0x98] sm:$0xff] %vm1213_vm3, %v1156_v38  ;;  %v1154_v2 = vpop.permute.xlu0 %1153  ;;  %1387 = vrot.lane.b32.xlu2 %v1324_v30, %s3442_s10  ;;  %v1648_v30 = vrot.slane %v4319_v13, 2  ;;  %v1649_v38 = vrot.slane %v4330_v12, 2 }
 0x15b   : > { %1232 = vst.msk [vmem:[#allocation2 + $0x90] sm:$0xff] %vm1213_vm3, %v1154_v2  ;;  %v4462_v2 = vld [vmem:[%s3830_s8 + $0x2c0] sm:$0xff] }
 0x15c   : > { %v1176_v63 = vpop.permute.xlu2 %1175 }
 0x15d   : > { %1243 = vst.msk [vmem:[#allocation2 + $0xe8] sm:$0xff] %vm1213_vm3, %v1176_v63 }
 0x15f   : > { %1488 = vrot.lane.b32.xlu1 %v4286_v60, %s3443_s11 }
 0x160   : > { %1389 = vrot.lane.b32.xlu0 %v1326_v21, %s3442_s10  ;;  %v4465_v21 = vld [vmem:[%s3830_s8 + $0x2b8] sm:$0xff] }
 0x161   : > { %v1162_v16 = vpop.permute.xlu1 %1161 }
 0x162   : > { %1236 = vst.msk [vmem:[#allocation2 + $0xb0] sm:$0xff] %vm1213_vm3, %v1162_v16  ;;  %v1160_v6 = vpop.permute.xlu0 %1159  ;;  %1490 = vrot.lane.b32.xlu2 %v4294_v62, %s3443_s11  ;;  %v1639_v16 = vrot.slane %v4301_v17, 2 }
 0x163   : > { %1235 = vst.msk [vmem:[#allocation2 + $0xa8] sm:$0xff] %vm1213_vm3, %v1160_v6  ;;  %v1659_v6 = vrot.slane %v4358_v41, 2 }
 0x164   : > { %v1328_v7 = vpop.permute.xlu2 %1327 }
 0x165   : > { %1424 = vst.msk [vmem:[#allocation2] sm:$0xff] %vm1423_vm4, %v1328_v7  ;;  %v1658_v7 = vrot.slane %v4348_v56, 2 }
 0x167   : > { %1494 = vrot.lane.b32.xlu1 %v4301_v17, %s3443_s11 }
 0x168   : > { %1492 = vrot.lane.b32.xlu0 %v4304_v0, %s3443_s11 }
 0x169   : > { %v1168_v24 = vpop.permute.xlu1 %1167 }
 0x16a   : > { %1239 = vst.msk [vmem:[#allocation2 + $0xc8] sm:$0xff] %vm1213_vm3, %v1168_v24  ;;  %v1166_v44 = vpop.permute.xlu0 %1165  ;;  %1496 = vrot.lane.b32.xlu2 %v4312_v26, %s3443_s11  ;;  %v4476_v24 = vsel %vm1036_vm0, %v1648_v30, %v1649_v38 }
 0x16b   : > { %1238 = vst.msk [vmem:[#allocation2 + $0xc0] sm:$0xff] %vm1213_vm3, %v1166_v44  ;;  %v4481_v44 = vld [vmem:[%s3830_s8 + $0x2d0] sm:$0xff] }
 0x16c   : > { %v1334_v48 = vpop.permute.xlu2 %1333 }
 0x16d   : > { %1427 = vst.msk [vmem:[#allocation2 + $0x18] sm:$0xff] %vm1423_vm4, %v1334_v48  ;;  %v1640_v48 = vsel %vm1036_vm0, %v1638_v1, %v1639_v16  ;;  %v4539_v1 = vld [vmem:[%s3830_s8 + $0x1c0] sm:$0xf] }
 0x16f   : > { %1500 = vrot.lane.b32.xlu1 %v4319_v13, %s3443_s11 }
 0x170   : > { %1498 = vrot.lane.b32.xlu0 %v4322_v45, %s3443_s11 }
 0x171   : > { %v1174_v29 = vpop.permute.xlu1 %1173 }
 0x172   : > { %1242 = vst.msk [vmem:[#allocation2 + $0xe0] sm:$0xff] %vm1213_vm3, %v1174_v29  ;;  %v1172_v23 = vpop.permute.xlu0 %1171  ;;  %1502 = vrot.lane.b32.xlu2 %v4330_v12, %s3443_s11 }
 0x173   : > { %1241 = vst.msk [vmem:[#allocation2 + $0xd8] sm:$0xff] %vm1213_vm3, %v1172_v23 }
 0x174   : > { %v1340_v27 = vpop.permute.xlu2 %1339 }
 0x175   : > { %1430 = vst.msk [vmem:[#allocation2 + $0x30] sm:$0xff] %vm1423_vm4, %v1340_v27  ;;  %v4491_v27 = vsel %vm1036_vm0, %v1658_v7, %v1659_v6 }
 0x177   : > { %1506 = vrot.lane.b32.xlu1 %v4337_v11, %s3443_s11 }
 0x178   : > { %1504 = vrot.lane.b32.xlu0 %v4340_v34, %s3443_s11 }
 0x179   : > { %v1180_v33 = vpop.permute.xlu1 %1179 }
 0x17a   : > { %1245 = vst.msk [vmem:[#allocation2 + $0xf8] sm:$0xff] %vm1213_vm3, %v1180_v33  ;;  %v1178_v57 = vpop.permute.xlu0 %1177  ;;  %1508 = vrot.lane.b32.xlu2 %v4348_v56, %s3443_s11  ;;  %v4494_v33 = vld [vmem:[%s3830_s8 + $0x2e8] sm:$0xff] }
 0x17b   : > { %1244 = vst.msk [vmem:[#allocation2 + $0xf0] sm:$0xff] %vm1213_vm3, %v1178_v57  ;;  %v4497_v57 = vld [vmem:[%s3830_s8 + $0x2d8] sm:$0xff] }
 0x17c   : > { %v1346_v42 = vpop.permute.xlu2 %1345 }
 0x17d   : > { %1433 = vst.msk [vmem:[#allocation2 + $0x48] sm:$0xff] %vm1423_vm4, %v1346_v42  ;;  %v4500_v42 = vld [vmem:[%s3830_s8 + $0x190] sm:$0xf] }
 0x17f   : > { %1512 = vrot.lane.b32.xlu1 %v4355_v31, %s3443_s11 }
 0x180   : > { %1510 = vrot.lane.b32.xlu0 %v4358_v41, %s3443_s11 }
 0x181   : > { %v1332_v32 = vpop.permute.xlu1 %1331 }
 0x182   : > { %1426 = vst.msk [vmem:[#allocation2 + $0x10] sm:$0xff] %vm1423_vm4, %v1332_v32  ;;  %v1330_v43 = vpop.permute.xlu0 %1329  ;;  %1514 = vrot.lane.b32.xlu2 %v4366_v58, %s3443_s11 }
 0x183   : > { %1425 = vst.msk [vmem:[#allocation2 + $0x8] sm:$0xff] %vm1423_vm4, %v1330_v43  ;;  %v1636_v43 = vrot.slane %v4500_v42, 2 }
 0x184   : > { %v1352_v46 = vpop.permute.xlu2 %1351 }
 0x185   : > { %1436 = vst.msk [vmem:[#allocation2 + $0x60] sm:$0xff] %vm1423_vm4, %v1352_v46  ;;  %v4509_v46 = vld [vmem:[%s3830_s8 + $0x2f0] sm:$0xff]  ;;  %v1637_v14 = vsel %vm1036_vm0, %v1634_v8, %v1636_v43 }
 0x187   : > { %1518 = vrot.lane.b32.xlu1 %v4373_v3, %s3443_s11 }
 0x188   : > { %1516 = vrot.lane.b32.xlu0 %v4376_v39, %s3443_s11 }
 0x189   : > { %v1338_v47 = vpop.permute.xlu1 %1337 }
 0x18a   : > { %1429 = vst.msk [vmem:[#allocation2 + $0x28] sm:$0xff] %vm1423_vm4, %v1338_v47  ;;  %v1336_v40 = vpop.permute.xlu0 %1335  ;;  %1520 = vrot.lane.b32.xlu2 %v4384_v54, %s3443_s11 }
 0x18b   : > { %1428 = vst.msk [vmem:[#allocation2 + $0x20] sm:$0xff] %vm1423_vm4, %v1336_v40 }
 0x18c   : > { %v1358_v61 = vpop.permute.xlu2 %1357 }
 0x18d   : > { %1439 = vst.msk [vmem:[#allocation2 + $0x78] sm:$0xff] %vm1423_vm4, %v1358_v61  ;;  %v1663_v61 = vrot.slane %v4355_v31, 2 }
 0x18f   : > { %1524 = vrot.lane.b32.xlu1 %v4391_v50, %s3443_s11 }
 0x190   : > { %1522 = vrot.lane.b32.xlu0 %v4394_v9, %s3443_s11 }
 0x191   : > { %v1344_v53 = vpop.permute.xlu1 %1343 }
 0x192   : > { %1432 = vst.msk [vmem:[#allocation2 + $0x40] sm:$0xff] %vm1423_vm4, %v1344_v53  ;;  %v1342_v10 = vpop.permute.xlu0 %1341  ;;  %1526 = vrot.lane.b32.xlu2 %v4402_v49, %s3443_s11  ;;  %v1664_v53 = vrot.slane %v4366_v58, 2 }
 0x193   : > { %1431 = vst.msk [vmem:[#allocation2 + $0x38] sm:$0xff] %vm1423_vm4, %v1342_v10  ;;  %v1653_v10 = vrot.slane %v4340_v34, 2 }
 0x194   : > { %v1364_v22 = vpop.permute.xlu2 %1363 }
 0x195   : > { %1442 = vst.msk [vmem:[#allocation2 + $0x90] sm:$0xff] %vm1423_vm4, %v1364_v22  ;;  %v1655_v8 = vsel %vm1036_vm0, %v1653_v10, %v1654_v25 }
 0x197   : > { %1530 = vrot.lane.b32.xlu1 %v4411_v15, %s3443_s11 }
 0x198   : > { %1528 = vrot.lane.b32.xlu0 %v4414_v4, %s3443_s11 }
 0x199   : > { %v1350_v28 = vpop.permute.xlu1 %1349 }
 0x19a   : > { %1435 = vst.msk [vmem:[#allocation2 + $0x58] sm:$0xff] %vm1423_vm4, %v1350_v28  ;;  %v1348_v52 = vpop.permute.xlu0 %1347  ;;  %1532 = vrot.lane.b32.xlu2 %v4429_v20, %s3443_s11  ;;  %v4523_v28 = vld [vmem:[%s3830_s8 + $0x1a8] sm:$0xf] }
 0x19b   : > { %1434 = vst.msk [vmem:[#allocation2 + $0x50] sm:$0xff] %vm1423_vm4, %v1348_v52  ;;  %v1674_v52 = vrot.slane %v4394_v9, 2  ;;  %v1641_v30 = vrot.slane %v4523_v28, 2 }
 0x19c   : > { %v1370_v18 = vpop.permute.xlu2 %1369 }
 0x19d   : > { %1445 = vst.msk [vmem:[#allocation2 + $0xa8] sm:$0xff] %vm1423_vm4, %v1370_v18  ;;  %v1673_v18 = vrot.slane %v4384_v54, 2 }
 0x19f   : > { %1536 = vrot.lane.b32.xlu1 %v4441_v36, %s3443_s11  ;;  %v4547_v7 = vsel %vm1036_vm0, %v1673_v18, %v1674_v52  ;;  %v1689_v18 = vrot.slane %v4444_v51, 2 }
 0x1a0   : > { %1534 = vrot.lane.b32.xlu0 %v4444_v51, %s3443_s11 }
 0x1a1   : > { %v1356_v55 = vpop.permute.xlu1 %1355 }
 0x1a2   : > { %1438 = vst.msk [vmem:[#allocation2 + $0x70] sm:$0xff] %vm1423_vm4, %v1356_v55  ;;  %v1354_v37 = vpop.permute.xlu0 %1353  ;;  %1538 = vrot.lane.b32.xlu2 %v4452_v35, %s3443_s11  ;;  %v4532_v55 = vsel %vm1036_vm0, %v1663_v61, %v1664_v53  ;;  %v1679_v61 = vrot.slane %v4402_v49, 2 }
 0x1a3   : > { %1437 = vst.msk [vmem:[#allocation2 + $0x68] sm:$0xff] %vm1423_vm4, %v1354_v37 }
 0x1a4   : > { %v1376_v63 = vpop.permute.xlu2 %1375 }
 0x1a5   : > { %1448 = vst.msk [vmem:[#allocation2 + $0xc0] sm:$0xff] %vm1423_vm4, %v1376_v63 }
 0x1a7   : > { %1542 = vrot.lane.b32.xlu1 %v4462_v2, %s3443_s11 }
 0x1a8   : > { %1540 = vrot.lane.b32.xlu0 %v4465_v21, %s3443_s11 }
 0x1a9   : > { %v1362_v29 = vpop.permute.xlu1 %1361 }
 0x1aa   : > { %1441 = vst.msk [vmem:[#allocation2 + $0x88] sm:$0xff] %vm1423_vm4, %v1362_v29  ;;  %v1360_v23 = vpop.permute.xlu0 %1359  ;;  %1544 = vrot.lane.b32.xlu2 %v4481_v44, %s3443_s11  ;;  %v1642_v29 = vsel %vm1036_vm0, %v1639_v16, %v1641_v30 }
 0x1ab   : > { %1440 = vst.msk [vmem:[#allocation2 + $0x80] sm:$0xff] %vm1423_vm4, %v1360_v23  ;;  %v4552_v23 = vld [vmem:[%s3830_s8 + $0x1d8] sm:$0xf] }
 0x1ac   : > { %v1382_v32 = vpop.permute.xlu2 %1381 }
 0x1ad   : > { %1451 = vst.msk [vmem:[#allocation2 + $0xd8] sm:$0xff] %vm1423_vm4, %v1382_v32 }
 0x1af   : > { %1548 = vrot.lane.b32.xlu1 %v4494_v33, %s3443_s11 }
 0x1b0   : > { %1546 = vrot.lane.b32.xlu0 %v4497_v57, %s3443_s11 }
 0x1b1   : > { %v1368_v47 = vpop.permute.xlu1 %1367 }
 0x1b2   : > { %1444 = vst.msk [vmem:[#allocation2 + $0xa0] sm:$0xff] %vm1423_vm4, %v1368_v47  ;;  %v1366_v40 = vpop.permute.xlu0 %1365  ;;  %1550 = vrot.lane.b32.xlu2 %v4509_v46, %s3443_s11  ;;  %s3349_s11 = scalar_lea.hbm %s5590_s2, 512 }
 0x1b3   : > { %1443 = vst.msk [vmem:[#allocation2 + $0x98] sm:$0xff] %vm1423_vm4, %v1366_v40  ;;  %v1678_v40 = vrot.slane %v4391_v50, 2 }
 0x1b4   : > { %v1388_v22 = vpop.permute.xlu2 %1387 }
 0x1b5   : > { %1454 = vst.msk [vmem:[#allocation2 + $0xf0] sm:$0xff] %vm1423_vm4, %v1388_v22  ;;  %v4573_v22 = vld [vmem:[%s3830_s8 + $0x1f0] sm:$0xf]  ;;  %v4582_v30 = vsel %vm1036_vm0, %v1678_v40, %v1679_v61 }
 0x1b7   : > { %1715 = vrot.lane.b32.xlu1 %v1637_v14, %s3444_s18  ;;  %v1669_v14 = vrot.slane %v4373_v3, 2 }
 0x1b8   : > { %1713 = vrot.lane.b32.xlu0 %v4424_v5, %s3444_s18  ;;  %v1646_v5 = vrot.slane %v4539_v1, 2 }
 0x1b9   : > { %v1374_v37 = vpop.permute.xlu1 %1373 }
 0x1ba   : > { %1447 = vst.msk [vmem:[#allocation2 + $0xb8] sm:$0xff] %vm1423_vm4, %v1374_v37  ;;  %v1372_v63 = vpop.permute.xlu0 %1371  ;;  %1717 = vrot.lane.b32.xlu2 %v1640_v48, %s3444_s18  ;;  %v1651_v48 = vrot.slane %v4552_v23, 2  ;;  %v1647_v43 = vsel %vm1036_vm0, %v1644_v19, %v1646_v5  ;;  %v1688_v37 = vrot.slane %v4429_v20, 2  ;;  %v1656_v5 = vrot.slane %v4573_v22, 2 }
 0x1bb   : > { %1446 = vst.msk [vmem:[#allocation2 + $0xb0] sm:$0xff] %vm1423_vm4, %v1372_v63 }
 0x1bc   : > { %v1491_v32 = vpop.permute.xlu2 %1490  ;;  %v1652_v10 = vsel %vm1036_vm0, %v1649_v38, %v1651_v48  ;;  %v4597_v48 = vsel %vm1036_vm0, %v1688_v37, %v1689_v18 }
 0x1bd   : > { %1586 = vst.msk [vmem:[#allocation2 + $0x8] sm:$0xff] %vm1584_vm5, %v1491_v32 }
 0x1bf   : > { %1721 = vrot.lane.b32.xlu1 %v4438_v59, %s3444_s18  ;;  %v1668_v59 = vrot.slane %v4376_v39, 2 }
 0x1c0   : > { %1719 = vrot.lane.b32.xlu0 %v1642_v29, %s3444_s18  ;;  %v4589_v29 = vld [vmem:[%s3830_s8 + $0x208] sm:$0xf] }
 0x1c1   : > { %v1380_v47 = vpop.permute.xlu1 %1379  ;;  %v1670_v38 = vsel %vm1036_vm0, %v1668_v59, %v1669_v14 }
 0x1c2   : > { %1450 = vst.msk [vmem:[#allocation2 + $0xd0] sm:$0xff] %vm1423_vm4, %v1380_v47  ;;  %v1378_v16 = vpop.permute.xlu0 %1377  ;;  %1723 = vrot.lane.b32.xlu2 %v1647_v43, %s3444_s18  ;;  %v1657_v43 = vsel %vm1036_vm0, %v1654_v25, %v1656_v5  ;;  %v4602_v47 = vld [vmem:[%s3830_s8 + $0x220] sm:$0xf]  ;;  %v4623_v5 = vld [vmem:[%s3830_s8 + $0x238] sm:$0xf] }
 0x1c3   : > { %1449 = vst.msk [vmem:[#allocation2 + $0xc8] sm:$0xff] %vm1423_vm4, %v1378_v16 }
 0x1c4   : > { %v1497_v19 = vpop.permute.xlu2 %1496 }
 0x1c5   : > { %1589 = vst.msk [vmem:[#allocation2 + $0x20] sm:$0xff] %vm1584_vm5, %v1497_v19  ;;  %v1694_v19 = vrot.slane %v4452_v35, 2 }
 0x1c7   : > { %1727 = vrot.lane.b32.xlu1 %v1652_v10, %s3444_s18  ;;  %v1693_v10 = vrot.slane %v4441_v36, 2 }
 0x1c8   : > { %1725 = vrot.lane.b32.xlu0 %v4476_v24, %s3444_s18  ;;  %v1661_v24 = vrot.slane %v4589_v29, 2 }
 0x1c9   : > { %v1386_v63 = vpop.permute.xlu1 %1385 }
 0x1ca   : > { %1453 = vst.msk [vmem:[#allocation2 + $0xe8] sm:$0xff] %vm1423_vm4, %v1386_v63  ;;  %v1384_v32 = vpop.permute.xlu0 %1383  ;;  %1729 = vrot.lane.b32.xlu2 %v1655_v8, %s3444_s18  ;;  %v1666_v8 = vrot.slane %v4602_v47, 2  ;;  %v1662_v40 = vsel %vm1036_vm0, %v1659_v6, %v1661_v24  ;;  %v1684_v63 = vrot.slane %v4411_v15, 2  ;;  %v1703_v24 = vrot.slane %v4481_v44, 2 }
 0x1cb   : > { %1452 = vst.msk [vmem:[#allocation2 + $0xe0] sm:$0xff] %vm1423_vm4, %v1384_v32  ;;  %v1704_v32 = vrot.slane %v4497_v57, 2 }
 0x1cc   : > { %v1503_v16 = vpop.permute.xlu2 %1502  ;;  %v1667_v37 = vsel %vm1036_vm0, %v1664_v53, %v1666_v8  ;;  %v1671_v8 = vrot.slane %v4623_v5, 2 }
 0x1cd   : > { %1592 = vst.msk [vmem:[#allocation2 + $0x38] sm:$0xff] %vm1584_vm5, %v1503_v16 }
 0x1cf   : > { %1733 = vrot.lane.b32.xlu1 %v4491_v27, %s3444_s18  ;;  %v1683_v27 = vrot.slane %v4414_v4, 2 }
 0x1d0   : > { %1731 = vrot.lane.b32.xlu0 %v1657_v43, %s3444_s18  ;;  %v4632_v43 = vsel %vm1036_vm0, %v1693_v10, %v1694_v19  ;;  %v1672_v10 = vsel %vm1036_vm0, %v1669_v14, %v1671_v8  ;;  %v1709_v8 = vrot.slane %v4509_v46, 2 }
 0x1d1   : > { %v1489_v59 = vpop.permute.xlu1 %1488  ;;  %v1685_v53 = vsel %vm1036_vm0, %v1683_v27, %v1684_v63  ;;  %v4652_v27 = vld [vmem:[%s3830_s8 + $0x268] sm:$0xf] }
 0x1d2   : > { %1585 = vst.msk [vmem:[#allocation2] sm:$0xff] %vm1584_vm5, %v1489_v59  ;;  %v1390_v25 = vpop.permute.xlu0 %1389  ;;  %1735 = vrot.lane.b32.xlu2 %v1662_v40, %s3444_s18  ;;  %v4639_v40 = vld [vmem:[%s3830_s8 + $0x250] sm:$0xf] }
 0x1d3   : > { %1455 = vst.msk [vmem:[#allocation2 + $0xf8] sm:$0xff] %vm1423_vm4, %v1390_v25  ;;  %v4647_v25 = vsel %vm1036_vm0, %v1703_v24, %v1704_v32 }
 0x1d4   : > { %v1509_v6 = vpop.permute.xlu2 %1508 }
 0x1d5   : > { %1595 = vst.msk [vmem:[#allocation2 + $0x50] sm:$0xff] %vm1584_vm5, %v1509_v6 }
 0x1d7   : > { %1739 = vrot.lane.b32.xlu1 %v1667_v37, %s3444_s18 }
 0x1d8   : > { %1737 = vrot.lane.b32.xlu0 %v4532_v55, %s3444_s18  ;;  %v1676_v55 = vrot.slane %v4639_v40, 2 }
 0x1d9   : > { %v1495_v16 = vpop.permute.xlu1 %1494 }
 0x1da   : > { %1588 = vst.msk [vmem:[#allocation2 + $0x18] sm:$0xff] %vm1584_vm5, %v1495_v16  ;;  %v1493_v59 = vpop.permute.xlu0 %1492  ;;  %1741 = vrot.lane.b32.xlu2 %v1670_v38, %s3444_s18  ;;  %v1681_v38 = vrot.slane %v4652_v27, 2  ;;  %v1677_v6 = vsel %vm1036_vm0, %v1674_v52, %v1676_v55  ;;  %v1708_v16 = vrot.slane %v4494_v33, 2  ;;  %v1699_v55 = vrot.slane %v4462_v2, 2 }
 0x1db   : > { %1587 = vst.msk [vmem:[#allocation2 + $0x10] sm:$0xff] %vm1584_vm5, %v1493_v59  ;;  %v1848_v33 = vrot.slane %v4301_v17, 4 }
 0x1dc   : > { %v1515_v37 = vpop.permute.xlu2 %1514  ;;  %v1682_v59 = vsel %vm1036_vm0, %v1679_v61, %v1681_v38 }
 0x1dd   : > { %1598 = vst.msk [vmem:[#allocation2 + $0x68] sm:$0xff] %vm1584_vm5, %v1515_v37  ;;  %v1847_v37 = vrot.slane %v4304_v0, 4 }
 0x1df   : > { %1745 = vrot.lane.b32.xlu1 %v4547_v7, %s3444_s18  ;;  %v1698_v7 = vrot.slane %v4465_v21, 2 }
 0x1e0   : > { %1743 = vrot.lane.b32.xlu0 %v1672_v10, %s3444_s18  ;;  %v4673_v10 = vld [vmem:[%s3830_s8 + $0x280] sm:$0xf] }
 0x1e1   : > { %v1501_v24 = vpop.permute.xlu1 %1500  ;;  %v1700_v61 = vsel %vm1036_vm0, %v1698_v7, %v1699_v55 }
 0x1e2   : > { %1591 = vst.msk [vmem:[#allocation2 + $0x30] sm:$0xff] %vm1584_vm5, %v1501_v24  ;;  %v1499_v14 = vpop.permute.xlu0 %1498  ;;  %1747 = vrot.lane.b32.xlu2 %v1677_v6, %s3444_s18  ;;  %v4682_v6 = vsel %vm1036_vm0, %v1708_v16, %v1709_v8  ;;  %v1686_v24 = vrot.slane %v4673_v10, 2  ;;  %v4697_v16 = vsel %vm1246_vm2, %v1847_v37, %v1848_v33 }
 0x1e3   : > { %1590 = vst.msk [vmem:[#allocation2 + $0x28] sm:$0xff] %vm1584_vm5, %v1499_v14  ;;  %v4689_v14 = vld [vmem:[%s3830_s8 + $0x298] sm:$0xf] }
 0x1e4   : > { %v1521_v52 = vpop.permute.xlu2 %1520  ;;  %v1687_v7 = vsel %vm1036_vm0, %v1684_v63, %v1686_v24  ;;  %v1853_v24 = vrot.slane %v4322_v45, 4 }
 0x1e5   : > { %1601 = vst.msk [vmem:[#allocation2 + $0x80] sm:$0xff] %vm1584_vm5, %v1521_v52 }
 0x1e7   : > { %1751 = vrot.lane.b32.xlu1 %v1682_v59, %s3444_s18  ;;  %v4702_v59 = vld [vmem:[%s3830_s8 + $0x2b0] sm:$0xf] }
 0x1e8   : > { %1749 = vrot.lane.b32.xlu0 %v4582_v30, %s3444_s18  ;;  %v1691_v30 = vrot.slane %v4689_v14, 2 }
 0x1e9   : > { %v1507_v38 = vpop.permute.xlu1 %1506 }
 0x1ea   : > { %1594 = vst.msk [vmem:[#allocation2 + $0x48] sm:$0xff] %vm1584_vm5, %v1507_v38  ;;  %v1505_v0 = vpop.permute.xlu0 %1504  ;;  %1753 = vrot.lane.b32.xlu2 %v1685_v53, %s3444_s18  ;;  %v1696_v53 = vrot.slane %v4702_v59, 2  ;;  %v1692_v37 = vsel %vm1036_vm0, %v1689_v18, %v1691_v30  ;;  %v1843_v30 = vrot.slane %v4294_v62, 4 }
 0x1eb   : > { %1593 = vst.msk [vmem:[#allocation2 + $0x40] sm:$0xff] %vm1584_vm5, %v1505_v0  ;;  %v1852_v0 = vrot.slane %v4312_v26, 4  ;;  %v1863_v26 = vrot.slane %v4337_v11, 4 }
 0x1ec   : > { %v1527_v52 = vpop.permute.xlu2 %1526 }
 0x1ed   : > { %1604 = vst.msk [vmem:[#allocation2 + $0x98] sm:$0xff] %vm1584_vm5, %v1527_v52  ;;  %v4723_v52 = vld [vmem:[%s3830_s8 + $0x2c8] sm:$0xf] }
 0x1ef   : > { %1757 = vrot.lane.b32.xlu1 %v4597_v48, %s3444_s18  ;;  %v1842_v48 = vrot.slane %v4286_v60, 4  ;;  %v4732_v60 = vsel %vm1246_vm2, %v1852_v0, %v1853_v24 }
 0x1f0   : > { %1755 = vrot.lane.b32.xlu0 %v1687_v7, %s3444_s18  ;;  %v1697_v7 = vsel %vm1036_vm0, %v1694_v19, %v1696_v53  ;;  %v1701_v53 = vrot.slane %v4723_v52, 2 }
 0x1f1   : > { %v1513_v38 = vpop.permute.xlu1 %1512  ;;  %v1844_v62 = vsel %vm1246_vm2, %v1842_v48, %v1843_v30  ;;  %v906_v48 = vld [vmem:[%s3830_s8 + $0x2f8] sm:$0xf] }
 0x1f2   : > { %1597 = vst.msk [vmem:[#allocation2 + $0x60] sm:$0xff] %vm1584_vm5, %v1513_v38  ;;  %v1511_v63 = vpop.permute.xlu0 %1510  ;;  %1759 = vrot.lane.b32.xlu2 %v1692_v37, %s3444_s18  ;;  %v1862_v38 = vrot.slane %v4340_v34, 4  ;;  %v4739_v37 = vld [vmem:[%s3830_s8 + $0x2e0] sm:$0xf]  ;;  %v1702_v0 = vsel %vm1036_vm0, %v1699_v55, %v1701_v53  ;;  %v1868_v55 = vrot.slane %v4358_v41, 4  ;;  %v1867_v53 = vrot.slane %v4348_v56, 4 }
 0x1f3   : > { %1596 = vst.msk [vmem:[#allocation2 + $0x58] sm:$0xff] %vm1584_vm5, %v1511_v63 }
 0x1f4   : > { %v1533_v18 = vpop.permute.xlu2 %1532  ;;  %v4747_v63 = vsel %vm1246_vm2, %v1862_v38, %v1863_v26  ;;  %v4776_v56 = vsel %vm1246_vm2, %v1867_v53, %v1868_v55 }
 0x1f5   : > { %1607 = vst.msk [vmem:[#allocation2 + $0xb0] sm:$0xff] %vm1584_vm5, %v1533_v18  ;;  %v1711_v18 = vrot.slane %v906_v48, 2  ;;  %v1877_v48 = vrot.slane %v4376_v39, 4 }
 0x1f7   : > { %1763 = vrot.lane.b32.xlu1 %v1697_v7, %s3444_s18 }
 0x1f8   : > { %1761 = vrot.lane.b32.xlu0 %v4632_v43, %s3444_s18  ;;  %v1706_v43 = vrot.slane %v4739_v37, 2 }
 0x1f9   : > { %v1519_v19 = vpop.permute.xlu1 %1518 }
 0x1fa   : > { %1600 = vst.msk [vmem:[#allocation2 + $0x78] sm:$0xff] %vm1584_vm5, %v1519_v19  ;;  %v1517_v34 = vpop.permute.xlu0 %1516  ;;  %1765 = vrot.lane.b32.xlu2 %v1700_v61, %s3444_s18  ;;  %v1707_v61 = vsel %vm1036_vm0, %v1704_v32, %v1706_v43  ;;  %v1858_v32 = vrot.slane %v4330_v12, 4  ;;  %v1878_v43 = vrot.slane %v4373_v3, 4  ;;  %v1845_v12 = vrot.slane %v4500_v42, 4 }
 0x1fb   : > { %1599 = vst.msk [vmem:[#allocation2 + $0x70] sm:$0xff] %vm1584_vm5, %v1517_v34  ;;  %v1712_v34 = vsel %vm1036_vm0, %v1709_v8, %v1711_v18  ;;  %v1855_v42 = vrot.slane %v4539_v1, 4 }
 0x1fc   : > { %v1539_v7 = vpop.permute.xlu2 %1538  ;;  %v4788_v39 = vsel %vm1246_vm2, %v1877_v48, %v1878_v43 }
 0x1fd   : > { %1610 = vst.msk [vmem:[#allocation2 + $0xc8] sm:$0xff] %vm1584_vm5, %v1539_v7  ;;  %v1846_v7 = vsel %vm1246_vm2, %v1843_v30, %v1845_v12  ;;  %v1883_v30 = vrot.slane %v4394_v9, 4  ;;  %v1856_v17 = vsel %vm1246_vm2, %v1853_v24, %v1855_v42  ;;  %v1907_v12 = vrot.slane %v4465_v21, 4 }
 0x1fe   : > { %v1913_v42 = vrot.slane %v4497_v57, 4 }
 0x1ff   : > { %1769 = vrot.lane.b32.xlu1 %v4647_v25, %s3444_s18  ;;  %v1857_v25 = vrot.slane %v4319_v13, 4 }
 0x200   : > { %1767 = vrot.lane.b32.xlu0 %v1702_v0, %s3444_s18 }
 0x201   : > { %v1525_v38 = vpop.permute.xlu1 %1524  ;;  %v1859_v13 = vsel %vm1246_vm2, %v1857_v25, %v1858_v32  ;;  %v1865_v25 = vrot.slane %v4573_v22, 4 }
 0x202   : > { %1603 = vst.msk [vmem:[#allocation2 + $0x90] sm:$0xff] %vm1584_vm5, %v1525_v38  ;;  %v1523_v19 = vpop.permute.xlu0 %1522  ;;  %1771 = vrot.lane.b32.xlu2 %v1707_v61, %s3444_s18  ;;  %v1882_v38 = vrot.slane %v4384_v54, 4  ;;  %v1892_v54 = vrot.slane %v4414_v4, 4 }
 0x203   : > { %1602 = vst.msk [vmem:[#allocation2 + $0x88] sm:$0xff] %vm1584_vm5, %v1523_v19  ;;  %v1893_v19 = vrot.slane %v4411_v15, 4 }
 0x204   : > { %v1545_v0 = vpop.permute.xlu2 %1544 }
 0x205   : > { %1613 = vst.msk [vmem:[#allocation2 + $0xe0] sm:$0xff] %vm1584_vm5, %v1545_v0  ;;  %v4829_v4 = vsel %vm1246_vm2, %v1892_v54, %v1893_v19  ;;  %v1866_v0 = vsel %vm1246_vm2, %v1863_v26, %v1865_v25  ;;  %v1888_v26 = vrot.slane %v4402_v49, 4  ;;  %v1875_v49 = vrot.slane %v4602_v47, 4 }
 0x206   : > { %v1885_v47 = vrot.slane %v4639_v40, 4 }
 0x207   : > { %1775 = vrot.lane.b32.xlu1 %v1712_v34, %s3444_s18 }
 0x208   : > { %1773 = vrot.lane.b32.xlu0 %v4682_v6, %s3444_s18  ;;  %v1850_v6 = vrot.slane %v4523_v28, 4  ;;  %v1886_v3 = vsel %vm1246_vm2, %v1883_v30, %v1885_v47 }
 0x209   : > { %v1531_v46 = vpop.permute.xlu1 %1530 }
 0x20a   : > { %1606 = vst.msk [vmem:[#allocation2 + $0xa8] sm:$0xff] %vm1584_vm5, %v1531_v46  ;;  %v1529_v8 = vpop.permute.xlu0 %1528  ;;  %1922 = vrot.lane.b32.xlu2 %v1844_v62, %s3445_s19  ;;  %v1851_v62 = vsel %vm1246_vm2, %v1848_v33, %v1850_v6  ;;  %v1873_v33 = vrot.slane %v4366_v58, 4  ;;  %v1860_v58 = vrot.slane %v4552_v23, 4  ;;  %v1870_v23 = vrot.slane %v4589_v29, 4 }
 0x20b   : > { %1605 = vst.msk [vmem:[#allocation2 + $0xa0] sm:$0xff] %vm1584_vm5, %v1529_v8  ;;  %v1908_v46 = vrot.slane %v4462_v2, 4  ;;  %v1880_v8 = vrot.slane %v4623_v5, 4 }
 0x20c   : > { %v1551_v18 = vpop.permute.xlu2 %1550  ;;  %v1871_v11 = vsel %vm1246_vm2, %v1868_v55, %v1870_v23 }
 0x20d   : > { %1616 = vst.msk [vmem:[#allocation2 + $0xf8] sm:$0xff] %vm1584_vm5, %v1551_v18  ;;  %v1909_v21 = vsel %vm1246_vm2, %v1907_v12, %v1908_v46  ;;  %v910_v12 = vld [vmem:[%s3830_s8 + $0x318] sm:$0xff] }
 0x20f   : > { %1926 = vrot.lane.b32.xlu1 %v4697_v16, %s3445_s19  ;;  %v1872_v16 = vrot.slane %v4355_v31, 4  ;;  %v4817_v31 = vsel %vm1246_vm2, %v1882_v38, %v1883_v30 }
 0x210   : > { %1924 = vrot.lane.b32.xlu0 %v1846_v7, %s3445_s19  ;;  %v1881_v7 = vsel %vm1246_vm2, %v1878_v43, %v1880_v8  ;;  %v1903_v43 = vrot.slane %v4452_v35, 4  ;;  %v1895_v35 = vrot.slane %v4673_v10, 4  ;;  %v919_v8 = vld [vmem:[%s3830_s8 + $0x360] sm:$0xff] }
 0x211   : > { %v1537_v61 = vpop.permute.xlu1 %1536  ;;  %v1874_v45 = vsel %vm1246_vm2, %v1872_v16, %v1873_v33  ;;  %v2248_v47 = vrot.slane %v919_v8, 2 }
 0x212   : > { %1609 = vst.msk [vmem:[#allocation2 + $0xc0] sm:$0xff] %vm1584_vm5, %v1537_v61  ;;  %v1535_v28 = vpop.permute.xlu0 %1534  ;;  %1928 = vrot.lane.b32.xlu2 %v1851_v62, %s3445_s19  ;;  %v1912_v62 = vrot.slane %v4481_v44, 4  ;;  %v1896_v38 = vsel %vm1246_vm2, %v1893_v19, %v1895_v35 }
 0x213   : > { %1608 = vst.msk [vmem:[#allocation2 + $0xb8] sm:$0xff] %vm1584_vm5, %v1535_v28 }
 0x214   : > { %v1718_v1 = vpop.permute.xlu2 %1717  ;;  %v1914_v57 = vsel %vm1246_vm2, %v1912_v62, %v1913_v42 }
 0x215   : > { %1812 = vst.msk [vmem:[#allocation2 + $0x10] sm:$0xff] %vm1809_vm6, %v1718_v1 }
 0x217   : > { %1932 = vrot.lane.b32.xlu1 %v1856_v17, %s3445_s19 }
 0x218   : > { %1930 = vrot.lane.b32.xlu0 %v4732_v60, %s3445_s19  ;;  %v1861_v60 = vsel %vm1246_vm2, %v1858_v32, %v1860_v58  ;;  %v1898_v32 = vrot.slane %v4444_v51, 4  ;;  %v1910_v51 = vrot.slane %v4723_v52, 4  ;;  %v907_v58 = vld [vmem:[%s3830_s8 + $0x300] sm:$0xff] }
 0x219   : > { %v1543_v24 = vpop.permute.xlu1 %1542  ;;  %v2437_v2 = vrot.slane %v907_v58, 4 }
 0x21a   : > { %1612 = vst.msk [vmem:[#allocation2 + $0xd8] sm:$0xff] %vm1584_vm5, %v1543_v24  ;;  %v1541_v53 = vpop.permute.xlu0 %1540  ;;  %1934 = vrot.lane.b32.xlu2 %v1859_v13, %s3445_s19  ;;  %v1897_v13 = vrot.slane %v4429_v20, 4 }
 0x21b   : > { %1611 = vst.msk [vmem:[#allocation2 + $0xd0] sm:$0xff] %vm1584_vm5, %v1541_v53  ;;  %v908_v53 = vld [vmem:[%s3830_s8 + $0x308] sm:$0xff] }
 0x21c   : > { %v1724_v34 = vpop.permute.xlu2 %1723  ;;  %v1899_v20 = vsel %vm1246_vm2, %v1897_v13, %v1898_v32 }
 0x21d   : > { %1815 = vst.msk [vmem:[#allocation2 + $0x28] sm:$0xff] %vm1809_vm6, %v1724_v34  ;;  %v2229_v34 = vrot.slane %v908_v53, 2 }
 0x21f   : > { %1938 = vrot.lane.b32.xlu1 %v4747_v63, %s3445_s19  ;;  %v1887_v63 = vrot.slane %v4391_v50, 4 }
 0x220   : > { %1936 = vrot.lane.b32.xlu0 %v1861_v60, %s3445_s19  ;;  %v2228_v60 = vrot.slane %v907_v58, 2 }
 0x221   : > { %v1549_v48 = vpop.permute.xlu1 %1548  ;;  %v1889_v41 = vsel %vm1246_vm2, %v1887_v63, %v1888_v26 }
 0x222   : > { %1615 = vst.msk [vmem:[#allocation2 + $0xf0] sm:$0xff] %vm1584_vm5, %v1549_v48  ;;  %v1547_v22 = vpop.permute.xlu0 %1546  ;;  %1940 = vrot.lane.b32.xlu2 %v1866_v0, %s3445_s19  ;;  %v2230_v48 = vsel %vm1036_vm0, %v2228_v60, %v2229_v34 }
 0x223   : > { %1614 = vst.msk [vmem:[#allocation2 + $0xe8] sm:$0xff] %vm1584_vm5, %v1547_v22  ;;  %v909_v22 = vld [vmem:[%s3830_s8 + $0x310] sm:$0xf] }
 0x224   : > { %v1730_v29 = vpop.permute.xlu2 %1729  ;;  %v2440_v13 = vrot.slane %v909_v22, 4 }
 0x225   : > { %1818 = vst.msk [vmem:[#allocation2 + $0x40] sm:$0xff] %vm1809_vm6, %v1730_v29 }
 0x227   : > { %1944 = vrot.lane.b32.xlu1 %v1871_v11, %s3445_s19  ;;  %v2231_v11 = vrot.slane %v909_v22, 2 }
 0x228   : > { %1942 = vrot.lane.b32.xlu0 %v4776_v56, %s3445_s19  ;;  %v1876_v56 = vsel %vm1246_vm2, %v1873_v33, %v1875_v49 }
 0x229   : > { %v1716_v50 = vpop.permute.xlu1 %1715 }
 0x22a   : > { %1811 = vst.msk [vmem:[#allocation2 + $0x8] sm:$0xff] %vm1809_vm6, %v1716_v50  ;;  %v1714_v55 = vpop.permute.xlu0 %1713  ;;  %1946 = vrot.lane.b32.xlu2 %v1874_v45, %s3445_s19  ;;  %v2233_v50 = vrot.slane %v910_v12, 2 }
 0x22b   : > { %1810 = vst.msk [vmem:[#allocation2] sm:$0xff] %vm1809_vm6, %v1714_v55 }
 0x22c   : > { %v1736_v6 = vpop.permute.xlu2 %1735 }
 0x22d   : > { %1821 = vst.msk [vmem:[#allocation2 + $0x58] sm:$0xff] %vm1809_vm6, %v1736_v6 }
 0x22f   : > { %1950 = vrot.lane.b32.xlu1 %v4788_v39, %s3445_s19  ;;  %v1902_v39 = vrot.slane %v4441_v36, 4  ;;  %v1890_v36 = vrot.slane %v4652_v27, 4  ;;  %v1900_v27 = vrot.slane %v4689_v14, 4  ;;  %v1905_v14 = vrot.slane %v4702_v59, 4 }
 0x230   : > { %1948 = vrot.lane.b32.xlu0 %v1876_v56, %s3445_s19  ;;  %v1915_v59 = vrot.slane %v4739_v37, 4  ;;  %v2438_v37 = vrot.slane %v908_v53, 4  ;;  %v920_v56 = vld [vmem:[%s3830_s8 + $0x368] sm:$0xff] }
 0x231   : > { %v1722_v18 = vpop.permute.xlu1 %1721  ;;  %v1904_v44 = vsel %vm1246_vm2, %v1902_v39, %v1903_v43  ;;  %v1891_v28 = vsel %vm1246_vm2, %v1888_v26, %v1890_v36  ;;  %v1901_v17 = vsel %vm1246_vm2, %v1898_v32, %v1900_v27  ;;  %v1906_v19 = vsel %vm1246_vm2, %v1903_v43, %v1905_v14 }
 0x232   : > { %1814 = vst.msk [vmem:[#allocation2 + $0x20] sm:$0xff] %vm1809_vm6, %v1722_v18  ;;  %v1720_v5 = vpop.permute.xlu0 %1719  ;;  %1952 = vrot.lane.b32.xlu2 %v1881_v7, %s3445_s19  ;;  %v1916_v52 = vsel %vm1246_vm2, %v1913_v42, %v1915_v59  ;;  %v2439_v0 = vsel %vm1246_vm2, %v2437_v2, %v2438_v37  ;;  %v2441_v26 = vsel %vm1246_vm2, %v2438_v37, %v2440_v13  ;;  %v2249_v7 = vrot.slane %v920_v56, 2  ;;  %v913_v37 = vld [vmem:[%s3830_s8 + $0x330] sm:$0xff] }
 0x233   : > { %1813 = vst.msk [vmem:[#allocation2 + $0x18] sm:$0xff] %vm1809_vm6, %v1720_v5  ;;  %v2457_v5 = vrot.slane %v919_v8, 4  ;;  %v2458_v42 = vrot.slane %v920_v56, 4 }
 0x234   : > { %v1742_v40 = vpop.permute.xlu2 %1741  ;;  %v2250_v62 = vsel %vm1036_vm0, %v2248_v47, %v2249_v7 }
 0x235   : > { %1824 = vst.msk [vmem:[#allocation2 + $0x70] sm:$0xff] %vm1809_vm6, %v1742_v40 }
 0x237   : > { %1956 = vrot.lane.b32.xlu1 %v1886_v3, %s3445_s19  ;;  %v2442_v3 = vrot.slane %v910_v12, 4 }
 0x238   : > { %1954 = vrot.lane.b32.xlu0 %v4817_v31, %s3445_s19  ;;  %v1911_v31 = vsel %vm1246_vm2, %v1908_v46, %v1910_v51  ;;  %v2232_v46 = vsel %vm1036_vm0, %v2229_v34, %v2231_v11  ;;  %v931_v51 = vld [vmem:[%s3830_s8 + $0x3c0] sm:$0xff]  ;;  %v2238_v34 = vrot.slane %v913_v37, 2 }
 0x239   : > { %v1728_v61 = vpop.permute.xlu1 %1727  ;;  %v2477_v59 = vrot.slane %v931_v51, 4 }
 0x23a   : > { %1817 = vst.msk [vmem:[#allocation2 + $0x38] sm:$0xff] %vm1809_vm6, %v1728_v61  ;;  %v1726_v9 = vpop.permute.xlu0 %1725  ;;  %1958 = vrot.lane.b32.xlu2 %v1889_v41, %s3445_s19  ;;  %v912_v61 = vld [vmem:[%s3830_s8 + $0x328] sm:$0xf] }
 0x23b   : > { %1816 = vst.msk [vmem:[#allocation2 + $0x30] sm:$0xff] %vm1809_vm6, %v1726_v9  ;;  %v2236_v9 = vrot.slane %v912_v61, 2 }
 0x23c   : > { %v1748_v30 = vpop.permute.xlu2 %1747 }
 0x23d   : > { %1827 = vst.msk [vmem:[#allocation2 + $0x88] sm:$0xff] %vm1809_vm6, %v1748_v30 }
 0x23f   : > { %1962 = vrot.lane.b32.xlu1 %v4829_v4, %s3445_s19 }
 0x240   : > { %1960 = vrot.lane.b32.xlu0 %v1891_v28, %s3445_s19  ;;  %v921_v28 = vld [vmem:[%s3830_s8 + $0x370] sm:$0xf] }
 0x241   : > { %v1734_v16 = vpop.permute.xlu1 %1733 }
 0x242   : > { %1820 = vst.msk [vmem:[#allocation2 + $0x50] sm:$0xff] %vm1809_vm6, %v1734_v16  ;;  %v1732_v10 = vpop.permute.xlu0 %1731  ;;  %1964 = vrot.lane.b32.xlu2 %v1896_v38, %s3445_s19  ;;  %v2251_v38 = vrot.slane %v921_v28, 2 }
 0x243   : > { %1819 = vst.msk [vmem:[#allocation2 + $0x48] sm:$0xff] %vm1809_vm6, %v1732_v10  ;;  %v2445_v10 = vrot.slane %v912_v61, 4 }
 0x244   : > { %v1754_v1 = vpop.permute.xlu2 %1753 }
 0x245   : > { %1830 = vst.msk [vmem:[#allocation2 + $0xa0] sm:$0xff] %vm1809_vm6, %v1754_v1 }
 0x247   : > { %1968 = vrot.lane.b32.xlu1 %v1901_v17, %s3445_s19  ;;  %v2252_v17 = vsel %vm1036_vm0, %v2249_v7, %v2251_v38 }
 0x248   : > { %1966 = vrot.lane.b32.xlu0 %v1899_v20, %s3445_s19  ;;  %v911_v20 = vld [vmem:[%s3830_s8 + $0x320] sm:$0xff] }
 0x249   : > { %v1740_v15 = vpop.permute.xlu1 %1739  ;;  %v2234_v49 = vrot.slane %v911_v20, 2  ;;  %v2443_v40 = vrot.slane %v911_v20, 4 }
 0x24a   : > { %1823 = vst.msk [vmem:[#allocation2 + $0x68] sm:$0xff] %vm1809_vm6, %v1740_v15  ;;  %v1738_v33 = vpop.permute.xlu0 %1737  ;;  %1970 = vrot.lane.b32.xlu2 %v1904_v44, %s3445_s19 }
 0x24b   : > { %1822 = vst.msk [vmem:[#allocation2 + $0x60] sm:$0xff] %vm1809_vm6, %v1738_v33  ;;  %v2235_v6 = vsel %vm1036_vm0, %v2233_v50, %v2234_v49  ;;  %v2444_v44 = vsel %vm1246_vm2, %v2442_v3, %v2443_v40  ;;  %v2237_v27 = vsel %vm1036_vm0, %v2234_v49, %v2236_v9  ;;  %v2446_v14 = vsel %vm1246_vm2, %v2443_v40, %v2445_v10  ;;  %v2680_v10 = vld [vmem:[%s5589_s1 + $0x10] sm:$0xff] }
 0x24c   : > { %v1760_v54 = vpop.permute.xlu2 %1759  ;;  %v2460_v33 = vrot.slane %v921_v28, 4 }
 0x24d   : > { %1833 = vst.msk [vmem:[#allocation2 + $0xb8] sm:$0xff] %vm1809_vm6, %v1760_v54 }
 0x24f   : > { %1974 = vrot.lane.b32.xlu1 %v1909_v21, %s3445_s19 }
 0x250   : > { %1972 = vrot.lane.b32.xlu0 %v1906_v19, %s3445_s19  ;;  %v4992_v19 = vld [vmem:[%s3830_s8 + $0x3c8] sm:$0xff] }
 0x251   : > { %v1746_v45 = vpop.permute.xlu1 %1745 }
 0x252   : > { %1826 = vst.msk [vmem:[#allocation2 + $0x80] sm:$0xff] %vm1809_vm6, %v1746_v45  ;;  %v1744_v24 = vpop.permute.xlu0 %1743  ;;  %1976 = vrot.lane.b32.xlu2 %v1911_v31, %s3445_s19  ;;  %v2478_v31 = vrot.slane %v4992_v19, 4  ;;  %v2461_v45 = vsel %vm1246_vm2, %v2458_v42, %v2460_v33 }
 0x253   : > { %1825 = vst.msk [vmem:[#allocation2 + $0x78] sm:$0xff] %vm1809_vm6, %v1744_v24  ;;  %v2268_v24 = vrot.slane %v931_v51, 2 }
 0x254   : > { %v1766_v4 = vpop.permute.xlu2 %1765 }
 0x255   : > { %1836 = vst.msk [vmem:[#allocation2 + $0xd0] sm:$0xff] %vm1809_vm6, %v1766_v4  ;;  %v2479_v4 = vsel %vm1246_vm2, %v2477_v59, %v2478_v31 }
 0x257   : > { %1980 = vrot.lane.b32.xlu1 %v1916_v52, %s3445_s19 }
 0x258   : > { %1978 = vrot.lane.b32.xlu0 %v1914_v57, %s3445_s19  ;;  %v2459_v57 = vsel %vm1246_vm2, %v2457_v5, %v2458_v42 }
 0x259   : > { %v1752_v25 = vpop.permute.xlu1 %1751 }
 0x25a   : > { %1829 = vst.msk [vmem:[#allocation2 + $0x98] sm:$0xff] %vm1809_vm6, %v1752_v25  ;;  %v1750_v23 = vpop.permute.xlu0 %1749  ;;  %2083 = vrot.lane.b32.xlu2 %v907_v58, %s3446_s21  ;;  %v2269_v58 = vrot.slane %v4992_v19, 2  ;;  %v5007_v25 = vld [vmem:[%s3830_s8 + $0x338] sm:$0xff] }
 0x25b   : > { %1828 = vst.msk [vmem:[#allocation2 + $0x90] sm:$0xff] %vm1809_vm6, %v1750_v23  ;;  %v2239_v23 = vrot.slane %v5007_v25, 2 }
 0x25c   : > { %v1772_v32 = vpop.permute.xlu2 %1771  ;;  %v2270_v2 = vsel %vm1036_vm0, %v2268_v24, %v2269_v58  ;;  %v5099_v24 = vld [vmem:[%s3830_s8 + $0x428] sm:$0xff] }
 0x25d   : > { %1839 = vst.msk [vmem:[#allocation2 + $0xe8] sm:$0xff] %vm1809_vm6, %v1772_v32  ;;  %v922_v32 = vld [vmem:[%s3830_s8 + $0x378] sm:$0xff]  ;;  %v2240_v13 = vsel %vm1036_vm0, %v2238_v34, %v2239_v23 }
 0x25e   : > { %v2462_v50 = vrot.slane %v922_v32, 4 }
 0x25f   : > { %2517 = vrot.lane.b32.xlu1 %v2439_v0, %s3447_s23 }
 0x260   : > { %2308 = vrot.lane.b32.xlu0 %v2230_v48, %s3448_s26  ;;  %v5014_v48 = vld [vmem:[%s3830_s8 + $0x380] sm:$0xff] }
 0x261   : > { %v1758_v63 = vpop.permute.xlu1 %1757  ;;  %v2254_v11 = vrot.slane %v5014_v48, 2 }
 0x262   : > { %1832 = vst.msk [vmem:[#allocation2 + $0xb0] sm:$0xff] %vm1809_vm6, %v1758_v63  ;;  %v1756_v29 = vpop.permute.xlu0 %1755  ;;  %2085 = vrot.lane.b32.xlu2 %v908_v53, %s3446_s21  ;;  %v2253_v63 = vrot.slane %v922_v32, 2 }
 0x263   : > { %1831 = vst.msk [vmem:[#allocation2 + $0xa8] sm:$0xff] %vm1809_vm6, %v1756_v29 }
 0x264   : > { %v1923_v41 = vpop.permute.xlu2 %1922 }
 0x265   : > { %2019 = vst.msk [vmem:[#allocation2] sm:$0xff] %vm2018_vm7, %v1923_v41 }
 0x267   : > { %2519 = vrot.lane.b32.xlu1 %v2441_v26, %s3447_s23  ;;  %v2447_v26 = vrot.slane %v913_v37, 4 }
 0x268   : > { %2310 = vrot.lane.b32.xlu0 %v2232_v46, %s3448_s26  ;;  %v2448_v46 = vrot.slane %v5007_v25, 4 }
 0x269   : > { %v1764_v55 = vpop.permute.xlu1 %1763 }
 0x26a   : > { %1835 = vst.msk [vmem:[#allocation2 + $0xc8] sm:$0xff] %vm1809_vm6, %v1764_v55  ;;  %v1762_v21 = vpop.permute.xlu0 %1761  ;;  %2087 = vrot.lane.b32.xlu2 %v910_v12, %s3446_s21  ;;  %v2255_v12 = vsel %vm1036_vm0, %v2253_v63, %v2254_v11  ;;  %v2449_v49 = vsel %vm1246_vm2, %v2447_v26, %v2448_v46  ;;  %v2463_v55 = vrot.slane %v5014_v48, 4  ;;  %v5128_v63 = vld [vmem:[%s3830_s8 + $0x350] sm:$0xff] }
 0x26b   : > { %1834 = vst.msk [vmem:[#allocation2 + $0xc0] sm:$0xff] %vm1809_vm6, %v1762_v21  ;;  %v933_v21 = vld [vmem:[%s3830_s8 + $0x3d0] sm:$0xf]  ;;  %v2244_v26 = vrot.slane %v5128_v63, 2 }
 0x26c   : > { %v1929_v18 = vpop.permute.xlu2 %1928  ;;  %v2271_v7 = vrot.slane %v933_v21, 2 }
 0x26d   : > { %2022 = vst.msk [vmem:[#allocation2 + $0x18] sm:$0xff] %vm2018_vm7, %v1929_v18 }
 0x26e   : > { %v2272_v42 = vsel %vm1036_vm0, %v2269_v58, %v2271_v7  ;;  %v2453_v7 = vrot.slane %v5128_v63, 4 }
 0x26f   : > { %2312 = vrot.lane.b32.xlu1 %v2235_v6, %s3448_s26  ;;  %v2464_v6 = vsel %vm1246_vm2, %v2462_v50, %v2463_v55 }
 0x270   : > { %2099 = vrot.lane.b32.xlu0 %v919_v8, %s3446_s21 }
 0x271   : > { %v1770_v39 = vpop.permute.xlu1 %1769 }
 0x272   : > { %1838 = vst.msk [vmem:[#allocation2 + $0xe0] sm:$0xff] %vm1809_vm6, %v1770_v39  ;;  %v1768_v43 = vpop.permute.xlu0 %1767  ;;  %2324 = vrot.lane.b32.xlu2 %v2250_v62, %s3448_s26  ;;  %v915_v62 = vld [vmem:[%s3830_s8 + $0x340] sm:$0xf] }
 0x273   : > { %1837 = vst.msk [vmem:[#allocation2 + $0xd8] sm:$0xff] %vm1809_vm6, %v1768_v43  ;;  %v2241_v3 = vrot.slane %v915_v62, 2  ;;  %v924_v43 = vld [vmem:[%s3830_s8 + $0x388] sm:$0xf]  ;;  %v2450_v38 = vrot.slane %v915_v62, 4 }
 0x274   : > { %v1935_v36 = vpop.permute.xlu2 %1934  ;;  %v2256_v61 = vrot.slane %v924_v43, 2  ;;  %v2465_v59 = vrot.slane %v924_v43, 4 }
 0x275   : > { %2025 = vst.msk [vmem:[#allocation2 + $0x30] sm:$0xff] %vm2018_vm7, %v1935_v36 }
 0x276   : > { %v2257_v9 = vsel %vm1036_vm0, %v2254_v11, %v2256_v61 }
 0x277   : > { %2533 = vrot.lane.b32.xlu1 %v2459_v57, %s3447_s23 }
 0x278   : > { %2521 = vrot.lane.b32.xlu0 %v2444_v44, %s3447_s23  ;;  %v2242_v44 = vsel %vm1036_vm0, %v2239_v23, %v2241_v3 }
 0x279   : > { %v1776_v35 = vpop.permute.xlu1 %1775 }
 0x27a   : > { %1841 = vst.msk [vmem:[#allocation2 + $0xf8] sm:$0xff] %vm1809_vm6, %v1776_v35  ;;  %v1774_v30 = vpop.permute.xlu0 %1773  ;;  %2089 = vrot.lane.b32.xlu2 %v911_v20, %s3446_s21 }
 0x27b   : > { %1840 = vst.msk [vmem:[#allocation2 + $0xf0] sm:$0xff] %vm1809_vm6, %v1774_v30  ;;  %v2682_v30 = vld [vmem:[%s5589_s1 + $0x20] sm:$0xf] }
 0x27c   : > { %v1941_v16 = vpop.permute.xlu2 %1940  ;;  %3198 = vmatpush.msk.msra.mxu0 %vm1246_vm2, %v2682_v30  ;;  %3239 = vmatpush.msk.msra.mxu1 %vm1246_vm2, %v2682_v30 }
 0x27d   : > { %2028 = vst.msk [vmem:[#allocation2 + $0x48] sm:$0xff] %vm2018_vm7, %v1941_v16  ;;  %v2681_v16 = vld [vmem:[%s5589_s1 + $0x18] sm:$0xff]  ;;  %3240 = vmatpush.msk.msra.mxu2 %vm1246_vm2, %v2682_v30  ;;  %3241 = vmatpush.msk.msra.mxu3 %vm1246_vm2, %v2682_v30 }
 0x27e   : > { %2795 = vmatpush.msra.mxu0 %v2681_v16  ;;  %3242 = vmatpush.msra.mxu1 %v2681_v16 }
 0x27f   : > { %2314 = vrot.lane.b32.xlu1 %v2237_v27, %s3448_s26  ;;  %v943_v27 = vld [vmem:[%s3830_s8 + $0x420] sm:$0xff]  ;;  %3243 = vmatpush.msra.mxu2 %v2681_v16 }
 0x280   : > { %2101 = vrot.lane.b32.xlu0 %v920_v56, %s3446_s21  ;;  %v2480_v56 = vrot.slane %v933_v21, 4  ;;  %2796 = vmatpush.msra.mxu0 %v2680_v10 }
 0x281   : > { %v1927_v1 = vpop.permute.xlu1 %1926  ;;  %3245 = vmatpush.msra.mxu1 %v2680_v10  ;;  %3246 = vmatpush.msra.mxu2 %v2680_v10 }
 0x282   : > { %2021 = vst.msk [vmem:[#allocation2 + $0x10] sm:$0xff] %vm2018_vm7, %v1927_v1  ;;  %v1925_v15 = vpop.permute.xlu0 %1924  ;;  %2326 = vrot.lane.b32.xlu2 %v2252_v17, %s3448_s26  ;;  %v2481_v5 = vsel %vm1246_vm2, %v2478_v31, %v2480_v56  ;;  %v934_v17 = vld [vmem:[%s3830_s8 + $0x3d8] sm:$0xff]  ;;  %v5080_v1 = vld [vmem:[%s3830_s8 + $0x3e0] sm:$0xff]  ;;  %3244 = vmatpush.msra.mxu3 %v2681_v16 }
 0x283   : > { %2020 = vst.msk [vmem:[#allocation2 + $0x8] sm:$0xff] %vm2018_vm7, %v1925_v15  ;;  %v2274_v33 = vrot.slane %v5080_v1, 2  ;;  %v2482_v34 = vrot.slane %v934_v17, 4 }
 0x284   : > { %v1947_v54 = vpop.permute.xlu2 %1946  ;;  %3247 = vmatpush.msra.mxu3 %v2680_v10 }
 0x285   : > { %2031 = vst.msk [vmem:[#allocation2 + $0x60] sm:$0xff] %vm2018_vm7, %v1947_v54 }
 0x287   : > { %2523 = vrot.lane.b32.xlu1 %v2446_v14, %s3447_s23  ;;  %v2273_v14 = vrot.slane %v934_v17, 2 }
 0x288   : > { %2115 = vrot.lane.b32.xlu0 %v931_v51, %s3446_s21  ;;  %v2451_v51 = vsel %vm1246_vm2, %v2448_v46, %v2450_v38 }
 0x289   : > { %v1933_v52 = vpop.permute.xlu1 %1932  ;;  %v2275_v58 = vsel %vm1036_vm0, %v2273_v14, %v2274_v33  ;;  %v918_v14 = vld [vmem:[%s3830_s8 + $0x358] sm:$0xf] }
 0x28a   : > { %2024 = vst.msk [vmem:[#allocation2 + $0x28] sm:$0xff] %vm2018_vm7, %v1933_v52  ;;  %v1931_v53 = vpop.permute.xlu0 %1930  ;;  %2535 = vrot.lane.b32.xlu2 %v2461_v45, %s3447_s23  ;;  %v2678_v45 = vld [vmem:[%s5589_s1] sm:$0xff]  ;;  %v2288_v52 = vrot.slane %v943_v27, 2 }
 0x28b   : > { %2023 = vst.msk [vmem:[#allocation2 + $0x20] sm:$0xff] %vm2018_vm7, %v1931_v53  ;;  %v2289_v53 = vrot.slane %v5099_v24, 2 }
 0x28c   : > { %v1953_v60 = vpop.permute.xlu2 %1952 }
 0x28d   : > { %2034 = vst.msk [vmem:[#allocation2 + $0x78] sm:$0xff] %vm2018_vm7, %v1953_v60  ;;  %v2290_v60 = vsel %vm1036_vm0, %v2288_v52, %v2289_v53 }
 0x28f   : > { %2549 = vrot.lane.b32.xlu1 %v2479_v4, %s3447_s23  ;;  %v2466_v4 = vsel %vm1246_vm2, %v2463_v55, %v2465_v59 }
 0x290   : > { %2340 = vrot.lane.b32.xlu0 %v2270_v2, %s3448_s26 }
 0x291   : > { %v1939_v0 = vpop.permute.xlu1 %1938 }
 0x292   : > { %2027 = vst.msk [vmem:[#allocation2 + $0x40] sm:$0xff] %vm2018_vm7, %v1939_v0  ;;  %v1937_v22 = vpop.permute.xlu0 %1936  ;;  %2091 = vrot.lane.b32.xlu2 %v913_v37, %s3446_s21  ;;  %v2497_v37 = vrot.slane %v943_v27, 4  ;;  %v2483_v0 = vrot.slane %v5080_v1, 4 }
 0x293   : > { %2026 = vst.msk [vmem:[#allocation2 + $0x38] sm:$0xff] %vm2018_vm7, %v1937_v22 }
 0x294   : > { %v1959_v29 = vpop.permute.xlu2 %1958 }
 0x295   : > { %2037 = vst.msk [vmem:[#allocation2 + $0x90] sm:$0xff] %vm2018_vm7, %v1959_v29 }
 0x297   : > { %2316 = vrot.lane.b32.xlu1 %v2240_v13, %s3448_s26  ;;  %v916_v13 = vld [vmem:[%s3830_s8 + $0x348] sm:$0xff] }
 0x298   : > { %2103 = vrot.lane.b32.xlu0 %v922_v32, %s3446_s21  ;;  %v2484_v32 = vsel %vm1246_vm2, %v2482_v34, %v2483_v0  ;;  %v2243_v29 = vrot.slane %v916_v13, 2  ;;  %v5219_v34 = vld [vmem:[%s3830_s8 + $0x3f8] sm:$0xff] }
 0x299   : > { %v1945_v20 = vpop.permute.xlu1 %1944 }
 0x29a   : > { %2030 = vst.msk [vmem:[#allocation2 + $0x58] sm:$0xff] %vm2018_vm7, %v1945_v20  ;;  %v1943_v41 = vpop.permute.xlu0 %1942  ;;  %2328 = vrot.lane.b32.xlu2 %v2255_v12, %s3448_s26  ;;  %v5135_v12 = vld [vmem:[%s3830_s8 + $0x398] sm:$0xff]  ;;  %v2245_v50 = vsel %vm1036_vm0, %v2243_v29, %v2244_v26 }
 0x29b   : > { %2029 = vst.msk [vmem:[#allocation2 + $0x50] sm:$0xff] %vm2018_vm7, %v1943_v41  ;;  %v925_v41 = vld [vmem:[%s3830_s8 + $0x390] sm:$0xff]  ;;  %v2259_v55 = vrot.slane %v5135_v12, 2 }
 0x29c   : > { %v1965_v8 = vpop.permute.xlu2 %1964 }
 0x29d   : > { %2040 = vst.msk [vmem:[#allocation2 + $0xa8] sm:$0xff] %vm2018_vm7, %v1965_v8 }
 0x29f   : > { %2525 = vrot.lane.b32.xlu1 %v2449_v49, %s3447_s23  ;;  %v2258_v49 = vrot.slane %v925_v41, 2 }
 0x2a0   : > { %2117 = vrot.lane.b32.xlu0 %v4992_v19, %s3446_s21  ;;  %v2679_v19 = vld [vmem:[%s5589_s1 + $0x8] sm:$0xff] }
 0x2a1   : > { %v1951_v47 = vpop.permute.xlu1 %1950  ;;  %2797 = vmatpush.msra.mxu0 %v2679_v19  ;;  %3248 = vmatpush.msra.mxu1 %v2679_v19  ;;  %v2260_v8 = vsel %vm1036_vm0, %v2258_v49, %v2259_v55 }
 0x2a2   : > { %2033 = vst.msk [vmem:[#allocation2 + $0x70] sm:$0xff] %vm2018_vm7, %v1951_v47  ;;  %v1949_v18 = vpop.permute.xlu0 %1948  ;;  %2537 = vrot.lane.b32.xlu2 %v2464_v6, %s3447_s23  ;;  %3249 = vmatpush.msra.mxu2 %v2679_v19  ;;  %v2452_v47 = vrot.slane %v916_v13, 4 }
 0x2a3   : > { %2032 = vst.msk [vmem:[#allocation2 + $0x68] sm:$0xff] %vm2018_vm7, %v1949_v18  ;;  %2798 = vmatpush.msra.mxu0 %v2678_v45  ;;  %3251 = vmatpush.msra.mxu1 %v2678_v45  ;;  %v936_v18 = vld [vmem:[%s3830_s8 + $0x3e8] sm:$0xf] }
 0x2a4   : > { %v1971_v39 = vpop.permute.xlu2 %1970  ;;  %3252 = vmatpush.msra.mxu2 %v2678_v45  ;;  %3250 = vmatpush.msra.mxu3 %v2679_v19  ;;  %v2454_v62 = vsel %vm1246_vm2, %v2452_v47, %v2453_v7  ;;  %v2485_v38 = vrot.slane %v936_v18, 4 }
 0x2a5   : > { %2043 = vst.msk [vmem:[#allocation2 + $0xc0] sm:$0xff] %vm2018_vm7, %v1971_v39  ;;  %v2467_v39 = vrot.slane %v925_v41, 4 }
 0x2a6   : > { %3253 = vmatpush.msra.mxu3 %v2678_v45 }
 0x2a7   : > { %2551 = vrot.lane.b32.xlu1 %v2481_v5, %s3447_s23 }
 0x2a8   : > { %2342 = vrot.lane.b32.xlu0 %v2272_v42, %s3448_s26  ;;  %v2276_v42 = vrot.slane %v936_v18, 2 }
 0x2a9   : > { %v1957_v40 = vpop.permute.xlu1 %1956 }
 0x2aa   : > { %2036 = vst.msk [vmem:[#allocation2 + $0x88] sm:$0xff] %vm2018_vm7, %v1957_v40  ;;  %v1955_v57 = vpop.permute.xlu0 %1954  ;;  %2093 = vrot.lane.b32.xlu2 %v5007_v25, %s3446_s21  ;;  %v2498_v25 = vrot.slane %v5099_v24, 4  ;;  %v2468_v40 = vrot.slane %v5135_v12, 4  ;;  %v2277_v61 = vsel %vm1036_vm0, %v2274_v33, %v2276_v42  ;;  %v5256_v42 = vld [vmem:[%s3830_s8 + $0x3b0] sm:$0xff] }
 0x2ab   : > { %2035 = vst.msk [vmem:[#allocation2 + $0x80] sm:$0xff] %vm2018_vm7, %v1955_v57 }
 0x2ac   : > { %v1977_v36 = vpop.permute.xlu2 %1976  ;;  %v2499_v22 = vsel %vm1246_vm2, %v2497_v37, %v2498_v25  ;;  %v2455_v37 = vrot.slane %v918_v14, 4 }
 0x2ad   : > { %2046 = vst.msk [vmem:[#allocation2 + $0xd8] sm:$0xff] %vm2018_vm7, %v1977_v36 }
 0x2af   : > { %2318 = vrot.lane.b32.xlu1 %v2242_v44, %s3448_s26  ;;  %v945_v44 = vld [vmem:[%s3830_s8 + $0x430] sm:$0xf] }
 0x2b0   : > { %2105 = vrot.lane.b32.xlu0 %v5014_v48, %s3446_s21  ;;  %v2291_v36 = vrot.slane %v945_v44, 2 }
 0x2b1   : > { %v1963_v35 = vpop.permute.xlu1 %1962 }
 0x2b2   : > { %2039 = vst.msk [vmem:[#allocation2 + $0xa0] sm:$0xff] %vm2018_vm7, %v1963_v35  ;;  %v1961_v28 = vpop.permute.xlu0 %1960  ;;  %2330 = vrot.lane.b32.xlu2 %v2257_v9, %s3448_s26  ;;  %v2469_v9 = vsel %vm1246_vm2, %v2467_v39, %v2468_v40  ;;  %v2292_v30 = vsel %vm1036_vm0, %v2289_v53, %v2291_v36 }
 0x2b3   : > { %2038 = vst.msk [vmem:[#allocation2 + $0x98] sm:$0xff] %vm2018_vm7, %v1961_v28  ;;  %v2500_v28 = vrot.slane %v945_v44, 4 }
 0x2b4   : > { %v2084_v15 = vpop.permute.xlu2 %2083 }
 0x2b5   : > { %2180 = vst.msk [vmem:[#allocation2] sm:$0xff] %vm2179_vm8, %v2084_v15  ;;  %v2486_v15 = vsel %vm1246_vm2, %v2483_v0, %v2485_v38  ;;  %v2279_v0 = vrot.slane %v5219_v34, 2 }
 0x2b7   : > { %2131 = vrot.lane.b32.xlu1 %v943_v27, %s3446_s21 }
 0x2b8   : > { %2119 = vrot.lane.b32.xlu0 %v934_v17, %s3446_s21  ;;  %v2501_v17 = vsel %vm1246_vm2, %v2498_v25, %v2500_v28  ;;  %v937_v25 = vld [vmem:[%s3830_s8 + $0x3f0] sm:$0xff]  ;;  %v2473_v28 = vrot.slane %v5256_v42, 4 }
 0x2b9   : > { %v1969_v54 = vpop.permute.xlu1 %1968 }
 0x2ba   : > { %2042 = vst.msk [vmem:[#allocation2 + $0xb8] sm:$0xff] %vm2018_vm7, %v1969_v54  ;;  %v1967_v31 = vpop.permute.xlu0 %1966  ;;  %2527 = vrot.lane.b32.xlu2 %v2451_v51, %s3447_s23  ;;  %v2246_v51 = vrot.slane %v918_v14, 2  ;;  %v927_v54 = vld [vmem:[%s3830_s8 + $0x3a0] sm:$0xf] }
 0x2bb   : > { %2041 = vst.msk [vmem:[#allocation2 + $0xb0] sm:$0xff] %vm2018_vm7, %v1967_v31  ;;  %v2261_v31 = vrot.slane %v927_v54, 2 }
 0x2bc   : > { %v2086_v2 = vpop.permute.xlu2 %2085 }
 0x2bd   : > { %2181 = vst.msk [vmem:[#allocation2 + $0x8] sm:$0xff] %vm2179_vm8, %v2086_v2  ;;  %v946_v2 = vld [vmem:[%s3830_s8 + $0x438] sm:$0xff] }
 0x2be   : > { %v2293_v29 = vrot.slane %v946_v2, 2 }
 0x2bf   : > { %2344 = vrot.lane.b32.xlu1 %v2275_v58, %s3448_s26 }
 0x2c0   : > { %2539 = vrot.lane.b32.xlu0 %v2466_v4, %s3447_s23 }
 0x2c1   : > { %v1975_v23 = vpop.permute.xlu1 %1974 }
 0x2c2   : > { %2045 = vst.msk [vmem:[#allocation2 + $0xd0] sm:$0xff] %vm2018_vm7, %v1975_v23  ;;  %v1973_v48 = vpop.permute.xlu0 %1972  ;;  %2356 = vrot.lane.b32.xlu2 %v2290_v60, %s3448_s26  ;;  %v2278_v23 = vrot.slane %v937_v25, 2 }
 0x2c3   : > { %2044 = vst.msk [vmem:[#allocation2 + $0xc8] sm:$0xff] %vm2018_vm7, %v1973_v48  ;;  %v2456_v48 = vsel %vm1246_vm2, %v2453_v7, %v2455_v37 }
 0x2c4   : > { %v2088_v11 = vpop.permute.xlu2 %2087 }
 0x2c5   : > { %2182 = vst.msk [vmem:[#allocation2 + $0x10] sm:$0xff] %vm2179_vm8, %v2088_v11  ;;  %v5231_v11 = vld [vmem:[%s3830_s8 + $0x440] sm:$0xff] }
 0x2c6   : > { %v2503_v49 = vrot.slane %v5231_v11, 4 }
 0x2c7   : > { %2565 = vrot.lane.b32.xlu1 %v2499_v22, %s3447_s23 }
 0x2c8   : > { %2553 = vrot.lane.b32.xlu0 %v2484_v32, %s3447_s23  ;;  %v2470_v32 = vrot.slane %v927_v54, 4 }
 0x2c9   : > { %v1981_v46 = vpop.permute.xlu1 %1980 }
 0x2ca   : > { %2048 = vst.msk [vmem:[#allocation2 + $0xe8] sm:$0xff] %vm2018_vm7, %v1981_v46  ;;  %v1979_v20 = vpop.permute.xlu0 %1978  ;;  %2095 = vrot.lane.b32.xlu2 %v916_v13, %s3446_s21 }
 0x2cb   : > { %2047 = vst.msk [vmem:[#allocation2 + $0xe0] sm:$0xff] %vm2018_vm7, %v1979_v20  ;;  %v2471_v20 = vsel %vm1246_vm2, %v2468_v40, %v2470_v32  ;;  %v949_v32 = vld [vmem:[%s3830_s8 + $0x450] sm:$0xff] }
 0x2cc   : > { %v2325_v21 = vpop.permute.xlu2 %2324 }
 0x2cf   : > { %2320 = vrot.lane.b32.xlu1 %v2245_v50, %s3448_s26  ;;  %v2502_v50 = vrot.slane %v946_v2, 4 }
 0x2d0   : > { %2107 = vrot.lane.b32.xlu0 %v925_v41, %s3446_s21 }
 0x2d1   : > { %v2518_v56 = vpop.permute.xlu1 %2517  ;;  %v2504_v47 = vsel %vm1246_vm2, %v2502_v50, %v2503_v49 }
 0x2d2   : > { %v2309_v6 = vpop.permute.xlu0 %2308  ;;  %2332 = vrot.lane.b32.xlu2 %v2260_v8, %s3448_s26 }
 0x2d3   : > { %2405 = vst.msk [vmem:[#allocation2] sm:$0xff] %vm2404_vm9, %v2309_v6 }
 0x2d4   : > { %2614 = vst.msk [vmem:[#allocation2] sm:$0xff] %vm2613_vm10, %v2518_v56  ;;  %v2090_v5 = vpop.permute.xlu2 %2089 }
 0x2d5   : > { %2183 = vst.msk [vmem:[#allocation2 + $0x18] sm:$0xff] %vm2179_vm8, %v2090_v5  ;;  %v928_v5 = vld [vmem:[%s3830_s8 + $0x3a8] sm:$0xff] }
 0x2d6   : > { %v2263_v39 = vrot.slane %v928_v5, 2 }
 0x2d7   : > { %2133 = vrot.lane.b32.xlu1 %v5099_v24, %s3446_s21  ;;  %v2262_v24 = vsel %vm1036_vm0, %v2259_v55, %v2261_v31 }
 0x2d8   : > { %2121 = vrot.lane.b32.xlu0 %v5080_v1, %s3446_s21  ;;  %v2247_v1 = vsel %vm1036_vm0, %v2244_v26, %v2246_v51  ;;  %v2280_v26 = vsel %vm1036_vm0, %v2278_v23, %v2279_v0 }
 0x2d9   : > { %v2520_v3 = vpop.permute.xlu1 %2519 }
 0x2da   : > { %v2311_v43 = vpop.permute.xlu0 %2310  ;;  %2529 = vrot.lane.b32.xlu2 %v2454_v62, %s3447_s23 }
 0x2db   : > { %2406 = vst.msk [vmem:[#allocation2 + $0x8] sm:$0xff] %vm2404_vm9, %v2311_v43  ;;  %v2646_v57 = vld [vmem:[#allocation2] sm:$0xff] }
 0x2dc   : > { %2615 = vst.msk [vmem:[#allocation2 + $0x8] sm:$0xff] %vm2613_vm10, %v2520_v3  ;;  %3199 = vmatmul.msk.f32.vlgmr.msra.gmra.mxu0 %vm2683_vm11, %v2646_v57  ;;  %v2327_v35 = vpop.permute.xlu2 %2326  ;;  %v2264_v3 = vrot.slane %v5256_v42, 2 }
 0x2de   : > { %v2265_v57 = vsel %vm1036_vm0, %v2263_v39, %v2264_v3  ;;  %v951_v39 = vld [vmem:[%s3830_s8 + $0x460] sm:$0xf] }
 0x2df   : > { %2346 = vrot.lane.b32.xlu1 %v2277_v61, %s3448_s26  ;;  %v939_v61 = vld [vmem:[%s3830_s8 + $0x400] sm:$0xf] }
 0x2e0   : > { %2541 = vrot.lane.b32.xlu0 %v2469_v9, %s3447_s23  ;;  %v2281_v36 = vrot.slane %v939_v61, 2  ;;  %v2490_v54 = vrot.slane %v939_v61, 4 }
 0x2e1   : > { %v2313_v27 = vpop.permute.xlu1 %2312 }
 0x2e2   : > { %2407 = vst.msk [vmem:[#allocation2 + $0x10] sm:$0xff] %vm2404_vm9, %v2313_v27  ;;  %v2100_v16 = vpop.permute.xlu0 %2099  ;;  %2358 = vrot.lane.b32.xlu2 %v2292_v30, %s3448_s26  ;;  %v948_v27 = vld [vmem:[%s3830_s8 + $0x448] sm:$0xf]  ;;  %v2282_v38 = vsel %vm1036_vm0, %v2279_v0, %v2281_v36 }
 0x2e3   : > { %2188 = vst.msk [vmem:[#allocation2 + $0x40] sm:$0xff] %vm2179_vm8, %v2100_v16  ;;  %v2647_v10 = vld [vmem:[#allocation2 + $0x8] sm:$0xff]  ;;  %v2505_v14 = vrot.slane %v948_v27, 4 }
 0x2e4   : > { %2413 = vst.msk [vmem:[#allocation2 + $0x40] sm:$0xff] %vm2404_vm9, %v2325_v21  ;;  %3200 = vmatmul.msk.f32.gmra.mxu0 %vm2683_vm11, %v2647_v10  ;;  %v2536_v33 = vpop.permute.xlu2 %2535  ;;  %v2487_v21 = vrot.slane %v937_v25, 4  ;;  %v2296_v10 = vrot.slane %v948_v27, 2 }
 0x2e7   : > { %2567 = vrot.lane.b32.xlu1 %v2501_v17, %s3447_s23 }
 0x2e8   : > { %2555 = vrot.lane.b32.xlu0 %v2486_v15, %s3447_s23 }
 0x2e9   : > { %v2534_v19 = vpop.permute.xlu1 %2533 }
 0x2ea   : > { %2622 = vst.msk [vmem:[#allocation2 + $0x40] sm:$0xff] %vm2613_vm10, %v2534_v19  ;;  %v2522_v59 = vpop.permute.xlu0 %2521  ;;  %2097 = vrot.lane.b32.xlu2 %v5128_v63, %s3446_s21  ;;  %v2294_v63 = vrot.slane %v5231_v11, 2 }
 0x2eb   : > { %2616 = vst.msk [vmem:[#allocation2 + $0x10] sm:$0xff] %vm2613_vm10, %v2522_v59 }
 0x2ec   : > { %v2092_v45 = vpop.permute.xlu2 %2091  ;;  %v2295_v55 = vsel %vm1036_vm0, %v2293_v29, %v2294_v63 }
 0x2ed   : > { %2184 = vst.msk [vmem:[#allocation2 + $0x20] sm:$0xff] %vm2179_vm8, %v2092_v45 }
 0x2ef   : > { %2322 = vrot.lane.b32.xlu1 %v2247_v1, %s3448_s26  ;;  %v2506_v1 = vsel %vm1246_vm2, %v2503_v49, %v2505_v14  ;;  %v953_v14 = vld [vmem:[%s3830_s8 + $0x470] sm:$0xff] }
 0x2f0   : > { %2109 = vrot.lane.b32.xlu0 %v5135_v12, %s3446_s21  ;;  %v2488_v12 = vrot.slane %v5219_v34, 4 }
 0x2f1   : > { %v2315_v52 = vpop.permute.xlu1 %2314  ;;  %v2654_v58 = vld [vmem:[#allocation2 + $0x40] sm:$0xff] }
 0x2f2   : > { %2408 = vst.msk [vmem:[#allocation2 + $0x18] sm:$0xff] %vm2404_vm9, %v2315_v52  ;;  %v2102_v53 = vpop.permute.xlu0 %2101  ;;  %v2648_v4 = vld [vmem:[#allocation2 + $0x10] sm:$0xff]  ;;  %3207 = vmatmul.msk.f32.vlgmr.msra.gmra.mxu1 %vm2683_vm11, %v2654_v58  ;;  %2334 = vrot.lane.b32.xlu2 %v2262_v24, %s3448_s26  ;;  %v2489_v7 = vsel %vm1246_vm2, %v2487_v21, %v2488_v12  ;;  %v2491_v31 = vsel %vm1246_vm2, %v2488_v12, %v2490_v54  ;;  %v930_v24 = vld [vmem:[%s3830_s8 + $0x3b8] sm:$0xf]  ;;  %v2304_v54 = vrot.slane %v953_v14, 2 }
 0x2f3   : > { %2189 = vst.msk [vmem:[#allocation2 + $0x48] sm:$0xff] %vm2179_vm8, %v2102_v53  ;;  %3201 = vmatmul.msk.f32.gmra.mxu0 %vm2683_vm11, %v2648_v4  ;;  %v2266_v58 = vrot.slane %v930_v24, 2 }
 0x2f4   : > { %2414 = vst.msk [vmem:[#allocation2 + $0x48] sm:$0xff] %vm2404_vm9, %v2327_v35  ;;  %v2329_v60 = vpop.permute.xlu2 %2328  ;;  %v2472_v35 = vrot.slane %v928_v5, 4 }
 0x2f5   : > { %2623 = vst.msk [vmem:[#allocation2 + $0x48] sm:$0xff] %vm2613_vm10, %v2536_v33  ;;  %v2297_v33 = vsel %vm1036_vm0, %v2294_v63, %v2296_v10  ;;  %v2267_v37 = vsel %vm1036_vm0, %v2264_v3, %v2266_v58  ;;  %v2513_v58 = vrot.slane %v953_v14, 4 }
 0x2f6   : > { %v2474_v17 = vsel %vm1246_vm2, %v2472_v35, %v2473_v28  ;;  %v3326_v35 = vld [vmem:[%s3830_s8 + $0x2e8] sm:$0xff] }
 0x2f7   : > { %2135 = vrot.lane.b32.xlu1 %v946_v2, %s3446_s21  ;;  %v940_v2 = vld [vmem:[%s3830_s8 + $0x408] sm:$0xff] }
 0x2f8   : > { %2123 = vrot.lane.b32.xlu0 %v937_v25, %s3446_s21 }
 0x2f9   : > { %v2524_v22 = vpop.permute.xlu1 %2523 }
 0x2fa   : > { %2617 = vst.msk [vmem:[#allocation2 + $0x18] sm:$0xff] %vm2613_vm10, %v2524_v22  ;;  %v2116_v13 = vpop.permute.xlu0 %2115  ;;  %2531 = vrot.lane.b32.xlu2 %v2456_v48, %s3447_s23  ;;  %v2475_v48 = vrot.slane %v930_v24, 4 }
 0x2fb   : > { %2196 = vst.msk [vmem:[#allocation2 + $0x80] sm:$0xff] %vm2179_vm8, %v2116_v13  ;;  %v950_v13 = vld [vmem:[%s3830_s8 + $0x458] sm:$0xff] }
 0x2fc   : > { %v2655_v46 = vld [vmem:[#allocation2 + $0x48] sm:$0xff]  ;;  %v2538_v41 = vpop.permute.xlu2 %2537  ;;  %v2476_v63 = vsel %vm1246_vm2, %v2473_v28, %v2475_v48  ;;  %v2508_v50 = vrot.slane %v950_v13, 4  ;;  %v1917_v28 = vrot.slane %v3326_v35, 4 }
 0x2fd   : > { %3208 = vmatmul.msk.f32.gmra.mxu1 %vm2683_vm11, %v2655_v46  ;;  %v2299_v46 = vrot.slane %v950_v13, 2 }
 0x2ff   : > { %2348 = vrot.lane.b32.xlu1 %v2280_v26, %s3448_s26  ;;  %v2298_v26 = vrot.slane %v949_v32, 2 }
 0x300   : > { %2543 = vrot.lane.b32.xlu0 %v2471_v20, %s3447_s23 }
 0x301   : > { %v2550_v8 = vpop.permute.xlu1 %2549  ;;  %v2649_v56 = vld [vmem:[#allocation2 + $0x18] sm:$0xff]  ;;  %v2300_v49 = vsel %vm1036_vm0, %v2298_v26, %v2299_v46 }
 0x302   : > { %v2341_v6 = vpop.permute.xlu0 %2340  ;;  %3202 = vmatmul.msk.f32.gmra.mxu0 %vm2683_vm11, %v2649_v56  ;;  %2360 = vrot.lane.b32.xlu2 %v2295_v55, %s3448_s26  ;;  %v2492_v55 = vrot.slane %v940_v2, 4 }
 0x303   : > { %2421 = vst.msk [vmem:[#allocation2 + $0x80] sm:$0xff] %vm2404_vm9, %v2341_v6 }
 0x304   : > { %2630 = vst.msk [vmem:[#allocation2 + $0x80] sm:$0xff] %vm2613_vm10, %v2550_v8  ;;  %v2094_v18 = vpop.permute.xlu2 %2093 }
 0x305   : > { %2185 = vst.msk [vmem:[#allocation2 + $0x28] sm:$0xff] %vm2179_vm8, %v2094_v18 }
 0x307   : > { %2569 = vrot.lane.b32.xlu1 %v2504_v47, %s3447_s23 }
 0x308   : > { %2557 = vrot.lane.b32.xlu0 %v2489_v7, %s3447_s23  ;;  %v942_v7 = vld [vmem:[%s3830_s8 + $0x418] sm:$0xf] }
 0x309   : > { %v2317_v62 = vpop.permute.xlu1 %2316  ;;  %v2286_v18 = vrot.slane %v942_v7, 2  ;;  %v2495_v36 = vrot.slane %v942_v7, 4 }
 0x30a   : > { %2409 = vst.msk [vmem:[#allocation2 + $0x20] sm:$0xff] %vm2404_vm9, %v2317_v62  ;;  %v2104_v40 = vpop.permute.xlu0 %2103  ;;  %2111 = vrot.lane.b32.xlu2 %v928_v5, %s3446_s21 }
 0x30b   : > { %2190 = vst.msk [vmem:[#allocation2 + $0x50] sm:$0xff] %vm2179_vm8, %v2104_v40  ;;  %v2662_v43 = vld [vmem:[#allocation2 + $0x80] sm:$0xff]  ;;  %v2301_v40 = vrot.slane %v951_v39, 2 }
 0x30c   : > { %2415 = vst.msk [vmem:[#allocation2 + $0x50] sm:$0xff] %vm2404_vm9, %v2329_v60  ;;  %3215 = vmatmul.msk.f32.vlgmr.msra.gmra.mxu2 %vm2683_vm11, %v2662_v43  ;;  %v2331_v44 = vpop.permute.xlu2 %2330  ;;  %v5310_v60 = vld [vmem:[%s3830_s8 + $0x410] sm:$0xff] }
 0x30d   : > { %2624 = vst.msk [vmem:[#allocation2 + $0x50] sm:$0xff] %vm2613_vm10, %v2538_v41  ;;  %v2284_v23 = vrot.slane %v5310_v60, 2  ;;  %v2507_v41 = vrot.slane %v949_v32, 4  ;;  %v2493_v8 = vrot.slane %v5310_v60, 4 }
 0x30f   : > { %2125 = vrot.lane.b32.xlu1 %v5219_v34, %s3446_s21  ;;  %v2283_v34 = vrot.slane %v940_v2, 2  ;;  %v2509_v12 = vsel %vm1246_vm2, %v2507_v41, %v2508_v50  ;;  %v2494_v6 = vsel %vm1246_vm2, %v2492_v55, %v2493_v8  ;;  %v2287_v3 = vsel %vm1036_vm0, %v2284_v23, %v2286_v18 }
 0x310   : > { %2336 = vrot.lane.b32.xlu0 %v2265_v57, %s3448_s26  ;;  %v2510_v57 = vrot.slane %v951_v39, 4 }
 0x311   : > { %v2526_v9 = vpop.permute.xlu1 %2525  ;;  %v2285_v29 = vsel %vm1036_vm0, %v2283_v34, %v2284_v23 }
 0x312   : > { %2618 = vst.msk [vmem:[#allocation2 + $0x20] sm:$0xff] %vm2613_vm10, %v2526_v9  ;;  %v2118_v30 = vpop.permute.xlu0 %2117  ;;  %2137 = vrot.lane.b32.xlu2 %v5231_v11, %s3446_s21  ;;  %v2511_v10 = vsel %vm1246_vm2, %v2508_v50, %v2510_v57 }
 0x313   : > { %2197 = vst.msk [vmem:[#allocation2 + $0x88] sm:$0xff] %vm2179_vm8, %v2118_v30 }
 0x314   : > { %v2656_v16 = vld [vmem:[#allocation2 + $0x50] sm:$0xff]  ;;  %v2528_v15 = vpop.permute.xlu2 %2527 }
 0x315   : > { %3209 = vmatmul.msk.f32.gmra.mxu1 %vm2683_vm11, %v2656_v16 }
 0x317   : > { %2350 = vrot.lane.b32.xlu1 %v2282_v38, %s3448_s26  ;;  %v3327_v38 = vld [vmem:[%s3830_s8 + $0x2f0] sm:$0xff] }
 0x318   : > { %2545 = vrot.lane.b32.xlu0 %v2474_v17, %s3447_s23  ;;  %v1918_v16 = vrot.slane %v3327_v38, 4  ;;  %v2496_v17 = vsel %vm1246_vm2, %v2493_v8, %v2495_v36 }
 0x319   : > { %v2552_v51 = vpop.permute.xlu1 %2551  ;;  %v2650_v19 = vld [vmem:[#allocation2 + $0x20] sm:$0xff] }
 0x31a   : > { %v2343_v59 = vpop.permute.xlu0 %2342  ;;  %3203 = vmatmul.msk.f32.gmra.mxu0 %vm2683_vm11, %v2650_v19  ;;  %2362 = vrot.lane.b32.xlu2 %v2297_v33, %s3448_s26  ;;  %v1919_v33 = vsel %vm1246_vm2, %v1917_v28, %v1918_v16 }
 0x31b   : > { %2422 = vst.msk [vmem:[#allocation2 + $0x88] sm:$0xff] %vm2404_vm9, %v2343_v59 }
 0x31c   : > { %2631 = vst.msk [vmem:[#allocation2 + $0x88] sm:$0xff] %vm2613_vm10, %v2552_v51  ;;  %v2357_v45 = vpop.permute.xlu2 %2356  ;;  %v952_v51 = vld [vmem:[%s3830_s8 + $0x468] sm:$0xff] }
 0x31d   : > { %v2303_v19 = vrot.slane %v952_v51, 2 }
 0x31f   : > { %2571 = vrot.lane.b32.xlu1 %v2506_v1, %s3447_s23  ;;  %v2305_v24 = vsel %vm1036_vm0, %v2303_v19, %v2304_v54 }
 0x320   : > { %2559 = vrot.lane.b32.xlu0 %v2491_v31, %s3447_s23 }
 0x321   : > { %v2319_v52 = vpop.permute.xlu1 %2318 }
 0x322   : > { %2410 = vst.msk [vmem:[#allocation2 + $0x28] sm:$0xff] %vm2404_vm9, %v2319_v52  ;;  %v2106_v53 = vpop.permute.xlu0 %2105  ;;  %2113 = vrot.lane.b32.xlu2 %v5256_v42, %s3446_s21 }
 0x323   : > { %2191 = vst.msk [vmem:[#allocation2 + $0x58] sm:$0xff] %vm2179_vm8, %v2106_v53  ;;  %v2663_v4 = vld [vmem:[#allocation2 + $0x88] sm:$0xff] }
 0x324   : > { %2416 = vst.msk [vmem:[#allocation2 + $0x58] sm:$0xff] %vm2404_vm9, %v2331_v44  ;;  %3216 = vmatmul.msk.f32.gmra.mxu2 %vm2683_vm11, %v2663_v4  ;;  %v2096_v25 = vpop.permute.xlu2 %2095  ;;  %v2302_v44 = vsel %vm1036_vm0, %v2299_v46, %v2301_v40 }
 0x325   : > { %2619 = vst.msk [vmem:[#allocation2 + $0x28] sm:$0xff] %vm2613_vm10, %v2528_v15 }
 0x326   : > { %2186 = vst.msk [vmem:[#allocation2 + $0x30] sm:$0xff] %vm2179_vm8, %v2096_v25 }
 0x327   : > { %2127 = vrot.lane.b32.xlu1 %v940_v2, %s3446_s21  ;;  %v3328_v2 = vld [vmem:[%s3830_s8 + $0x2f8] sm:$0xf] }
 0x328   : > { %2338 = vrot.lane.b32.xlu0 %v2267_v37, %s3448_s26  ;;  %v1920_v37 = vrot.slane %v3328_v2, 4 }
 0x329   : > { %v2132_v0 = vpop.permute.xlu1 %2131 }
 0x32a   : > { %2204 = vst.msk [vmem:[#allocation2 + $0xc0] sm:$0xff] %vm2179_vm8, %v2132_v0  ;;  %v2120_v22 = vpop.permute.xlu0 %2119  ;;  %2139 = vrot.lane.b32.xlu2 %v949_v32, %s3446_s21  ;;  %v1921_v23 = vsel %vm1246_vm2, %v1918_v16, %v1920_v37 }
 0x32b   : > { %2198 = vst.msk [vmem:[#allocation2 + $0x90] sm:$0xff] %vm2179_vm8, %v2120_v22 }
 0x32c   : > { %2429 = vst.msk [vmem:[#allocation2 + $0xc0] sm:$0xff] %vm2404_vm9, %v2357_v45  ;;  %v2651_v11 = vld [vmem:[#allocation2 + $0x28] sm:$0xff]  ;;  %v2333_v20 = vpop.permute.xlu2 %2332  ;;  %v2512_v45 = vrot.slane %v952_v51, 4 }
 0x32d   : > { %3204 = vmatmul.msk.f32.gmra.mxu0 %vm2683_vm11, %v2651_v11 }
 0x32e   : > { %v2514_v53 = vsel %vm1246_vm2, %v2512_v45, %v2513_v58 }
 0x32f   : > { %2352 = vrot.lane.b32.xlu1 %v2285_v29, %s3448_s26 }
 0x330   : > { %2547 = vrot.lane.b32.xlu0 %v2476_v63, %s3447_s23 }
 0x331   : > { %v2345_v21 = vpop.permute.xlu1 %2344 }
 0x332   : > { %2423 = vst.msk [vmem:[#allocation2 + $0x90] sm:$0xff] %vm2404_vm9, %v2345_v21  ;;  %v2540_v56 = vpop.permute.xlu0 %2539  ;;  %2364 = vrot.lane.b32.xlu2 %v2300_v49, %s3448_s26 }
 0x333   : > { %2625 = vst.msk [vmem:[#allocation2 + $0x58] sm:$0xff] %vm2613_vm10, %v2540_v56 }
 0x334   : > { %v2530_v47 = vpop.permute.xlu2 %2529 }
 0x337   : > { %2573 = vrot.lane.b32.xlu1 %v2509_v12, %s3447_s23 }
 0x338   : > { %2561 = vrot.lane.b32.xlu0 %v2494_v6, %s3447_s23 }
 0x339   : > { %v2566_v5 = vpop.permute.xlu1 %2565 }
 0x33a   : > { %2638 = vst.msk [vmem:[#allocation2 + $0xc0] sm:$0xff] %vm2613_vm10, %v2566_v5  ;;  %v2554_v42 = vpop.permute.xlu0 %2553  ;;  %v2657_v62 = vld [vmem:[#allocation2 + $0x58] sm:$0xff]  ;;  %2129 = vrot.lane.b32.xlu2 %v5310_v60, %s3446_s21 }
 0x33b   : > { %2632 = vst.msk [vmem:[#allocation2 + $0x90] sm:$0xff] %vm2613_vm10, %v2554_v42  ;;  %3210 = vmatmul.msk.f32.gmra.mxu1 %vm2683_vm11, %v2657_v62  ;;  %v954_v60 = vld [vmem:[%s3830_s8 + $0x478] sm:$0xf]  ;;  %s3238_s8 = sshll.u32 %s3431_s15, 8 }
 0x33c   : > { %v2359_v43 = vpop.permute.xlu2 %2358  ;;  %v2306_v34 = vrot.slane %v954_v60, 2 }
 0x33e   : > { %v2307_v48 = vsel %vm1036_vm0, %v2304_v54, %v2306_v34 }
 0x33f   : > { %2354 = vrot.lane.b32.xlu1 %v2287_v3, %s3448_s26 }
 0x340   : > { %2141 = vrot.lane.b32.xlu0 %v950_v13, %s3446_s21  ;;  %v2515_v13 = vrot.slane %v954_v60, 4 }
 0x341   : > { %v2321_v61 = vpop.permute.xlu1 %2320  ;;  %v2670_v9 = vld [vmem:[#allocation2 + $0xc0] sm:$0xff] }
 0x342   : > { %2411 = vst.msk [vmem:[#allocation2 + $0x30] sm:$0xff] %vm2404_vm9, %v2321_v61  ;;  %v2108_v30 = vpop.permute.xlu0 %2107  ;;  %v2664_v27 = vld [vmem:[#allocation2 + $0x90] sm:$0xff]  ;;  %3223 = vmatmul.msk.f32.vlgmr.msra.gmra.mxu3 %vm2683_vm11, %v2670_v9  ;;  %2366 = vrot.lane.b32.xlu2 %v2302_v44, %s3448_s26  ;;  %v2516_v26 = vsel %vm1246_vm2, %v2513_v58, %v2515_v13 }
 0x343   : > { %2192 = vst.msk [vmem:[#allocation2 + $0x60] sm:$0xff] %vm2179_vm8, %v2108_v30  ;;  %3217 = vmatmul.msk.f32.gmra.mxu2 %vm2683_vm11, %v2664_v27 }
 0x344   : > { %2417 = vst.msk [vmem:[#allocation2 + $0x60] sm:$0xff] %vm2404_vm9, %v2333_v20  ;;  %v2098_v15 = vpop.permute.xlu2 %2097 }
 0x345   : > { %2620 = vst.msk [vmem:[#allocation2 + $0x30] sm:$0xff] %vm2613_vm10, %v2530_v47 }
 0x346   : > { %2187 = vst.msk [vmem:[#allocation2 + $0x38] sm:$0xff] %vm2179_vm8, %v2098_v15 }
 0x347   : > { %2575 = vrot.lane.b32.xlu1 %v2511_v10, %s3447_s23 }
 0x348   : > { %2563 = vrot.lane.b32.xlu0 %v2496_v17, %s3447_s23 }
 0x349   : > { %v2134_v59 = vpop.permute.xlu1 %2133 }
 0x34a   : > { %2205 = vst.msk [vmem:[#allocation2 + $0xc8] sm:$0xff] %vm2179_vm8, %v2134_v59  ;;  %v2122_v1 = vpop.permute.xlu0 %2121  ;;  %1982 = vrot.lane.b32.xlu2 %v1919_v33, %s3445_s19 }
 0x34b   : > { %2199 = vst.msk [vmem:[#allocation2 + $0x98] sm:$0xff] %vm2179_vm8, %v2122_v1 }
 0x34c   : > { %2430 = vst.msk [vmem:[#allocation2 + $0xc8] sm:$0xff] %vm2404_vm9, %v2359_v43  ;;  %v2652_v31 = vld [vmem:[#allocation2 + $0x30] sm:$0xff]  ;;  %v2335_v52 = vpop.permute.xlu2 %2334 }
 0x34d   : > { %3205 = vmatmul.msk.f32.gmra.mxu0 %vm2683_vm11, %v2652_v31 }
 0x34f   : > { %2368 = vrot.lane.b32.xlu1 %v2305_v24, %s3448_s26 }
 0x350   : > { %2143 = vrot.lane.b32.xlu0 %v952_v51, %s3446_s21 }
 0x351   : > { %v2347_v4 = vpop.permute.xlu1 %2346 }
 0x352   : > { %2424 = vst.msk [vmem:[#allocation2 + $0x98] sm:$0xff] %vm2404_vm9, %v2347_v4  ;;  %v2542_v25 = vpop.permute.xlu0 %2541  ;;  %2577 = vrot.lane.b32.xlu2 %v2514_v53, %s3447_s23 }
 0x353   : > { %2626 = vst.msk [vmem:[#allocation2 + $0x60] sm:$0xff] %vm2613_vm10, %v2542_v25 }
 0x354   : > { %v2532_v0 = vpop.permute.xlu2 %2531 }
 0x357   : > { %2145 = vrot.lane.b32.xlu1 %v953_v14, %s3446_s21 }
 0x358   : > { %1984 = vrot.lane.b32.xlu0 %v1921_v23, %s3445_s19 }
 0x359   : > { %v2800_v22 = vpop.f32.mrf.mxu0  ;;  %v2568_v32 = vpop.permute.xlu1 %2567 }
 0x35a   : > { %2896 = vst [vmem:[%s5385_s28] sm:$0xff] %v2800_v22  ;;  %v2556_v11 = vpop.permute.xlu0 %2555  ;;  %v2658_v29 = vld [vmem:[#allocation2 + $0x60] sm:$0xff]  ;;  %2370 = vrot.lane.b32.xlu2 %v2307_v48, %s3448_s26  ;;  %v2966_v41 = vmul.f32 %v2800_v22, %v2800_v22  ;;  %s3056_s26 = sshll.u32 %s5385_s28, 4  ;;  %s3057_s26 = int_to_ptr.vmem [resolvable:$true] %s3056_s26 }
 0x35b   : > { %2639 = vst.msk [vmem:[#allocation2 + $0xc8] sm:$0xff] %vm2613_vm10, %v2568_v32  ;;  %3211 = vmatmul.msk.f32.gmra.mxu1 %vm2683_vm11, %v2658_v29 }
 0x35c   : > { %2633 = vst.msk [vmem:[#allocation2 + $0x98] sm:$0xff] %vm2613_vm10, %v2556_v11  ;;  %v2361_v46 = vpop.permute.xlu2 %2360 }
 0x360   : > { %2579 = vrot.lane.b32.xlu0 %v2516_v26, %s3447_s23  ;;  %s3055_s23 = scalar_lea.hbm %s5590_s2, %s3238_s8 }
 0x361   : > { %v2803_v63 = vpop.f32.mrf.mxu0  ;;  %v2323_v20 = vpop.permute.xlu1 %2322  ;;  %s3058_s29 = sshll.u32 %s3055_s23, 4  ;;  %s3059_s29 = int_to_ptr.hbm [resolvable:$true] %s3058_s29 }
 0x362   : > { %2897 = vst [vmem:[%s5385_s28 + $0x8] sm:$0xff] %v2803_v63  ;;  %v2928_v50 = vadd.f32 %v2803_v63, %v2800_v22  ;;  %v2967_v49 = vmul.f32 %v2803_v63, %v2803_v63  ;;  %v2110_v55 = vpop.permute.xlu0 %2109  ;;  %v2671_v21 = vld [vmem:[#allocation2 + $0xc8] sm:$0xff]  ;;  %s3343_s4 = sshra.s32 %s3059_s29, 4  ;;  %s3344_s4 = int_to_ptr.hbm [resolvable:$true] %s3343_s4 }
 0x363   : > { %2412 = vst.msk [vmem:[#allocation2 + $0x38] sm:$0xff] %vm2404_vm9, %v2323_v20  ;;  %v2665_v8 = vld [vmem:[#allocation2 + $0x98] sm:$0xff]  ;;  %3224 = vmatmul.msk.f32.gmra.mxu3 %vm2683_vm11, %v2671_v21  ;;  %s3345_s5 = scalar_lea.hbm %s3344_s4, 256  ;;  %p3350_p3 = scmp.lt.s32.totalorder %s3344_s4, %s5590_s2 }
 0x364   : > { %v2998_v56 = vadd.f32 %v2967_v49, %v2966_v41  ;;  %2193 = vst.msk [vmem:[#allocation2 + $0x68] sm:$0xff] %vm2179_vm8, %v2110_v55  ;;  %3218 = vmatmul.msk.f32.gmra.mxu2 %vm2683_vm11, %v2665_v8  ;;  %v2112_v12 = vpop.permute.xlu2 %2111  ;;  %p3346_p0 = scmp.ne.s32.totalorder %s3344_s4, %s3345_s5  ;;  %p3351_p4 = scmp.lt.s32.totalorder %s3349_s11, %s3345_s5 }
 0x365   : > { %2418 = vst.msk [vmem:[#allocation2 + $0x68] sm:$0xff] %vm2404_vm9, %v2335_v52 }
 0x366   : > { %2621 = vst.msk [vmem:[#allocation2 + $0x38] sm:$0xff] %vm2613_vm10, %v2532_v0  ;;  %p3347_p1 = pnand %p3346_p0, %p3509_p5  ;;  %p3352_p6 = por %p3351_p4, %p3350_p3 }
 0x367   : > { %2194 = vst.msk [vmem:[#allocation2 + $0x70] sm:$0xff] %vm2179_vm8, %v2112_v12 }
 0x368   : > { %p3348_p2 = pneg %p3347_p1 }
 0x369   : > { %v2136_v6 = vpop.permute.xlu1 %2135 }
 0x36a   : > { %v2124_v47 = vpop.permute.xlu0 %2123  ;;  %2206 = vst.msk [vmem:[#allocation2 + $0xd0] sm:$0xff] %vm2179_vm8, %v2136_v6  ;;  %p3353_p7 = pnand %p3352_p6, %p3348_p2 }
 0x36b   : > { %2200 = vst.msk [vmem:[#allocation2 + $0xa0] sm:$0xff] %vm2179_vm8, %v2124_v47 }
 0x36c   : > { %2431 = vst.msk [vmem:[#allocation2 + $0xd0] sm:$0xff] %vm2404_vm9, %v2361_v46  ;;  %v2138_v18 = vpop.permute.xlu2 %2137 }
 0x36d   : > { %v2653_v7 = vld [vmem:[#allocation2 + $0x38] sm:$0xff]  ;;  %2207 = vst.msk [vmem:[#allocation2 + $0xd8] sm:$0xff] %vm2179_vm8, %v2138_v18 }
 0x36e   : > { %3206 = vmatmul.msk.f32.gmra.mxu0 %vm2683_vm11, %v2653_v7 }
 0x36f   : > { %v5407_v5 = vpop.f32.mrf.mxu1 }
 0x370   : > { %v2806_v42 = vpop.f32.mrf.mxu0  ;;  %2904 = vst [vmem:[%s5385_s28 + $0x40] sm:$0xff] %v5407_v5 }
 0x371   : > { %2898 = vst [vmem:[%s5385_s28 + $0x10] sm:$0xff] %v2806_v42  ;;  %v2929_v62 = vadd.f32 %v2928_v50, %v2806_v42  ;;  %v2968_v39 = vmul.f32 %v2806_v42, %v2806_v42  ;;  %v2349_v3 = vpop.permute.xlu1 %2348 }
 0x372   : > { %v2544_v40 = vpop.permute.xlu0 %2543  ;;  %2425 = vst.msk [vmem:[#allocation2 + $0xa0] sm:$0xff] %vm2404_vm9, %v2349_v3 }
 0x373   : > { %v2999_v43 = vadd.f32 %v2998_v56, %v2968_v39  ;;  %2627 = vst.msk [vmem:[#allocation2 + $0x68] sm:$0xff] %vm2613_vm10, %v2544_v40 }
 0x374   : > { %v2363_v57 = vpop.permute.xlu2 %2362 }
 0x375   : > { %2432 = vst.msk [vmem:[#allocation2 + $0xd8] sm:$0xff] %vm2404_vm9, %v2363_v57 }
 0x379   : > { %v2570_v44 = vpop.permute.xlu1 %2569 }
 0x37a   : > { %v2558_v61 = vpop.permute.xlu0 %2557  ;;  %v2659_v36 = vld [vmem:[#allocation2 + $0x68] sm:$0xff]  ;;  %2640 = vst.msk [vmem:[#allocation2 + $0xd0] sm:$0xff] %vm2613_vm10, %v2570_v44  ;;  %v5416_v9 = vpop.f32.mrf.mxu1 }
 0x37b   : > { %2634 = vst.msk [vmem:[#allocation2 + $0xa0] sm:$0xff] %vm2613_vm10, %v2558_v61  ;;  %3212 = vmatmul.msk.f32.gmra.mxu1 %vm2683_vm11, %v2659_v36 }
 0x37c   : > { %2905 = vst [vmem:[%s5385_s28 + $0x48] sm:$0xff] %v5416_v9  ;;  %v2114_v35 = vpop.permute.xlu2 %2113 }
 0x37d   : > { %2195 = vst.msk [vmem:[#allocation2 + $0x78] sm:$0xff] %vm2179_vm8, %v2114_v35 }
 0x37f   : > { %v2809_v28 = vpop.f32.mrf.mxu0 }
 0x380   : > { %2899 = vst [vmem:[%s5385_s28 + $0x18] sm:$0xff] %v2809_v28  ;;  %v2930_v30 = vadd.f32 %v2929_v62, %v2809_v28  ;;  %v2969_v27 = vmul.f32 %v2809_v28, %v2809_v28 }
 0x381   : > { %v2126_v38 = vpop.permute.xlu1 %2125  ;;  %v2672_v16 = vld [vmem:[#allocation2 + $0xd0] sm:$0xff] }
 0x382   : > { %v3000_v10 = vadd.f32 %v2999_v43, %v2969_v27  ;;  %v2337_v17 = vpop.permute.xlu0 %2336  ;;  %v2666_v15 = vld [vmem:[#allocation2 + $0xa0] sm:$0xff]  ;;  %2201 = vst.msk [vmem:[#allocation2 + $0xa8] sm:$0xff] %vm2179_vm8, %v2126_v38  ;;  %3225 = vmatmul.msk.f32.gmra.mxu3 %vm2683_vm11, %v2672_v16 }
 0x383   : > { %2419 = vst.msk [vmem:[#allocation2 + $0x70] sm:$0xff] %vm2404_vm9, %v2337_v17  ;;  %3219 = vmatmul.msk.f32.gmra.mxu2 %vm2683_vm11, %v2666_v15  ;;  %v2974_v17 = vmul.f32 %v5407_v5, %v5407_v5 }
 0x384   : > { %v2140_v14 = vpop.permute.xlu2 %2139 }
 0x385   : > { %2208 = vst.msk [vmem:[#allocation2 + $0xe0] sm:$0xff] %vm2179_vm8, %v2140_v14 }
 0x389   : > { %v2351_v33 = vpop.permute.xlu1 %2350 }
 0x38a   : > { %v2546_v51 = vpop.permute.xlu0 %2545  ;;  %2426 = vst.msk [vmem:[#allocation2 + $0xa8] sm:$0xff] %vm2404_vm9, %v2351_v33  ;;  %v2975_v33 = vmul.f32 %v5416_v9, %v5416_v9 }
 0x38b   : > { %2628 = vst.msk [vmem:[#allocation2 + $0x70] sm:$0xff] %vm2613_vm10, %v2546_v51 }
 0x38c   : > { %v2365_v19 = vpop.permute.xlu2 %2364 }
 0x38d   : > { %2433 = vst.msk [vmem:[#allocation2 + $0xe0] sm:$0xff] %vm2404_vm9, %v2365_v19 }
 0x38f   : > { %v5432_v54 = vpop.f32.mrf.mxu2 }
 0x390   : > { %2912 = vst [vmem:[%s5385_s28 + $0x80] sm:$0xff] %v5432_v54 }
 0x391   : > { %v2572_v59 = vpop.permute.xlu1 %2571 }
 0x392   : > { %v2560_v1 = vpop.permute.xlu0 %2559  ;;  %v2660_v31 = vld [vmem:[#allocation2 + $0x70] sm:$0xff]  ;;  %2641 = vst.msk [vmem:[#allocation2 + $0xd8] sm:$0xff] %vm2613_vm10, %v2572_v59  ;;  %v5437_v45 = vpop.f32.mrf.mxu1 }
 0x393   : > { %2635 = vst.msk [vmem:[#allocation2 + $0xa8] sm:$0xff] %vm2613_vm10, %v2560_v1  ;;  %3213 = vmatmul.msk.f32.gmra.mxu1 %vm2683_vm11, %v2660_v31  ;;  %v2976_v59 = vmul.f32 %v5437_v45, %v5437_v45 }
 0x394   : > { %2906 = vst [vmem:[%s5385_s28 + $0x50] sm:$0xff] %v5437_v45  ;;  %v2130_v24 = vpop.permute.xlu2 %2129 }
 0x395   : > { %2203 = vst.msk [vmem:[#allocation2 + $0xb8] sm:$0xff] %vm2179_vm8, %v2130_v24 }
 0x397   : > { %v2812_v52 = vpop.f32.mrf.mxu0 }
 0x398   : > { %2900 = vst [vmem:[%s5385_s28 + $0x20] sm:$0xff] %v2812_v52  ;;  %v2931_v58 = vadd.f32 %v2930_v30, %v2812_v52  ;;  %v2970_v53 = vmul.f32 %v2812_v52, %v2812_v52 }
 0x399   : > { %v2128_v4 = vpop.permute.xlu1 %2127  ;;  %v2673_v2 = vld [vmem:[#allocation2 + $0xd8] sm:$0xff] }
 0x39a   : > { %v3001_v37 = vadd.f32 %v3000_v10, %v2970_v53  ;;  %v2339_v25 = vpop.permute.xlu0 %2338  ;;  %v2667_v60 = vld [vmem:[#allocation2 + $0xa8] sm:$0xff]  ;;  %2202 = vst.msk [vmem:[#allocation2 + $0xb0] sm:$0xff] %vm2179_vm8, %v2128_v4  ;;  %3226 = vmatmul.msk.f32.gmra.mxu3 %vm2683_vm11, %v2673_v2 }
 0x39b   : > { %2420 = vst.msk [vmem:[#allocation2 + $0x78] sm:$0xff] %vm2404_vm9, %v2339_v25  ;;  %3220 = vmatmul.msk.f32.gmra.mxu2 %vm2683_vm11, %v2667_v60 }
 0x39c   : > { %v2367_v34 = vpop.permute.xlu2 %2366 }
 0x3a1   : > { %v2353_v23 = vpop.permute.xlu1 %2352 }
 0x3a2   : > { %v2548_v0 = vpop.permute.xlu0 %2547  ;;  %2427 = vst.msk [vmem:[#allocation2 + $0xb0] sm:$0xff] %vm2404_vm9, %v2353_v23 }
 0x3a3   : > { %2629 = vst.msk [vmem:[#allocation2 + $0x78] sm:$0xff] %vm2613_vm10, %v2548_v0 }
 0x3a4   : > { %v1983_v48 = vpop.permute.xlu2 %1982 }
 0x3a5   : > { %2049 = vst.msk [vmem:[#allocation2 + $0xf0] sm:$0xff] %vm2018_vm7, %v1983_v48 }
 0x3a7   : > { %v5452_v22 = vpop.f32.mrf.mxu2 }
 0x3a8   : > { %2913 = vst [vmem:[%s5385_s28 + $0x88] sm:$0xff] %v5452_v22 }
 0x3a9   : > { %v2574_v32 = vpop.permute.xlu1 %2573 }
 0x3aa   : > { %v2815_v13 = vpop.f32.mrf.mxu0  ;;  %v2562_v11 = vpop.permute.xlu0 %2561  ;;  %v2661_v29 = vld [vmem:[#allocation2 + $0x78] sm:$0xff]  ;;  %2642 = vst.msk [vmem:[#allocation2 + $0xe0] sm:$0xff] %vm2613_vm10, %v2574_v32 }
 0x3ab   : > { %2901 = vst [vmem:[%s5385_s28 + $0x28] sm:$0xff] %v2815_v13  ;;  %v2932_v26 = vadd.f32 %v2931_v58, %v2815_v13  ;;  %v2971_v46 = vmul.f32 %v2815_v13, %v2815_v13  ;;  %3214 = vmatmul.msk.f32.gmra.mxu1 %vm2683_vm11, %v2661_v29 }
 0x3ac   : > { %2636 = vst.msk [vmem:[#allocation2 + $0xb0] sm:$0xff] %vm2613_vm10, %v2562_v11  ;;  %v2578_v12 = vpop.permute.xlu2 %2577 }
 0x3ad   : > { %v3002_v63 = vadd.f32 %v3001_v37, %v2971_v46 }
 0x3b1   : > { %v2355_v20 = vpop.permute.xlu1 %2354  ;;  %v2674_v41 = vld [vmem:[#allocation2 + $0xe0] sm:$0xff] }
 0x3b2   : > { %v2142_v50 = vpop.permute.xlu0 %2141  ;;  %2428 = vst.msk [vmem:[#allocation2 + $0xb8] sm:$0xff] %vm2404_vm9, %v2355_v20  ;;  %3227 = vmatmul.msk.f32.gmra.mxu3 %vm2683_vm11, %v2674_v41 }
 0x3b3   : > { %2209 = vst.msk [vmem:[#allocation2 + $0xe8] sm:$0xff] %vm2179_vm8, %v2142_v50  ;;  %v2668_v49 = vld [vmem:[#allocation2 + $0xb0] sm:$0xff]  ;;  %v2983_v50 = vmul.f32 %v5452_v22, %v5452_v22 }
 0x3b4   : > { %3221 = vmatmul.msk.f32.gmra.mxu2 %vm2683_vm11, %v2668_v49  ;;  %2434 = vst.msk [vmem:[#allocation2 + $0xe8] sm:$0xff] %vm2404_vm9, %v2367_v34  ;;  %v2371_v57 = vpop.permute.xlu2 %2370 }
 0x3b8   : > { %v2833_v55 = vpop.f32.mrf.mxu1 }
 0x3b9   : > { %2907 = vst [vmem:[%s5385_s28 + $0x58] sm:$0xff] %v2833_v55  ;;  %v2576_v21 = vpop.permute.xlu1 %2575  ;;  %v2977_v24 = vmul.f32 %v2833_v55, %v2833_v55 }
 0x3ba   : > { %v2564_v8 = vpop.permute.xlu0 %2563  ;;  %2643 = vst.msk [vmem:[#allocation2 + $0xe8] sm:$0xff] %vm2613_vm10, %v2576_v21 }
 0x3bb   : > { %2637 = vst.msk [vmem:[#allocation2 + $0xb8] sm:$0xff] %vm2613_vm10, %v2564_v8 }
 0x3c1   : > { %v2369_v56 = vpop.permute.xlu1 %2368  ;;  %v2675_v6 = vld [vmem:[#allocation2 + $0xe8] sm:$0xff] }
 0x3c2   : > { %v2144_v47 = vpop.permute.xlu0 %2143  ;;  %v2669_v7 = vld [vmem:[#allocation2 + $0xb8] sm:$0xff]  ;;  %3228 = vmatmul.msk.f32.gmra.mxu3 %vm2683_vm11, %v2675_v6 }
 0x3c3   : > { %2210 = vst.msk [vmem:[#allocation2 + $0xf0] sm:$0xff] %vm2179_vm8, %v2144_v47  ;;  %3222 = vmatmul.msk.f32.gmra.mxu2 %vm2683_vm11, %v2669_v7 }
 0x3c4   : > { %2435 = vst.msk [vmem:[#allocation2 + $0xf0] sm:$0xff] %vm2404_vm9, %v2369_v56 }
 0x3c5   : > { %2644 = vst.msk [vmem:[#allocation2 + $0xf0] sm:$0xff] %vm2613_vm10, %v2578_v12  ;;  %v5473_v18 = vpop.f32.mrf.mxu3 }
 0x3c6   : > { %v5475_v42 = vpop.f32.mrf.mxu2  ;;  %2920 = vst [vmem:[%s5385_s28 + $0xc0] sm:$0xff] %v5473_v18 }
 0x3c7   : > { %2914 = vst [vmem:[%s5385_s28 + $0x90] sm:$0xff] %v5475_v42  ;;  %v2984_v21 = vmul.f32 %v5475_v42, %v5475_v42 }
 0x3c9   : > { %v2146_v62 = vpop.permute.xlu1 %2145 }
 0x3ca   : > { %v2818_v39 = vpop.f32.mrf.mxu0  ;;  %v1985_v3 = vpop.permute.xlu0 %1984 }
 0x3cb   : > { %2902 = vst [vmem:[%s5385_s28 + $0x30] sm:$0xff] %v2818_v39  ;;  %v2933_v40 = vadd.f32 %v2932_v26, %v2818_v39  ;;  %v2972_v43 = vmul.f32 %v2818_v39, %v2818_v39 }
 0x3cc   : > { %2050 = vst.msk [vmem:[#allocation2 + $0xf8] sm:$0xff] %vm2018_vm7, %v1985_v3  ;;  %v2676_v44 = vld [vmem:[#allocation2 + $0xf0] sm:$0xff] }
 0x3cd   : > { %v3003_v61 = vadd.f32 %v3002_v63, %v2972_v43  ;;  %2211 = vst.msk [vmem:[#allocation2 + $0xf8] sm:$0xff] %vm2179_vm8, %v2146_v62  ;;  %3229 = vmatmul.msk.f32.gmra.mxu3 %vm2683_vm11, %v2676_v44  ;;  %v2982_v63 = vmul.f32 %v5432_v54, %v5432_v54 }
 0x3ce   : > { %2436 = vst.msk [vmem:[#allocation2 + $0xf8] sm:$0xff] %vm2404_vm9, %v2371_v57 }
 0x3d2   : > { %v2580_v36 = vpop.permute.xlu0 %2579 }
 0x3d3   : > { %2645 = vst.msk [vmem:[#allocation2 + $0xf8] sm:$0xff] %vm2613_vm10, %v2580_v36 }
 0x3d8   : > { %v2836_v35 = vpop.f32.mrf.mxu1 }
 0x3d9   : > { %2908 = vst [vmem:[%s5385_s28 + $0x60] sm:$0xff] %v2836_v35  ;;  %v2978_v58 = vmul.f32 %v2836_v35, %v2836_v35 }
 0x3da   : > { %v2677_v28 = vld [vmem:[#allocation2 + $0xf8] sm:$0xff] }
 0x3db   : > { %3230 = vmatmul.msk.f32.gmra.mxu3 %vm2683_vm11, %v2677_v28 }
 0x3e6   : > { %v5489_v30 = vpop.f32.mrf.mxu3 }
 0x3e7   : > { %v2857_v27 = vpop.f32.mrf.mxu2  ;;  %2921 = vst [vmem:[%s5385_s28 + $0xc8] sm:$0xff] %v5489_v30 }
 0x3e8   : > { %2915 = vst [vmem:[%s5385_s28 + $0x98] sm:$0xff] %v2857_v27  ;;  %v2985_v12 = vmul.f32 %v2857_v27, %v2857_v27 }
 0x3eb   : > { %v2821_v38 = vpop.f32.mrf.mxu0 }
 0x3ec   : > { %2903 = vst [vmem:[%s5385_s28 + $0x38] sm:$0xff] %v2821_v38  ;;  %v2934_v16 = vadd.f32 %v2933_v40, %v2821_v38  ;;  %v2973_v10 = vmul.f32 %v2821_v38, %v2821_v38  ;;  %v2990_v38 = vmul.f32 %v5473_v18, %v5473_v18 }
 0x3ee   : > { %v2935_v15 = vadd.f32 %v2934_v16, %v5407_v5  ;;  %v3004_v14 = vadd.f32 %v3003_v61, %v2973_v10 }
 0x3f0   : > { %v2936_v51 = vadd.f32 %v2935_v15, %v5416_v9  ;;  %v3005_v19 = vadd.f32 %v3004_v14, %v2974_v17  ;;  %v2991_v17 = vmul.f32 %v5489_v30, %v5489_v30 }
 0x3f2   : > { %v2937_v1 = vadd.f32 %v2936_v51, %v5437_v45  ;;  %v3006_v31 = vadd.f32 %v3005_v19, %v2975_v33 }
 0x3f4   : > { %v3007_v52 = vadd.f32 %v3006_v31, %v2976_v59  ;;  %v2938_v5 = vadd.f32 %v2937_v1, %v2833_v55 }
 0x3f6   : > { %v2939_v53 = vadd.f32 %v2938_v5, %v2836_v35  ;;  %v3008_v4 = vadd.f32 %v3007_v52, %v2977_v24 }
 0x3f8   : > { %v2839_v2 = vpop.f32.mrf.mxu1  ;;  %v3009_v9 = vadd.f32 %v3008_v4, %v2978_v58 }
 0x3f9   : > { %2909 = vst [vmem:[%s5385_s28 + $0x68] sm:$0xff] %v2839_v2  ;;  %v2940_v37 = vadd.f32 %v2939_v53, %v2839_v2  ;;  %v2979_v25 = vmul.f32 %v2839_v2, %v2839_v2 }
 0x3fb   : > { %v3010_v60 = vadd.f32 %v3009_v9, %v2979_v25 }
 0x405   : > { %v2878_v45 = vpop.f32.mrf.mxu3 }
 0x406   : > { %v2860_v34 = vpop.f32.mrf.mxu2  ;;  %2922 = vst [vmem:[%s5385_s28 + $0xd0] sm:$0xff] %v2878_v45  ;;  %v2992_v33 = vmul.f32 %v2878_v45, %v2878_v45 }
 0x407   : > { %2916 = vst [vmem:[%s5385_s28 + $0xa0] sm:$0xff] %v2860_v34 }
 0x410   : > { %v2842_v23 = vpop.f32.mrf.mxu1 }
 0x411   : > { %2910 = vst [vmem:[%s5385_s28 + $0x70] sm:$0xff] %v2842_v23  ;;  %v2980_v32 = vmul.f32 %v2842_v23, %v2842_v23  ;;  %v2941_v13 = vadd.f32 %v2940_v37, %v2842_v23 }
 0x413   : > { %v3011_v29 = vadd.f32 %v3010_v60, %v2980_v32 }
 0x41d   : > { %v2881_v0 = vpop.f32.mrf.mxu3 }
 0x41e   : > { %v2863_v48 = vpop.f32.mrf.mxu2  ;;  %2923 = vst [vmem:[%s5385_s28 + $0xd8] sm:$0xff] %v2881_v0  ;;  %v2993_v31 = vmul.f32 %v2881_v0, %v2881_v0 }
 0x41f   : > { %2917 = vst [vmem:[%s5385_s28 + $0xa8] sm:$0xff] %v2863_v48 }
 0x428   : > { %v2845_v11 = vpop.f32.mrf.mxu1 }
 0x429   : > { %2911 = vst [vmem:[%s5385_s28 + $0x78] sm:$0xff] %v2845_v11  ;;  %v2942_v26 = vadd.f32 %v2941_v13, %v2845_v11  ;;  %v2981_v46 = vmul.f32 %v2845_v11, %v2845_v11 }
 0x42b   : > { %v2943_v20 = vadd.f32 %v2942_v26, %v5432_v54  ;;  %v3012_v41 = vadd.f32 %v3011_v29, %v2981_v46  ;;  %v2986_v54 = vmul.f32 %v2860_v34, %v2860_v34 }
 0x42d   : > { %v2944_v49 = vadd.f32 %v2943_v20, %v5452_v22  ;;  %v3013_v55 = vadd.f32 %v3012_v41, %v2982_v63  ;;  %v2987_v22 = vmul.f32 %v2863_v48, %v2863_v48 }
 0x42f   : > { %v2945_v8 = vadd.f32 %v2944_v49, %v5475_v42  ;;  %v3014_v56 = vadd.f32 %v3013_v55, %v2983_v50 }
 0x431   : > { %v3015_v6 = vadd.f32 %v3014_v56, %v2984_v21  ;;  %v2946_v47 = vadd.f32 %v2945_v8, %v2857_v27 }
 0x433   : > { %v2947_v7 = vadd.f32 %v2946_v47, %v2860_v34  ;;  %v3016_v62 = vadd.f32 %v3015_v6, %v2985_v12 }
 0x435   : > { %v3017_v39 = vadd.f32 %v3016_v62, %v2986_v54  ;;  %v2884_v3 = vpop.f32.mrf.mxu3  ;;  %v2948_v43 = vadd.f32 %v2947_v7, %v2863_v48 }
 0x436   : > { %2924 = vst [vmem:[%s5385_s28 + $0xe0] sm:$0xff] %v2884_v3 }
 0x437   : > { %v2866_v40 = vpop.f32.mrf.mxu2  ;;  %v3018_v44 = vadd.f32 %v3017_v39, %v2987_v22 }
 0x438   : > { %2918 = vst [vmem:[%s5385_s28 + $0xb0] sm:$0xff] %v2866_v40  ;;  %v2988_v57 = vmul.f32 %v2866_v40, %v2866_v40  ;;  %v2949_v61 = vadd.f32 %v2948_v43, %v2866_v40 }
 0x43a   : > { %v3019_v35 = vadd.f32 %v3018_v44, %v2988_v57 }
 0x445   : > { %v2887_v42 = vpop.f32.mrf.mxu3 }
 0x446   : > { %v2869_v36 = vpop.f32.mrf.mxu2  ;;  %2925 = vst [vmem:[%s5385_s28 + $0xe8] sm:$0xff] %v2887_v42  ;;  %v2995_v53 = vmul.f32 %v2887_v42, %v2887_v42 }
 0x447   : > { %2919 = vst [vmem:[%s5385_s28 + $0xb8] sm:$0xff] %v2869_v36  ;;  %v2950_v28 = vadd.f32 %v2949_v61, %v2869_v36  ;;  %v2989_v27 = vmul.f32 %v2869_v36, %v2869_v36 }
 0x449   : > { %v2951_v16 = vadd.f32 %v2950_v28, %v5473_v18  ;;  %v3020_v10 = vadd.f32 %v3019_v35, %v2989_v27  ;;  %v2994_v18 = vmul.f32 %v2884_v3, %v2884_v3 }
 0x44b   : > { %v2952_v15 = vadd.f32 %v2951_v16, %v5489_v30  ;;  %v3021_v14 = vadd.f32 %v3020_v10, %v2990_v38 }
 0x44d   : > { %v2953_v51 = vadd.f32 %v2952_v15, %v2878_v45  ;;  %v3022_v19 = vadd.f32 %v3021_v14, %v2991_v17 }
 0x44f   : > { %v3023_v59 = vadd.f32 %v3022_v19, %v2992_v33  ;;  %v2954_v24 = vadd.f32 %v2953_v51, %v2881_v0 }
 0x450   : > { %v2890_v1 = vpop.f32.mrf.mxu3 }
 0x451   : > { %2926 = vst [vmem:[%s5385_s28 + $0xf0] sm:$0xff] %v2890_v1  ;;  %v3024_v52 = vadd.f32 %v3023_v59, %v2993_v31  ;;  %v2955_v5 = vadd.f32 %v2954_v24, %v2884_v3  ;;  %v2996_v2 = vmul.f32 %v2890_v1, %v2890_v1 }
 0x453   : > { %v3025_v58 = vadd.f32 %v3024_v52, %v2994_v18  ;;  %v2956_v30 = vadd.f32 %v2955_v5, %v2887_v42 }
 0x455   : > { %v3026_v4 = vadd.f32 %v3025_v58, %v2995_v53  ;;  %v2957_v9 = vadd.f32 %v2956_v30, %v2890_v1 }
 0x457   : > { %v3027_v25 = vadd.f32 %v3026_v4, %v2996_v2 }
 0x45e   : > { %v2893_v37 = vpop.f32.mrf.mxu3 }
 0x45f   : > { %2927 = vst [vmem:[%s5385_s28 + $0xf8] sm:$0xff] %v2893_v37  ;;  %v2958_v60 = vadd.f32 %v2957_v9, %v2893_v37  ;;  %v2997_v45 = vmul.f32 %v2893_v37, %v2893_v37 }
 0x460   : > { %3356 = shalt.err (!%p3353_p7)
}
 0x461   : > { %s3449_s28 = smov 128   ;;  %v2959_v34 = vrot.slane %v2958_v60, 4  ;;  %v3028_v23 = vadd.f32 %v3027_v25, %v2997_v45  ;;  %s3197_s8 = sshll.u32 %s3827_s6, 1 }
 0x462   : > { %3257 = dma.vmem_to_hbm [thread:$0]  (%p3509_p5), %s3057_s26, 4096, %s3059_s29, %s3037_s30, %s3449_s28, %s3449_s28, %s3442_s10  }
 0x463   : > { %v2960_v0 = vadd.f32 %v2959_v34, %v2958_v60  ;;  %v3029_v48 = vrot.slane %v3028_v23, 4  ;;  %s3235_s19 = sshll.u32 %s3431_s15, 1  ;;  %s808_s5 = scalar_lea.vmem [#allocation6], %s3197_s8 }
 0x464   : > { %s3072_s4 = scalar_lea.hbm %s5591_s3, %s3235_s19  ;;  %s3074_s10 = sshll.u32 %s808_s5, 4  ;;  %s3075_s10 = int_to_ptr.vmem [resolvable:$true] %s3074_s10 }
 0x465   : > { %v2961_v32 = vrot.slane %v2960_v0, 2  ;;  %v3030_v13 = vadd.f32 %v3029_v48, %v3028_v23  ;;  %s3076_s26 = sshll.u32 %s3072_s4, 4  ;;  %s3042_s15 = scalar_lea.sflag [#allocation7], %s3827_s6  ;;  %s3077_s26 = int_to_ptr.hbm [resolvable:$true] %s3076_s26 }
 0x466   : > { %s3371_s29 = sshra.s32 %s3077_s26, 4  ;;  %s3377_s11 = scalar_lea.hbm %s5591_s3, 4  ;;  %s3372_s29 = int_to_ptr.hbm [resolvable:$true] %s3371_s29 }
 0x467   : > { %v2962_v11 = vadd.f32 %v2961_v32, %v2960_v0  ;;  %v3031_v29 = vrot.slane %v3030_v13, 2  ;;  %s3373_s30 = scalar_lea.hbm %s3372_s29, 2  ;;  %p3378_p13 = scmp.lt.s32.totalorder %s3372_s29, %s5591_s3 }
 0x468   : > { %p3374_p8 = scmp.ne.s32.totalorder %s3372_s29, %s3373_s30  ;;  %p3379_p0 = scmp.lt.s32.totalorder %s3377_s11, %s3373_s30 }
 0x469   : > { %v2963_v26 = vrot.slane %v2962_v11, 1  ;;  %v3032_v46 = vadd.f32 %v3031_v29, %v3030_v13 }
 0x46a   : > { %p3375_p11 = pnand %p3374_p8, %p3509_p5  ;;  %p3380_p1 = por %p3379_p0, %p3378_p13 }
 0x46b   : > { %v2964_v63 = vadd.f32 %v2963_v26, %v2962_v11  ;;  %v3033_v20 = vrot.slane %v3032_v46, 1 }
 0x46c   : > { %p3376_p12 = pneg %p3375_p11 }
 0x46d   : > { %2965 = vst [vmem:[%s808_s5] sm:$0x1] %v2964_v63  ;;  %v3034_v41 = vadd.f32 %v3033_v20, %v3032_v46 }
 0x46e   : > { %p3381_p2 = pnand %p3380_p1, %p3376_p12 }
 0x46f   : > { %3035 = vst [vmem:[%s808_s5 + $0x1] sm:$0x1] %v3034_v41 }
 0x470   : > { %3384 = shalt.err (!%p3381_p2)
}
 0x471   : > { %3258 = dma.vmem_to_hbm [thread:$0]  (%p3509_p5), %s3075_s10, 32, %s3077_s26, %s3042_s15  }
 0x472 PF: > { %s3088_s6 = sand.u32 1, %s3419_s12   ;;  %p3262_p3 = pnand %p3193_p10, %p3520_p9 }
 0x473   : > { %s3089_s28 = scalar_lea.sflag [#allocation5], %s3088_s6 }
 0x474   : > { %p3263_p4 = pneg %p3262_p3 }
 0x476   : > { %3410 = dma.done.wait (%p3263_p4), %s3089_s28, 4096  }
 0x477   : > { %3412 = vsyncadd (%p3263_p4), %s3089_s28, 4294963200  ;;  %s3099_s8 = scalar_lea.sflag [#allocation7], %s3088_s6 }
 0x478   : > { %3414 = dma.done.wait (%p3263_p4), %s3099_s8, 32  }
 0x479   : > { %3416 = vsyncadd (%p3263_p4), %s3099_s8, 4294967264  ;;  %s20_s17 = sadd.s32 1, %s3439_s17   ;;  %s5594_s12 = smov %s3423_s13 }
 0x47a   : > { %p17_p6 = scmp.ge.s32.totalorder %s20_s17, 4   ;;  %s5595_s13 = smov %s3427_s14 }
 0x47b   : > { %s5596_s14 = smov %s3518_s24  ;;  %s5597_s15 = smov %s3435_s16 }
 0x47c   : > { %s5598_s16 = smov %s5600_s20  ;;  %19 = sbr.rel (!%p17_p6) target bundleno = 6 (0x6), region = 123 }
 0x481   :  { %3105 = vsyncpa [#allocation5], 1 }
 0x482   :  { %3107 = vsyncpa [#allocation5 + $0x1], 1 }
 0x483   :  { %3108 = vsyncpa [#allocation7], 1 }
 0x484   :  { %3110 = vsyncpa [#allocation7 + $0x1], 1 }

</bundles_post_ra>
